<compile_context>
chip_gen: v7x
topology: tpu7x:2x2x1
jax: 0.10.0
libtpu: 0.0.40
codegen_flags: <defaults>
</compile_context>

<pallas_src>
import functools

import jax
import jax.numpy as jnp
from jax import lax
from jax.experimental import pallas as pl
from jax.experimental.pallas import tpu as pltpu

_EPS = 1e-5
_LANE = 128


def _round_up(v, m):
    return (v + m - 1) // m * m


# ------------------------------ in-kernel helpers ------------------------------

def _bn_fold(s_sum, s_sq, gamma, beta, m_total):
    """Fold train-mode BatchNorm batch stats into per-channel (scale, shift).

    s_sum / s_sq: (G, 1, C) per-core partial sums; gamma / beta: (1, C)."""
    tot = jnp.sum(s_sum, axis=0)
    tot_sq = jnp.sum(s_sq, axis=0)
    mean = tot / m_total
    var = jnp.maximum(tot_sq / m_total - mean * mean, 0.0)
    scale = lax.rsqrt(var + _EPS) * gamma
    return scale, beta - mean * scale


def _acc_stats(y_f32, s_ref, q_ref):
    s_ref[...] += jnp.sum(y_f32, axis=0).reshape(1, 1, -1)
    q_ref[...] += jnp.sum(y_f32 * y_f32, axis=0).reshape(1, 1, -1)


def _taps_phased(ph_ref, *, s, tb, ho, wo, c):
    """Fused-conv LHS (tb*ho*wo, 9*c) bf16 from a phase-folded padded input.

    ph_ref: (tb, ho+2, wo+2, s*s*c); phase p lives in lanes [p*c, (p+1)*c)."""
    m = tb * ho * wo
    cols = []
    for kh in range(3):
        for kw in range(3):
            p = (kh % s) * s + (kw % s)
            a, b = kh // s, kw // s
            cols.append(ph_ref[:, a:a + ho, b:b + wo,
                               p * c:(p + 1) * c].reshape(m, c))
    return jnp.concatenate(cols, axis=1)


def _taps_padded(pad_ref, *, tb, ho, wo, c):
    """Fused-conv LHS (tb*ho*wo, 9*c) bf16 from a zero-haloed VMEM scratch."""
    m = tb * ho * wo
    cols = []
    for kh in range(3):
        for kw in range(3):
            cols.append(pad_ref[:, kh:kh + ho, kw:kw + wo, :].reshape(m, c))
    return jnp.concatenate(cols, axis=1)


# ---------------------------------- kernels ------------------------------------

def _k1_phased_proj(ph_ref, w1_ref, ws_ref,
                    y1_ref, s1_ref, q1_ref, ysc_ref, ss_ref, qs_ref,
                    *, s, tb, ho, wo, cin):
    """conv1 + 1x1 projection shortcut; per-core BN sum / sumsq accumulation."""
    m = tb * ho * wo

    @pl.when(pl.program_id(1) == 0)
    def _init():
        for r in (s1_ref, q1_ref, ss_ref, qs_ref):
            r[...] = jnp.zeros_like(r)

    a = _taps_phased(ph_ref, s=s, tb=tb, ho=ho, wo=wo, c=cin)
    y1 = jnp.dot(a, w1_ref[...], preferred_element_type=jnp.float32)
    y1_ref[...] = y1.astype(jnp.bfloat16).reshape(y1_ref.shape)
    _acc_stats(y1, s1_ref, q1_ref)

    # 1x1 stride-s shortcut conv: its input is exactly the centre (kh=kw=1) tap.
    p0 = (1 % s) * s + (1 % s)
    c0 = 1 // s
    xs = ph_ref[:, c0:c0 + ho, c0:c0 + wo,
                p0 * cin:(p0 + 1) * cin].reshape(m, cin)
    ysc = jnp.dot(xs, ws_ref[...], preferred_element_type=jnp.float32)
    ysc_ref[...] = ysc.astype(jnp.bfloat16).reshape(ysc_ref.shape)
    _acc_stats(ysc, ss_ref, qs_ref)


def _k1_pad_id(x_ref, w1_ref, y1_ref, s1_ref, q1_ref, pad_ref,
               *, tb, ho, wo, cin):
    """conv1 (stride-1 identity case): 1px halo built in a VMEM scratch."""
    @pl.when(pl.program_id(1) == 0)
    def _init():
        pad_ref[...] = jnp.zeros_like(pad_ref)   # zero the halo once per core
        s1_ref[...] = jnp.zeros_like(s1_ref)
        q1_ref[...] = jnp.zeros_like(q1_ref)

    pad_ref[:, 1:ho + 1, 1:wo + 1, :] = x_ref[...]
    a = _taps_padded(pad_ref, tb=tb, ho=ho, wo=wo, c=cin)
    y1 = jnp.dot(a, w1_ref[...], preferred_element_type=jnp.float32)
    y1_ref[...] = y1.astype(jnp.bfloat16).reshape(y1_ref.shape)
    _acc_stats(y1, s1_ref, q1_ref)


def _k2(y1_ref, s1_ref, q1_ref, g1_ref, b1_ref, w2_ref,
        y2_ref, s2_ref, q2_ref, pad_ref, *, tb, ho, wo, cout, m_total):
    """bn1 (global batch stats) + relu + conv2; per-core bn2 stats."""
    m = tb * ho * wo

    @pl.when(pl.program_id(1) == 0)
    def _init():
        pad_ref[...] = jnp.zeros_like(pad_ref)   # halo; interior rewritten below
        s2_ref[...] = jnp.zeros_like(s2_ref)
        q2_ref[...] = jnp.zeros_like(q2_ref)

    scale, shift = _bn_fold(s1_ref[...], q1_ref[...],
                            g1_ref[...], b1_ref[...], m_total)
    h = y1_ref[...].astype(jnp.float32).reshape(m, cout)
    h = jnp.maximum(h * scale + shift, 0.0).astype(jnp.bfloat16)
    pad_ref[:, 1:ho + 1, 1:wo + 1, :] = h.reshape(tb, ho, wo, cout)

    a = _taps_padded(pad_ref, tb=tb, ho=ho, wo=wo, c=cout)
    y2 = jnp.dot(a, w2_ref[...], preferred_element_type=jnp.float32)
    y2_ref[...] = y2.astype(jnp.bfloat16).reshape(y2_ref.shape)
    _acc_stats(y2, s2_ref, q2_ref)


def _k3_proj(y2_ref, s2_ref, q2_ref, g2_ref, b2_ref,
             ysc_ref, ss_ref, qs_ref, gs_ref, bs_ref, o_ref,
             *, ho, wo, cout, m_total):
    """bn2 + shortcut BN + residual add + relu (fully parallel over images)."""
    m = ho * wo
    sc2, sh2 = _bn_fold(s2_ref[...], q2_ref[...], g2_ref[...], b2_ref[...], m_total)
    scs, shs = _bn_fold(ss_ref[...], qs_ref[...], gs_ref[...], bs_ref[...], m_total)
    y2 = y2_ref[...].astype(jnp.float32).reshape(m, cout)
    sc = ysc_ref[...].astype(jnp.float32).reshape(m, cout)
    out = jnp.maximum(y2 * sc2 + sh2 + (sc * scs + shs), 0.0)
    o_ref[...] = out.reshape(o_ref.shape)


def _k3_id(y2_ref, s2_ref, q2_ref, g2_ref, b2_ref, x_ref, o_ref,
           *, ho, wo, cout, m_total):
    m = ho * wo
    sc2, sh2 = _bn_fold(s2_ref[...], q2_ref[...], g2_ref[...], b2_ref[...], m_total)
    y2 = y2_ref[...].astype(jnp.float32).reshape(m, cout)
    res = x_ref[...].astype(jnp.float32).reshape(m, cout)
    out = jnp.maximum(y2 * sc2 + sh2 + res, 0.0)
    o_ref[...] = out.reshape(o_ref.shape)


# ----------------------------------- wrapper ------------------------------------

@functools.partial(jax.jit, static_argnames=("stride",))
def residual_block_pallas(x_nchw, params, stride):
    x = jnp.transpose(x_nchw, (0, 2, 3, 1))                        # NHWC
    n, h, w, cin = x.shape
    cout = params["w1"].shape[0]
    s = int(stride)
    ho = (h - 1) // s + 1                     # = floor((h + 2 - 3) / s) + 1
    wo = (w - 1) // s + 1
    m_total = float(n * ho * wo)
    has_proj = (s != 1) or (cin != cout)

    # Lane-dense channel padding (multiple of 128 lanes), sliced off at the end.
    cin_p = _round_up(cin, _LANE)
    cout_p = _round_up(cout, _LANE)

    # bf16 activations between passes (MXU consumes bf16; halves HBM traffic).
    xb = jnp.pad(x, ((0, 0), (0, 0), (0, 0), (0, cin_p - cin))).astype(jnp.bfloat16)

    def pad_w(wgt, co_p, ci_p):
        co, ci = wgt.shape[:2]
        return jnp.pad(wgt, ((0, co_p - co), (0, ci_p - ci), (0, 0), (0, 0)))

    def pad_vec(v):
        return jnp.pad(v, (0, cout_p - cout)).reshape(1, cout_p).astype(jnp.float32)

    # Fused conv weights: (kh, kw, cin) flattened along the contraction axis.
    w1c = jnp.transpose(pad_w(params["w1"], cout_p, cin_p),
                        (2, 3, 1, 0)).reshape(9 * cin_p, cout_p).astype(jnp.bfloat16)
    w2c = jnp.transpose(pad_w(params["w2"], cout_p, cout_p),
                        (2, 3, 1, 0)).reshape(9 * cout_p, cout_p).astype(jnp.bfloat16)
    g1, b1 = pad_vec(params["g1"]), pad_vec(params["b1"])
    g2, b2 = pad_vec(params["g2"]), pad_vec(params["b2"])

    # Megacore sharding of the conv passes: (cores, steps) grid, per-core stats.
    gcores = 2 if (n % 2 == 0 and n >= 2) else 1
    per_core = n // gcores

    # Tile TB images per grid step so the matmul M dim is dense (target >= 256)
    # while keeping the double-buffered per-step block footprint modest.
    blk_img_bytes = 4 * (ho + 2) * (wo + 2) * max(cin_p, cout_p) * 2
    tb = 1
    for cand in range(1, per_core + 1):
        if per_core % cand:
            continue
        if cand * blk_img_bytes > (8 << 20):
            break
        tb = cand
        if cand * ho * wo >= 256:
            break
    nb = per_core // tb
    grid12 = (gcores, nb)

    img_spec = pl.BlockSpec((tb, ho, wo, cout_p),
                            lambda g, i: (g * nb + i, 0, 0, 0))
    stat_spec = pl.BlockSpec((1, 1, cout_p), lambda g, i: (g, 0, 0))
    stat_shape = jax.ShapeDtypeStruct((gcores, 1, cout_p), jnp.float32)
    ybf_shape = jax.ShapeDtypeStruct((n, ho, wo, cout_p), jnp.bfloat16)

    def const12(arr):
        return pl.BlockSpec(arr.shape, lambda g, i, nd=arr.ndim: (0,) * nd)

    def const3(arr):
        return pl.BlockSpec(arr.shape, lambda i, nd=arr.ndim: (0,) * nd)

    cp12 = pltpu.CompilerParams(dimension_semantics=("parallel", "arbitrary"),
                                vmem_limit_bytes=32 * 1024 * 1024)
    cp3 = pltpu.CompilerParams(dimension_semantics=("parallel",))

    # ---- pass 1: conv1 (+ projection conv) and their BN sum / sumsq ------------
    if has_proj:
        # Space-to-depth phase fold of the 1px-padded input: every stride-s tap
        # becomes a 128-aligned lane slice; zero duplication in HBM.
        # TODO(synk): for s>1 this pad+phase fold is still one wrapper-side HBM
        # round trip of x; it could move in-kernel like the s==1 path below.
        xp = jnp.pad(xb, ((0, 0), (1, s * (ho + 2) - h - 1),
                          (1, s * (wo + 2) - w - 1), (0, 0)))
        ph = jnp.concatenate(
            [xp[:, a::s, b::s, :] for a in range(s) for b in range(s)], axis=-1)
        ph_spec = pl.BlockSpec((tb, ho + 2, wo + 2, s * s * cin_p),
                               lambda g, i: (g * nb + i, 0, 0, 0))
        wsc = pad_w(params["ws"], cout_p, cin_p)[:, :, 0, 0].T.astype(jnp.bfloat16)
        gs, bs = pad_vec(params["gs"]), pad_vec(params["bs"])

        y1, s1, q1, ysc, ss, qs = pl.pallas_call(
            functools.partial(_k1_phased_proj, s=s, tb=tb, ho=ho, wo=wo, cin=cin_p),
            grid=grid12,
            in_specs=[ph_spec, const12(w1c), const12(wsc)],
            out_specs=(img_spec, stat_spec, stat_spec,
                       img_spec, stat_spec, stat_spec),
            out_shape=(ybf_shape, stat_shape, stat_shape,
                       ybf_shape, stat_shape, stat_shape),
            compiler_params=cp12,
        )(ph, w1c, wsc)
    else:
        # stride-1 identity block: raw x tiles in, halo built in VMEM in-kernel.
        x_spec = pl.BlockSpec((tb, ho, wo, cin_p),
                              lambda g, i: (g * nb + i, 0, 0, 0))
        y1, s1, q1 = pl.pallas_call(
            functools.partial(_k1_pad_id, tb=tb, ho=ho, wo=wo, cin=cin_p),
            grid=grid12,
            in_specs=[x_spec, const12(w1c)],
            out_specs=(img_spec, stat_spec, stat_spec),
            out_shape=(ybf_shape, stat_shape, stat_shape),
            scratch_shapes=[pltpu.VMEM((tb, ho + 2, wo + 2, cin_p), jnp.bfloat16)],
            compiler_params=cp12,
        )(xb, w1c)

    # ---- pass 2: bn1 + relu + conv2 and bn2 sum / sumsq ------------------------
    y2, s2, q2 = pl.pallas_call(
        functools.partial(_k2, tb=tb, ho=ho, wo=wo, cout=cout_p, m_total=m_total),
        grid=grid12,
        in_specs=[img_spec, const12(s1), const12(q1),
                  const12(g1), const12(b1), const12(w2c)],
        out_specs=(img_spec, stat_spec, stat_spec),
        out_shape=(ybf_shape, stat_shape, stat_shape),
        scratch_shapes=[pltpu.VMEM((tb, ho + 2, wo + 2, cout_p), jnp.bfloat16)],
        compiler_params=cp12,
    )(y1, s1, q1, g1, b1, w2c)

    # ---- pass 3: bn2 + shortcut BN + residual add + relu (parallel) ------------
    oimg = pl.BlockSpec((1, ho, wo, cout_p), lambda i: (i, 0, 0, 0))
    out_shape = jax.ShapeDtypeStruct((n, ho, wo, cout_p), jnp.float32)

    if has_proj:
        out = pl.pallas_call(
            functools.partial(_k3_proj, ho=ho, wo=wo, cout=cout_p, m_total=m_total),
            grid=(n,),
            in_specs=[oimg, const3(s2), const3(q2), const3(g2), const3(b2),
                      oimg, const3(ss), const3(qs), const3(gs), const3(bs)],
            out_specs=oimg,
            out_shape=out_shape,
            compiler_params=cp3,
        )(y2, s2, q2, g2, b2, ysc, ss, qs, gs, bs)
    else:
        out = pl.pallas_call(
            functools.partial(_k3_id, ho=ho, wo=wo, cout=cout_p, m_total=m_total),
            grid=(n,),
            in_specs=[oimg, const3(s2), const3(q2), const3(g2), const3(b2), oimg],
            out_specs=oimg,
            out_shape=out_shape,
            compiler_params=cp3,
        )(y2, s2, q2, g2, b2, xb)

    return jnp.transpose(out[..., :cout], (0, 3, 1, 2))            # NCHW


# --------------------------- pure-JAX reference ----------------------------------

def residual_block_ref(x, params, stride):
    def conv(inp, wgt, s, pad):
        return lax.conv_general_dilated(
            inp, wgt, (s, s), [(pad, pad), (pad, pad)],
            dimension_numbers=("NCHW", "OIHW", "NCHW"),
            precision=lax.Precision.HIGHEST)

    def bn(inp, g, b, eps=1e-5):
        mean = jnp.mean(inp, axis=(0, 2, 3), keepdims=True)
        var = jnp.mean((inp - mean) ** 2, axis=(0, 2, 3), keepdims=True)
        return ((inp - mean) * lax.rsqrt(var + eps) * g.reshape(1, -1, 1, 1)
                + b.reshape(1, -1, 1, 1))

    cin = x.shape[1]
    cout = params["w1"].shape[0]
    out = jnp.maximum(bn(conv(x, params["w1"], stride, 1),
                         params["g1"], params["b1"]), 0.0)
    out = bn(conv(out, params["w2"], 1, 1), params["g2"], params["b2"])
    if stride != 1 or cin != cout:
        sc = bn(conv(x, params["ws"], stride, 0), params["gs"], params["bs"])
    else:
        sc = x
    return jnp.maximum(out + sc, 0.0)


# --------------------------------- params ----------------------------------------

def init_params(key, cin, cout, stride):
    k1, k2, k3 = jax.random.split(key, 3)
    p = {
        "w1": 0.1 * jax.random.normal(k1, (cout, cin, 3, 3), jnp.float32),
        "g1": jnp.ones((cout,), jnp.float32),
        "b1": jnp.zeros((cout,), jnp.float32),
        "w2": 0.1 * jax.random.normal(k2, (cout, cout, 3, 3), jnp.float32),
        "g2": jnp.ones((cout,), jnp.float32),
        "b2": jnp.zeros((cout,), jnp.float32),
    }
    if stride != 1 or cin != cout:
        p["ws"] = 0.1 * jax.random.normal(k3, (cout, cin, 1, 1), jnp.float32)
        p["gs"] = jnp.ones((cout,), jnp.float32)
        p["bs"] = jnp.zeros((cout,), jnp.float32)
    return p


# ----------------------------------- main ------------------------------------------

if __name__ == "__main__":
    key = jax.random.PRNGKey(0)
    kx, kp1, kp2 = jax.random.split(key, 3)

    x = jax.random.normal(kx, (2, 4, 16, 16), jnp.float32)   # NCHW, like PyTorch

    # Tolerance reflects bf16 MXU operands / bf16 inter-pass activations
    # (f32 accumulation) vs an f32 reference.
    TOL = 5e-2

    # Case 1: downsampling block (stride=2, 4 -> 8 channels, projection shortcut).
    params_proj = init_params(kp1, 4, 8, 2)
    out_proj = residual_block_pallas(x, params_proj, stride=2)
    jax.block_until_ready(out_proj)
    ref_proj = residual_block_ref(x, params_proj, stride=2)
    assert out_proj.shape == (2, 8, 8, 8)
    assert jnp.allclose(out_proj, ref_proj, atol=TOL, rtol=TOL), (
        float(jnp.max(jnp.abs(out_proj - ref_proj))))

    # Case 2: identity-shortcut block (stride=1, 4 -> 4 channels).
    params_id = init_params(kp2, 4, 4, 1)
    out_id = residual_block_pallas(x, params_id, stride=1)
    jax.block_until_ready(out_id)
    ref_id = residual_block_ref(x, params_id, stride=1)
    assert out_id.shape == (2, 4, 16, 16)
    assert jnp.allclose(out_id, ref_id, atol=TOL, rtol=TOL), (
        float(jnp.max(jnp.abs(out_id - ref_id))))

    print("KERNEL_OK")
</pallas_src>

<mosaic_0001>
module attributes {stable_mosaic.version = 11 : i64} {
  func.func @_k1_phased_proj(%arg0: i32, %arg1: i32, %arg2: memref<1x10x10x512xbf16, #tpu.memory_space<vmem>>, %arg3: memref<1152x128xbf16, #tpu.memory_space<vmem>>, %arg4: memref<128x128xbf16, #tpu.memory_space<vmem>>, %arg5: memref<1x8x8x128xbf16, #tpu.memory_space<vmem>>, %arg6: memref<1x1x128xf32, #tpu.memory_space<vmem>>, %arg7: memref<1x1x128xf32, #tpu.memory_space<vmem>>, %arg8: memref<1x8x8x128xbf16, #tpu.memory_space<vmem>>, %arg9: memref<1x1x128xf32, #tpu.memory_space<vmem>>, %arg10: memref<1x1x128xf32, #tpu.memory_space<vmem>>) attributes {dimension_semantics = [#tpu.dimension_semantics<parallel>, #tpu.dimension_semantics<arbitrary>], iteration_bounds = array<i64: 2, 1>, scalar_prefetch = 0 : i64, scratch_operands = 0 : i64, tpu.core_type = #tpu.core_type<tc>, window_params = [{transform_indices = @transform_0, window_bounds = array<i64: 1, 10, 10, 512>}, {pipeline_mode = #tpu.pipeline_mode<synchronous>, transform_indices = @transform_1, window_bounds = array<i64: 1152, 128>}, {pipeline_mode = #tpu.pipeline_mode<synchronous>, transform_indices = @transform_2, window_bounds = array<i64: 128, 128>}, {transform_indices = @transform_3, window_bounds = array<i64: 1, 8, 8, 128>}, {transform_indices = @transform_4, window_bounds = array<i64: 1, 1, 128>}, {transform_indices = @transform_5, window_bounds = array<i64: 1, 1, 128>}, {transform_indices = @transform_6, window_bounds = array<i64: 1, 8, 8, 128>}, {transform_indices = @transform_7, window_bounds = array<i64: 1, 1, 128>}, {transform_indices = @transform_8, window_bounds = array<i64: 1, 1, 128>}]} {
    %c0_i32 = arith.constant 0 : i32
    %0 = arith.cmpi eq, %arg1, %c0_i32 : i32
    %1 = arith.extui %0 : i1 to i32
    %c0_i32_0 = arith.constant 0 : i32
    %2 = arith.cmpi ne, %1, %c0_i32_0 : i32
    scf.if %2 {
      %cst_77 = arith.constant 0.000000e+00 : f32
      %56 = vector.broadcast %cst_77 : f32 to vector<1x1x128xf32>
      %c0_78 = arith.constant 0 : index
      %c0_79 = arith.constant 0 : index
      %c0_80 = arith.constant 0 : index
      %57 = vector.load %arg6[%c0_78, %c0_79, %c0_80] : memref<1x1x128xf32, #tpu.memory_space<vmem>>, vector<1x1x128xf32>
      tpu.vector_store %arg6[%c0_78, %c0_79, %c0_80], %56 {strides = array<i32>} : memref<1x1x128xf32, #tpu.memory_space<vmem>>, vector<1x1x128xf32>,
      %cst_81 = arith.constant 0.000000e+00 : f32
      %58 = vector.broadcast %cst_81 : f32 to vector<1x1x128xf32>
      %c0_82 = arith.constant 0 : index
      %c0_83 = arith.constant 0 : index
      %c0_84 = arith.constant 0 : index
      %59 = vector.load %arg7[%c0_82, %c0_83, %c0_84] : memref<1x1x128xf32, #tpu.memory_space<vmem>>, vector<1x1x128xf32>
      tpu.vector_store %arg7[%c0_82, %c0_83, %c0_84], %58 {strides = array<i32>} : memref<1x1x128xf32, #tpu.memory_space<vmem>>, vector<1x1x128xf32>,
      %cst_85 = arith.constant 0.000000e+00 : f32
      %60 = vector.broadcast %cst_85 : f32 to vector<1x1x128xf32>
      %c0_86 = arith.constant 0 : index
      %c0_87 = arith.constant 0 : index
      %c0_88 = arith.constant 0 : index
      %61 = vector.load %arg9[%c0_86, %c0_87, %c0_88] : memref<1x1x128xf32, #tpu.memory_space<vmem>>, vector<1x1x128xf32>
      tpu.vector_store %arg9[%c0_86, %c0_87, %c0_88], %60 {strides = array<i32>} : memref<1x1x128xf32, #tpu.memory_space<vmem>>, vector<1x1x128xf32>,
      %cst_89 = arith.constant 0.000000e+00 : f32
      %62 = vector.broadcast %cst_89 : f32 to vector<1x1x128xf32>
      %c0_90 = arith.constant 0 : index
      %c0_91 = arith.constant 0 : index
      %c0_92 = arith.constant 0 : index
      %63 = vector.load %arg10[%c0_90, %c0_91, %c0_92] : memref<1x1x128xf32, #tpu.memory_space<vmem>>, vector<1x1x128xf32>
      tpu.vector_store %arg10[%c0_90, %c0_91, %c0_92], %62 {strides = array<i32>} : memref<1x1x128xf32, #tpu.memory_space<vmem>>, vector<1x1x128xf32>,
    } else {
    }
    %c0 = arith.constant 0 : index
    %c0_1 = arith.constant 0 : index
    %c0_2 = arith.constant 0 : index
    %c0_3 = arith.constant 0 : index
    %3 = vector.load %arg2[%c0, %c0_1, %c0_2, %c0_3] : memref<1x10x10x512xbf16, #tpu.memory_space<vmem>>, vector<1x8x8x128xbf16>
    %4 = vector.shape_cast %3 : vector<1x8x8x128xbf16> to vector<64x128xbf16>
    %c0_4 = arith.constant 0 : index
    %c0_5 = arith.constant 0 : index
    %c0_6 = arith.constant 0 : index
    %c128 = arith.constant 128 : index
    %5 = vector.load %arg2[%c0_4, %c0_5, %c0_6, %c128] : memref<1x10x10x512xbf16, #tpu.memory_space<vmem>>, vector<1x8x8x128xbf16>
    %6 = vector.shape_cast %5 : vector<1x8x8x128xbf16> to vector<64x128xbf16>
    %c0_7 = arith.constant 0 : index
    %c0_8 = arith.constant 0 : index
    %c1 = arith.constant 1 : index
    %c0_9 = arith.constant 0 : index
    %7 = vector.load %arg2[%c0_7, %c0_8, %c1, %c0_9] : memref<1x10x10x512xbf16, #tpu.memory_space<vmem>>, vector<1x8x8x128xbf16>
    %8 = vector.shape_cast %7 : vector<1x8x8x128xbf16> to vector<64x128xbf16>
    %c0_10 = arith.constant 0 : index
    %c0_11 = arith.constant 0 : index
    %c0_12 = arith.constant 0 : index
    %c256 = arith.constant 256 : index
    %9 = vector.load %arg2[%c0_10, %c0_11, %c0_12, %c256] : memref<1x10x10x512xbf16, #tpu.memory_space<vmem>>, vector<1x8x8x128xbf16>
    %10 = vector.shape_cast %9 : vector<1x8x8x128xbf16> to vector<64x128xbf16>
    %c0_13 = arith.constant 0 : index
    %c0_14 = arith.constant 0 : index
    %c0_15 = arith.constant 0 : index
    %c384 = arith.constant 384 : index
    %11 = vector.load %arg2[%c0_13, %c0_14, %c0_15, %c384] : memref<1x10x10x512xbf16, #tpu.memory_space<vmem>>, vector<1x8x8x128xbf16>
    %12 = vector.shape_cast %11 : vector<1x8x8x128xbf16> to vector<64x128xbf16>
    %c0_16 = arith.constant 0 : index
    %c0_17 = arith.constant 0 : index
    %c1_18 = arith.constant 1 : index
    %c256_19 = arith.constant 256 : index
    %13 = vector.load %arg2[%c0_16, %c0_17, %c1_18, %c256_19] : memref<1x10x10x512xbf16, #tpu.memory_space<vmem>>, vector<1x8x8x128xbf16>
    %14 = vector.shape_cast %13 : vector<1x8x8x128xbf16> to vector<64x128xbf16>
    %c0_20 = arith.constant 0 : index
    %c1_21 = arith.constant 1 : index
    %c0_22 = arith.constant 0 : index
    %c0_23 = arith.constant 0 : index
    %15 = vector.load %arg2[%c0_20, %c1_21, %c0_22, %c0_23] : memref<1x10x10x512xbf16, #tpu.memory_space<vmem>>, vector<1x8x8x128xbf16>
    %16 = vector.shape_cast %15 : vector<1x8x8x128xbf16> to vector<64x128xbf16>
    %c0_24 = arith.constant 0 : index
    %c1_25 = arith.constant 1 : index
    %c0_26 = arith.constant 0 : index
    %c128_27 = arith.constant 128 : index
    %17 = vector.load %arg2[%c0_24, %c1_25, %c0_26, %c128_27] : memref<1x10x10x512xbf16, #tpu.memory_space<vmem>>, vector<1x8x8x128xbf16>
    %18 = vector.shape_cast %17 : vector<1x8x8x128xbf16> to vector<64x128xbf16>
    %c0_28 = arith.constant 0 : index
    %c1_29 = arith.constant 1 : index
    %c1_30 = arith.constant 1 : index
    %c0_31 = arith.constant 0 : index
    %19 = vector.load %arg2[%c0_28, %c1_29, %c1_30, %c0_31] : memref<1x10x10x512xbf16, #tpu.memory_space<vmem>>, vector<1x8x8x128xbf16>
    %20 = vector.shape_cast %19 : vector<1x8x8x128xbf16> to vector<64x128xbf16>
    %21 = tpu.concatenate %4, %6, %8, %10, %12, %14, %16, %18, %20 in 1 : vector<64x128xbf16>, vector<64x128xbf16>, vector<64x128xbf16>, vector<64x128xbf16>, vector<64x128xbf16>, vector<64x128xbf16>, vector<64x128xbf16>, vector<64x128xbf16>, vector<64x128xbf16> -> vector<64x1152xbf16>
    %c0_32 = arith.constant 0 : index
    %c0_33 = arith.constant 0 : index
    %22 = vector.load %arg3[%c0_32, %c0_33] : memref<1152x128xbf16, #tpu.memory_space<vmem>>, vector<1152x128xbf16>
    %cst = arith.constant dense<0.000000e+00> : vector<64x128xf32>
    %23 = tpu.matmul %21, %22, %cst {dimension_numbers = #tpu.dot_dimension_numbers<[1], [0], [0], [1], [0, 0, 1, 1], [], []>} : vector<64x1152xbf16>, vector<1152x128xbf16>, vector<64x128xf32> -> vector<64x128xf32>
    %24 = arith.truncf %23 : vector<64x128xf32> to vector<64x128xbf16>
    %25 = vector.shape_cast %24 : vector<64x128xbf16> to vector<1x8x8x128xbf16>
    %c0_34 = arith.constant 0 : index
    %c0_35 = arith.constant 0 : index
    %c0_36 = arith.constant 0 : index
    %c0_37 = arith.constant 0 : index
    %26 = vector.load %arg5[%c0_34, %c0_35, %c0_36, %c0_37] : memref<1x8x8x128xbf16, #tpu.memory_space<vmem>>, vector<1x8x8x128xbf16>
    tpu.vector_store %arg5[%c0_34, %c0_35, %c0_36, %c0_37], %25 {strides = array<i32>} : memref<1x8x8x128xbf16, #tpu.memory_space<vmem>>, vector<1x8x8x128xbf16>,
    %c0_38 = arith.constant 0 : index
    %c0_39 = arith.constant 0 : index
    %c0_40 = arith.constant 0 : index
    %27 = vector.load %arg6[%c0_38, %c0_39, %c0_40] : memref<1x1x128xf32, #tpu.memory_space<vmem>>, vector<1x1x128xf32>
    %cst_41 = arith.constant dense<0.000000e+00> : vector<128xf32>
    %28 = vector.multi_reduction <add>, %23, %cst_41 [0] : vector<64x128xf32> to vector<128xf32>
    %29 = vector.shape_cast %28 : vector<128xf32> to vector<1x1x128xf32>
    %30 = arith.addf %27, %29 : vector<1x1x128xf32>
    %c0_42 = arith.constant 0 : index
    %c0_43 = arith.constant 0 : index
    %c0_44 = arith.constant 0 : index
    %31 = vector.load %arg6[%c0_42, %c0_43, %c0_44] : memref<1x1x128xf32, #tpu.memory_space<vmem>>, vector<1x1x128xf32>
    tpu.vector_store %arg6[%c0_42, %c0_43, %c0_44], %30 {strides = array<i32>} : memref<1x1x128xf32, #tpu.memory_space<vmem>>, vector<1x1x128xf32>,
    %c0_45 = arith.constant 0 : index
    %c0_46 = arith.constant 0 : index
    %c0_47 = arith.constant 0 : index
    %32 = vector.load %arg7[%c0_45, %c0_46, %c0_47] : memref<1x1x128xf32, #tpu.memory_space<vmem>>, vector<1x1x128xf32>
    %33 = arith.mulf %23, %23 : vector<64x128xf32>
    %cst_48 = arith.constant dense<0.000000e+00> : vector<128xf32>
    %34 = vector.multi_reduction <add>, %33, %cst_48 [0] : vector<64x128xf32> to vector<128xf32>
    %35 = vector.shape_cast %34 : vector<128xf32> to vector<1x1x128xf32>
    %36 = arith.addf %32, %35 : vector<1x1x128xf32>
    %c0_49 = arith.constant 0 : index
    %c0_50 = arith.constant 0 : index
    %c0_51 = arith.constant 0 : index
    %37 = vector.load %arg7[%c0_49, %c0_50, %c0_51] : memref<1x1x128xf32, #tpu.memory_space<vmem>>, vector<1x1x128xf32>
    tpu.vector_store %arg7[%c0_49, %c0_50, %c0_51], %36 {strides = array<i32>} : memref<1x1x128xf32, #tpu.memory_space<vmem>>, vector<1x1x128xf32>,
    %c0_52 = arith.constant 0 : index
    %c0_53 = arith.constant 0 : index
    %c0_54 = arith.constant 0 : index
    %c384_55 = arith.constant 384 : index
    %38 = vector.load %arg2[%c0_52, %c0_53, %c0_54, %c384_55] : memref<1x10x10x512xbf16, #tpu.memory_space<vmem>>, vector<1x8x8x128xbf16>
    %39 = vector.shape_cast %38 : vector<1x8x8x128xbf16> to vector<64x128xbf16>
    %c0_56 = arith.constant 0 : index
    %c0_57 = arith.constant 0 : index
    %40 = vector.load %arg4[%c0_56, %c0_57] : memref<128x128xbf16, #tpu.memory_space<vmem>>, vector<128x128xbf16>
    %cst_58 = arith.constant dense<0.000000e+00> : vector<64x128xf32>
    %41 = tpu.matmul %39, %40, %cst_58 {dimension_numbers = #tpu.dot_dimension_numbers<[1], [0], [0], [1], [0, 0, 1, 1], [], []>} : vector<64x128xbf16>, vector<128x128xbf16>, vector<64x128xf32> -> vector<64x128xf32>
    %42 = arith.truncf %41 : vector<64x128xf32> to vector<64x128xbf16>
    %43 = vector.shape_cast %42 : vector<64x128xbf16> to vector<1x8x8x128xbf16>
    %c0_59 = arith.constant 0 : index
    %c0_60 = arith.constant 0 : index
    %c0_61 = arith.constant 0 : index
    %c0_62 = arith.constant 0 : index
    %44 = vector.load %arg8[%c0_59, %c0_60, %c0_61, %c0_62] : memref<1x8x8x128xbf16, #tpu.memory_space<vmem>>, vector<1x8x8x128xbf16>
    tpu.vector_store %arg8[%c0_59, %c0_60, %c0_61, %c0_62], %43 {strides = array<i32>} : memref<1x8x8x128xbf16, #tpu.memory_space<vmem>>, vector<1x8x8x128xbf16>,
    %c0_63 = arith.constant 0 : index
    %c0_64 = arith.constant 0 : index
    %c0_65 = arith.constant 0 : index
    %45 = vector.load %arg9[%c0_63, %c0_64, %c0_65] : memref<1x1x128xf32, #tpu.memory_space<vmem>>, vector<1x1x128xf32>
    %cst_66 = arith.constant dense<0.000000e+00> : vector<128xf32>
    %46 = vector.multi_reduction <add>, %41, %cst_66 [0] : vector<64x128xf32> to vector<128xf32>
    %47 = vector.shape_cast %46 : vector<128xf32> to vector<1x1x128xf32>
    %48 = arith.addf %45, %47 : vector<1x1x128xf32>
    %c0_67 = arith.constant 0 : index
    %c0_68 = arith.constant 0 : index
    %c0_69 = arith.constant 0 : index
    %49 = vector.load %arg9[%c0_67, %c0_68, %c0_69] : memref<1x1x128xf32, #tpu.memory_space<vmem>>, vector<1x1x128xf32>
    tpu.vector_store %arg9[%c0_67, %c0_68, %c0_69], %48 {strides = array<i32>} : memref<1x1x128xf32, #tpu.memory_space<vmem>>, vector<1x1x128xf32>,
    %c0_70 = arith.constant 0 : index
    %c0_71 = arith.constant 0 : index
    %c0_72 = arith.constant 0 : index
    %50 = vector.load %arg10[%c0_70, %c0_71, %c0_72] : memref<1x1x128xf32, #tpu.memory_space<vmem>>, vector<1x1x128xf32>
    %51 = arith.mulf %41, %41 : vector<64x128xf32>
    %cst_73 = arith.constant dense<0.000000e+00> : vector<128xf32>
    %52 = vector.multi_reduction <add>, %51, %cst_73 [0] : vector<64x128xf32> to vector<128xf32>
    %53 = vector.shape_cast %52 : vector<128xf32> to vector<1x1x128xf32>
    %54 = arith.addf %50, %53 : vector<1x1x128xf32>
    %c0_74 = arith.constant 0 : index
    %c0_75 = arith.constant 0 : index
    %c0_76 = arith.constant 0 : index
    %55 = vector.load %arg10[%c0_74, %c0_75, %c0_76] : memref<1x1x128xf32, #tpu.memory_space<vmem>>, vector<1x1x128xf32>
    tpu.vector_store %arg10[%c0_74, %c0_75, %c0_76], %54 {strides = array<i32>} : memref<1x1x128xf32, #tpu.memory_space<vmem>>, vector<1x1x128xf32>,
    return
  }
  func.func @transform_0(%arg0: i32, %arg1: i32) -> (i32, i32, i32, i32) {
    %c1_i32 = arith.constant 1 : i32
    %0 = arith.muli %arg0, %c1_i32 : i32
    %1 = arith.addi %0, %arg1 : i32
    %c0_i32 = arith.constant 0 : i32
    %c0_i32_0 = arith.constant 0 : i32
    %c0_i32_1 = arith.constant 0 : i32
    %c0_i32_2 = arith.constant 0 : i32
    return %1, %c0_i32, %c0_i32_0, %c0_i32_1 : i32, i32, i32, i32
  }
  func.func @transform_1(%arg0: i32, %arg1: i32) -> (i32, i32) {
    %c0_i32 = arith.constant 0 : i32
    %c0_i32_0 = arith.constant 0 : i32
    %c0_i32_1 = arith.constant 0 : i32
    return %c0_i32, %c0_i32_0 : i32, i32
  }
  func.func @transform_2(%arg0: i32, %arg1: i32) -> (i32, i32) {
    %c0_i32 = arith.constant 0 : i32
    %c0_i32_0 = arith.constant 0 : i32
    %c0_i32_1 = arith.constant 0 : i32
    return %c0_i32, %c0_i32_0 : i32, i32
  }
  func.func @transform_3(%arg0: i32, %arg1: i32) -> (i32, i32, i32, i32) {
    %c1_i32 = arith.constant 1 : i32
    %0 = arith.muli %arg0, %c1_i32 : i32
    %1 = arith.addi %0, %arg1 : i32
    %c0_i32 = arith.constant 0 : i32
    %c0_i32_0 = arith.constant 0 : i32
    %c0_i32_1 = arith.constant 0 : i32
    %c0_i32_2 = arith.constant 0 : i32
    return %1, %c0_i32, %c0_i32_0, %c0_i32_1 : i32, i32, i32, i32
  }
  func.func @transform_4(%arg0: i32, %arg1: i32) -> (i32, i32, i32) {
    %c0_i32 = arith.constant 0 : i32
    %c0_i32_0 = arith.constant 0 : i32
    %c0_i32_1 = arith.constant 0 : i32
    return %arg0, %c0_i32, %c0_i32_0 : i32, i32, i32
  }
  func.func @transform_5(%arg0: i32, %arg1: i32) -> (i32, i32, i32) {
    %c0_i32 = arith.constant 0 : i32
    %c0_i32_0 = arith.constant 0 : i32
    %c0_i32_1 = arith.constant 0 : i32
    return %arg0, %c0_i32, %c0_i32_0 : i32, i32, i32
  }
  func.func @transform_6(%arg0: i32, %arg1: i32) -> (i32, i32, i32, i32) {
    %c1_i32 = arith.constant 1 : i32
    %0 = arith.muli %arg0, %c1_i32 : i32
    %1 = arith.addi %0, %arg1 : i32
    %c0_i32 = arith.constant 0 : i32
    %c0_i32_0 = arith.constant 0 : i32
    %c0_i32_1 = arith.constant 0 : i32
    %c0_i32_2 = arith.constant 0 : i32
    return %1, %c0_i32, %c0_i32_0, %c0_i32_1 : i32, i32, i32, i32
  }
  func.func @transform_7(%arg0: i32, %arg1: i32) -> (i32, i32, i32) {
    %c0_i32 = arith.constant 0 : i32
    %c0_i32_0 = arith.constant 0 : i32
    %c0_i32_1 = arith.constant 0 : i32
    return %arg0, %c0_i32, %c0_i32_0 : i32, i32, i32
  }
  func.func @transform_8(%arg0: i32, %arg1: i32) -> (i32, i32, i32) {
    %c0_i32 = arith.constant 0 : i32
    %c0_i32_0 = arith.constant 0 : i32
    %c0_i32_1 = arith.constant 0 : i32
    return %arg0, %c0_i32, %c0_i32_0 : i32, i32, i32
  }
}

module attributes {stable_mosaic.version = 11 : i64} {
  func.func @_k2(%arg0: i32, %arg1: i32, %arg2: memref<1x8x8x128xbf16, #tpu.memory_space<vmem>>, %arg3: memref<2x1x128xf32, #tpu.memory_space<vmem>>, %arg4: memref<2x1x128xf32, #tpu.memory_space<vmem>>, %arg5: memref<1x128xf32, #tpu.memory_space<vmem>>, %arg6: memref<1x128xf32, #tpu.memory_space<vmem>>, %arg7: memref<1152x128xbf16, #tpu.memory_space<vmem>>, %arg8: memref<1x8x8x128xbf16, #tpu.memory_space<vmem>>, %arg9: memref<1x1x128xf32, #tpu.memory_space<vmem>>, %arg10: memref<1x1x128xf32, #tpu.memory_space<vmem>>, %arg11: memref<1x10x10x128xbf16, #tpu.memory_space<vmem>>) attributes {dimension_semantics = [#tpu.dimension_semantics<parallel>, #tpu.dimension_semantics<arbitrary>], iteration_bounds = array<i64: 2, 1>, scalar_prefetch = 0 : i64, scratch_operands = 1 : i64, tpu.core_type = #tpu.core_type<tc>, window_params = [{transform_indices = @transform_0, window_bounds = array<i64: 1, 8, 8, 128>}, {pipeline_mode = #tpu.pipeline_mode<synchronous>, transform_indices = @transform_1, window_bounds = array<i64: 2, 1, 128>}, {pipeline_mode = #tpu.pipeline_mode<synchronous>, transform_indices = @transform_2, window_bounds = array<i64: 2, 1, 128>}, {pipeline_mode = #tpu.pipeline_mode<synchronous>, transform_indices = @transform_3, window_bounds = array<i64: 1, 128>}, {pipeline_mode = #tpu.pipeline_mode<synchronous>, transform_indices = @transform_4, window_bounds = array<i64: 1, 128>}, {pipeline_mode = #tpu.pipeline_mode<synchronous>, transform_indices = @transform_5, window_bounds = array<i64: 1152, 128>}, {transform_indices = @transform_6, window_bounds = array<i64: 1, 8, 8, 128>}, {transform_indices = @transform_7, window_bounds = array<i64: 1, 1, 128>}, {transform_indices = @transform_8, window_bounds = array<i64: 1, 1, 128>}]} {
    %c0_i32 = arith.constant 0 : i32
    %0 = arith.cmpi eq, %arg1, %c0_i32 : i32
    %1 = arith.extui %0 : i1 to i32
    %c0_i32_0 = arith.constant 0 : i32
    %2 = arith.cmpi ne, %1, %c0_i32_0 : i32
    scf.if %2 {
      %cst_79 = arith.constant 0.000000e+00 : bf16
      %70 = vector.broadcast %cst_79 : bf16 to vector<1x10x10x128xbf16>
      %c0_80 = arith.constant 0 : index
      %c0_81 = arith.constant 0 : index
      %c0_82 = arith.constant 0 : index
      %c0_83 = arith.constant 0 : index
      %71 = vector.load %arg11[%c0_80, %c0_81, %c0_82, %c0_83] : memref<1x10x10x128xbf16, #tpu.memory_space<vmem>>, vector<1x10x10x128xbf16>
      tpu.vector_store %arg11[%c0_80, %c0_81, %c0_82, %c0_83], %70 {strides = array<i32>} : memref<1x10x10x128xbf16, #tpu.memory_space<vmem>>, vector<1x10x10x128xbf16>,
      %cst_84 = arith.constant 0.000000e+00 : f32
      %72 = vector.broadcast %cst_84 : f32 to vector<1x1x128xf32>
      %c0_85 = arith.constant 0 : index
      %c0_86 = arith.constant 0 : index
      %c0_87 = arith.constant 0 : index
      %73 = vector.load %arg9[%c0_85, %c0_86, %c0_87] : memref<1x1x128xf32, #tpu.memory_space<vmem>>, vector<1x1x128xf32>
      tpu.vector_store %arg9[%c0_85, %c0_86, %c0_87], %72 {strides = array<i32>} : memref<1x1x128xf32, #tpu.memory_space<vmem>>, vector<1x1x128xf32>,
      %cst_88 = arith.constant 0.000000e+00 : f32
      %74 = vector.broadcast %cst_88 : f32 to vector<1x1x128xf32>
      %c0_89 = arith.constant 0 : index
      %c0_90 = arith.constant 0 : index
      %c0_91 = arith.constant 0 : index
      %75 = vector.load %arg10[%c0_89, %c0_90, %c0_91] : memref<1x1x128xf32, #tpu.memory_space<vmem>>, vector<1x1x128xf32>
      tpu.vector_store %arg10[%c0_89, %c0_90, %c0_91], %74 {strides = array<i32>} : memref<1x1x128xf32, #tpu.memory_space<vmem>>, vector<1x1x128xf32>,
    } else {
    }
    %c0 = arith.constant 0 : index
    %c0_1 = arith.constant 0 : index
    %c0_2 = arith.constant 0 : index
    %3 = vector.load %arg3[%c0, %c0_1, %c0_2] : memref<2x1x128xf32, #tpu.memory_space<vmem>>, vector<2x1x128xf32>
    %c0_3 = arith.constant 0 : index
    %c0_4 = arith.constant 0 : index
    %c0_5 = arith.constant 0 : index
    %4 = vector.load %arg4[%c0_3, %c0_4, %c0_5] : memref<2x1x128xf32, #tpu.memory_space<vmem>>, vector<2x1x128xf32>
    %c0_6 = arith.constant 0 : index
    %c0_7 = arith.constant 0 : index
    %5 = vector.load %arg5[%c0_6, %c0_7] : memref<1x128xf32, #tpu.memory_space<vmem>>, vector<1x128xf32>
    %c0_8 = arith.constant 0 : index
    %c0_9 = arith.constant 0 : index
    %6 = vector.load %arg6[%c0_8, %c0_9] : memref<1x128xf32, #tpu.memory_space<vmem>>, vector<1x128xf32>
    %cst = arith.constant dense<0.000000e+00> : vector<1x128xf32>
    %7 = vector.multi_reduction <add>, %3, %cst [0] : vector<2x1x128xf32> to vector<1x128xf32>
    %cst_10 = arith.constant dense<0.000000e+00> : vector<1x128xf32>
    %8 = vector.multi_reduction <add>, %4, %cst_10 [0] : vector<2x1x128xf32> to vector<1x128xf32>
    %cst_11 = arith.constant 1.280000e+02 : f32
    %9 = vector.broadcast %cst_11 : f32 to vector<1x128xf32>
    %10 = arith.divf %7, %9 : vector<1x128xf32>
    %cst_12 = arith.constant 1.280000e+02 : f32
    %11 = vector.broadcast %cst_12 : f32 to vector<1x128xf32>
    %12 = arith.divf %8, %11 : vector<1x128xf32>
    %13 = arith.mulf %10, %10 : vector<1x128xf32>
    %14 = arith.subf %12, %13 : vector<1x128xf32>
    %cst_13 = arith.constant 0.000000e+00 : f32
    %15 = vector.broadcast %cst_13 : f32 to vector<1x128xf32>
    %16 = arith.maximumf %14, %15 : vector<1x128xf32>
    %cst_14 = arith.constant 9.99999974E-6 : f32
    %17 = vector.broadcast %cst_14 : f32 to vector<1x128xf32>
    %18 = arith.addf %16, %17 : vector<1x128xf32>
    %19 = math.rsqrt %18 : vector<1x128xf32>
    %20 = arith.mulf %19, %5 : vector<1x128xf32>
    %21 = arith.mulf %10, %20 : vector<1x128xf32>
    %22 = arith.subf %6, %21 : vector<1x128xf32>
    %c0_15 = arith.constant 0 : index
    %c0_16 = arith.constant 0 : index
    %c0_17 = arith.constant 0 : index
    %c0_18 = arith.constant 0 : index
    %23 = vector.load %arg2[%c0_15, %c0_16, %c0_17, %c0_18] : memref<1x8x8x128xbf16, #tpu.memory_space<vmem>>, vector<1x8x8x128xbf16>
    %24 = arith.extf %23 : vector<1x8x8x128xbf16> to vector<1x8x8x128xf32>
    %25 = vector.shape_cast %24 : vector<1x8x8x128xf32> to vector<64x128xf32>
    %26 = vector.broadcast %20 : vector<1x128xf32> to vector<64x128xf32>
    %27 = arith.mulf %25, %26 : vector<64x128xf32>
    %28 = vector.broadcast %22 : vector<1x128xf32> to vector<64x128xf32>
    %29 = arith.addf %27, %28 : vector<64x128xf32>
    %cst_19 = arith.constant 0.000000e+00 : f32
    %30 = vector.broadcast %cst_19 : f32 to vector<64x128xf32>
    %31 = arith.maximumf %29, %30 : vector<64x128xf32>
    %32 = arith.truncf %31 : vector<64x128xf32> to vector<64x128xbf16>
    %33 = vector.shape_cast %32 : vector<64x128xbf16> to vector<1x8x8x128xbf16>
    %c0_20 = arith.constant 0 : index
    %c1 = arith.constant 1 : index
    %c1_21 = arith.constant 1 : index
    %c0_22 = arith.constant 0 : index
    %34 = vector.load %arg11[%c0_20, %c1, %c1_21, %c0_22] : memref<1x10x10x128xbf16, #tpu.memory_space<vmem>>, vector<1x8x8x128xbf16>
    tpu.vector_store %arg11[%c0_20, %c1, %c1_21, %c0_22], %33 {strides = array<i32>} : memref<1x10x10x128xbf16, #tpu.memory_space<vmem>>, vector<1x8x8x128xbf16>,
    %c0_23 = arith.constant 0 : index
    %c0_24 = arith.constant 0 : index
    %c0_25 = arith.constant 0 : index
    %c0_26 = arith.constant 0 : index
    %35 = vector.load %arg11[%c0_23, %c0_24, %c0_25, %c0_26] : memref<1x10x10x128xbf16, #tpu.memory_space<vmem>>, vector<1x8x8x128xbf16>
    %36 = vector.shape_cast %35 : vector<1x8x8x128xbf16> to vector<64x128xbf16>
    %c0_27 = arith.constant 0 : index
    %c0_28 = arith.constant 0 : index
    %c1_29 = arith.constant 1 : index
    %c0_30 = arith.constant 0 : index
    %37 = vector.load %arg11[%c0_27, %c0_28, %c1_29, %c0_30] : memref<1x10x10x128xbf16, #tpu.memory_space<vmem>>, vector<1x8x8x128xbf16>
    %38 = vector.shape_cast %37 : vector<1x8x8x128xbf16> to vector<64x128xbf16>
    %c0_31 = arith.constant 0 : index
    %c0_32 = arith.constant 0 : index
    %c2 = arith.constant 2 : index
    %c0_33 = arith.constant 0 : index
    %39 = vector.load %arg11[%c0_31, %c0_32, %c2, %c0_33] : memref<1x10x10x128xbf16, #tpu.memory_space<vmem>>, vector<1x8x8x128xbf16>
    %40 = vector.shape_cast %39 : vector<1x8x8x128xbf16> to vector<64x128xbf16>
    %c0_34 = arith.constant 0 : index
    %c1_35 = arith.constant 1 : index
    %c0_36 = arith.constant 0 : index
    %c0_37 = arith.constant 0 : index
    %41 = vector.load %arg11[%c0_34, %c1_35, %c0_36, %c0_37] : memref<1x10x10x128xbf16, #tpu.memory_space<vmem>>, vector<1x8x8x128xbf16>
    %42 = vector.shape_cast %41 : vector<1x8x8x128xbf16> to vector<64x128xbf16>
    %c0_38 = arith.constant 0 : index
    %c1_39 = arith.constant 1 : index
    %c1_40 = arith.constant 1 : index
    %c0_41 = arith.constant 0 : index
    %43 = vector.load %arg11[%c0_38, %c1_39, %c1_40, %c0_41] : memref<1x10x10x128xbf16, #tpu.memory_space<vmem>>, vector<1x8x8x128xbf16>
    %44 = vector.shape_cast %43 : vector<1x8x8x128xbf16> to vector<64x128xbf16>
    %c0_42 = arith.constant 0 : index
    %c1_43 = arith.constant 1 : index
    %c2_44 = arith.constant 2 : index
    %c0_45 = arith.constant 0 : index
    %45 = vector.load %arg11[%c0_42, %c1_43, %c2_44, %c0_45] : memref<1x10x10x128xbf16, #tpu.memory_space<vmem>>, vector<1x8x8x128xbf16>
    %46 = vector.shape_cast %45 : vector<1x8x8x128xbf16> to vector<64x128xbf16>
    %c0_46 = arith.constant 0 : index
    %c2_47 = arith.constant 2 : index
    %c0_48 = arith.constant 0 : index
    %c0_49 = arith.constant 0 : index
    %47 = vector.load %arg11[%c0_46, %c2_47, %c0_48, %c0_49] : memref<1x10x10x128xbf16, #tpu.memory_space<vmem>>, vector<1x8x8x128xbf16>
    %48 = vector.shape_cast %47 : vector<1x8x8x128xbf16> to vector<64x128xbf16>
    %c0_50 = arith.constant 0 : index
    %c2_51 = arith.constant 2 : index
    %c1_52 = arith.constant 1 : index
    %c0_53 = arith.constant 0 : index
    %49 = vector.load %arg11[%c0_50, %c2_51, %c1_52, %c0_53] : memref<1x10x10x128xbf16, #tpu.memory_space<vmem>>, vector<1x8x8x128xbf16>
    %50 = vector.shape_cast %49 : vector<1x8x8x128xbf16> to vector<64x128xbf16>
    %c0_54 = arith.constant 0 : index
    %c2_55 = arith.constant 2 : index
    %c2_56 = arith.constant 2 : index
    %c0_57 = arith.constant 0 : index
    %51 = vector.load %arg11[%c0_54, %c2_55, %c2_56, %c0_57] : memref<1x10x10x128xbf16, #tpu.memory_space<vmem>>, vector<1x8x8x128xbf16>
    %52 = vector.shape_cast %51 : vector<1x8x8x128xbf16> to vector<64x128xbf16>
    %53 = tpu.concatenate %36, %38, %40, %42, %44, %46, %48, %50, %52 in 1 : vector<64x128xbf16>, vector<64x128xbf16>, vector<64x128xbf16>, vector<64x128xbf16>, vector<64x128xbf16>, vector<64x128xbf16>, vector<64x128xbf16>, vector<64x128xbf16>, vector<64x128xbf16> -> vector<64x1152xbf16>
    %c0_58 = arith.constant 0 : index
    %c0_59 = arith.constant 0 : index
    %54 = vector.load %arg7[%c0_58, %c0_59] : memref<1152x128xbf16, #tpu.memory_space<vmem>>, vector<1152x128xbf16>
    %cst_60 = arith.constant dense<0.000000e+00> : vector<64x128xf32>
    %55 = tpu.matmul %53, %54, %cst_60 {dimension_numbers = #tpu.dot_dimension_numbers<[1], [0], [0], [1], [0, 0, 1, 1], [], []>} : vector<64x1152xbf16>, vector<1152x128xbf16>, vector<64x128xf32> -> vector<64x128xf32>
    %56 = arith.truncf %55 : vector<64x128xf32> to vector<64x128xbf16>
    %57 = vector.shape_cast %56 : vector<64x128xbf16> to vector<1x8x8x128xbf16>
    %c0_61 = arith.constant 0 : index
    %c0_62 = arith.constant 0 : index
    %c0_63 = arith.constant 0 : index
    %c0_64 = arith.constant 0 : index
    %58 = vector.load %arg8[%c0_61, %c0_62, %c0_63, %c0_64] : memref<1x8x8x128xbf16, #tpu.memory_space<vmem>>, vector<1x8x8x128xbf16>
    tpu.vector_store %arg8[%c0_61, %c0_62, %c0_63, %c0_64], %57 {strides = array<i32>} : memref<1x8x8x128xbf16, #tpu.memory_space<vmem>>, vector<1x8x8x128xbf16>,
    %c0_65 = arith.constant 0 : index
    %c0_66 = arith.constant 0 : index
    %c0_67 = arith.constant 0 : index
    %59 = vector.load %arg9[%c0_65, %c0_66, %c0_67] : memref<1x1x128xf32, #tpu.memory_space<vmem>>, vector<1x1x128xf32>
    %cst_68 = arith.constant dense<0.000000e+00> : vector<128xf32>
    %60 = vector.multi_reduction <add>, %55, %cst_68 [0] : vector<64x128xf32> to vector<128xf32>
    %61 = vector.shape_cast %60 : vector<128xf32> to vector<1x1x128xf32>
    %62 = arith.addf %59, %61 : vector<1x1x128xf32>
    %c0_69 = arith.constant 0 : index
    %c0_70 = arith.constant 0 : index
    %c0_71 = arith.constant 0 : index
    %63 = vector.load %arg9[%c0_69, %c0_70, %c0_71] : memref<1x1x128xf32, #tpu.memory_space<vmem>>, vector<1x1x128xf32>
    tpu.vector_store %arg9[%c0_69, %c0_70, %c0_71], %62 {strides = array<i32>} : memref<1x1x128xf32, #tpu.memory_space<vmem>>, vector<1x1x128xf32>,
    %c0_72 = arith.constant 0 : index
    %c0_73 = arith.constant 0 : index
    %c0_74 = arith.constant 0 : index
    %64 = vector.load %arg10[%c0_72, %c0_73, %c0_74] : memref<1x1x128xf32, #tpu.memory_space<vmem>>, vector<1x1x128xf32>
    %65 = arith.mulf %55, %55 : vector<64x128xf32>
    %cst_75 = arith.constant dense<0.000000e+00> : vector<128xf32>
    %66 = vector.multi_reduction <add>, %65, %cst_75 [0] : vector<64x128xf32> to vector<128xf32>
    %67 = vector.shape_cast %66 : vector<128xf32> to vector<1x1x128xf32>
    %68 = arith.addf %64, %67 : vector<1x1x128xf32>
    %c0_76 = arith.constant 0 : index
    %c0_77 = arith.constant 0 : index
    %c0_78 = arith.constant 0 : index
    %69 = vector.load %arg10[%c0_76, %c0_77, %c0_78] : memref<1x1x128xf32, #tpu.memory_space<vmem>>, vector<1x1x128xf32>
    tpu.vector_store %arg10[%c0_76, %c0_77, %c0_78], %68 {strides = array<i32>} : memref<1x1x128xf32, #tpu.memory_space<vmem>>, vector<1x1x128xf32>,
    return
  }
  func.func @transform_0(%arg0: i32, %arg1: i32) -> (i32, i32, i32, i32) {
    %c1_i32 = arith.constant 1 : i32
    %0 = arith.muli %arg0, %c1_i32 : i32
    %1 = arith.addi %0, %arg1 : i32
    %c0_i32 = arith.constant 0 : i32
    %c0_i32_0 = arith.constant 0 : i32
    %c0_i32_1 = arith.constant 0 : i32
    %c0_i32_2 = arith.constant 0 : i32
    return %1, %c0_i32, %c0_i32_0, %c0_i32_1 : i32, i32, i32, i32
  }
  func.func @transform_1(%arg0: i32, %arg1: i32) -> (i32, i32, i32) {
    %c0_i32 = arith.constant 0 : i32
    %c0_i32_0 = arith.constant 0 : i32
    %c0_i32_1 = arith.constant 0 : i32
    %c0_i32_2 = arith.constant 0 : i32
    return %c0_i32, %c0_i32_0, %c0_i32_1 : i32, i32, i32
  }
  func.func @transform_2(%arg0: i32, %arg1: i32) -> (i32, i32, i32) {
    %c0_i32 = arith.constant 0 : i32
    %c0_i32_0 = arith.constant 0 : i32
    %c0_i32_1 = arith.constant 0 : i32
    %c0_i32_2 = arith.constant 0 : i32
    return %c0_i32, %c0_i32_0, %c0_i32_1 : i32, i32, i32
  }
  func.func @transform_3(%arg0: i32, %arg1: i32) -> (i32, i32) {
    %c0_i32 = arith.constant 0 : i32
    %c0_i32_0 = arith.constant 0 : i32
    %c0_i32_1 = arith.constant 0 : i32
    return %c0_i32, %c0_i32_0 : i32, i32
  }
  func.func @transform_4(%arg0: i32, %arg1: i32) -> (i32, i32) {
    %c0_i32 = arith.constant 0 : i32
    %c0_i32_0 = arith.constant 0 : i32
    %c0_i32_1 = arith.constant 0 : i32
    return %c0_i32, %c0_i32_0 : i32, i32
  }
  func.func @transform_5(%arg0: i32, %arg1: i32) -> (i32, i32) {
    %c0_i32 = arith.constant 0 : i32
    %c0_i32_0 = arith.constant 0 : i32
    %c0_i32_1 = arith.constant 0 : i32
    return %c0_i32, %c0_i32_0 : i32, i32
  }
  func.func @transform_6(%arg0: i32, %arg1: i32) -> (i32, i32, i32, i32) {
    %c1_i32 = arith.constant 1 : i32
    %0 = arith.muli %arg0, %c1_i32 : i32
    %1 = arith.addi %0, %arg1 : i32
    %c0_i32 = arith.constant 0 : i32
    %c0_i32_0 = arith.constant 0 : i32
    %c0_i32_1 = arith.constant 0 : i32
    %c0_i32_2 = arith.constant 0 : i32
    return %1, %c0_i32, %c0_i32_0, %c0_i32_1 : i32, i32, i32, i32
  }
  func.func @transform_7(%arg0: i32, %arg1: i32) -> (i32, i32, i32) {
    %c0_i32 = arith.constant 0 : i32
    %c0_i32_0 = arith.constant 0 : i32
    %c0_i32_1 = arith.constant 0 : i32
    return %arg0, %c0_i32, %c0_i32_0 : i32, i32, i32
  }
  func.func @transform_8(%arg0: i32, %arg1: i32) -> (i32, i32, i32) {
    %c0_i32 = arith.constant 0 : i32
    %c0_i32_0 = arith.constant 0 : i32
    %c0_i32_1 = arith.constant 0 : i32
    return %arg0, %c0_i32, %c0_i32_0 : i32, i32, i32
  }
}

module attributes {stable_mosaic.version = 11 : i64} {
  func.func @_k3_proj(%arg0: i32, %arg1: memref<1x8x8x128xbf16, #tpu.memory_space<vmem>>, %arg2: memref<2x1x128xf32, #tpu.memory_space<vmem>>, %arg3: memref<2x1x128xf32, #tpu.memory_space<vmem>>, %arg4: memref<1x128xf32, #tpu.memory_space<vmem>>, %arg5: memref<1x128xf32, #tpu.memory_space<vmem>>, %arg6: memref<1x8x8x128xbf16, #tpu.memory_space<vmem>>, %arg7: memref<2x1x128xf32, #tpu.memory_space<vmem>>, %arg8: memref<2x1x128xf32, #tpu.memory_space<vmem>>, %arg9: memref<1x128xf32, #tpu.memory_space<vmem>>, %arg10: memref<1x128xf32, #tpu.memory_space<vmem>>, %arg11: memref<1x8x8x128xf32, #tpu.memory_space<vmem>>) attributes {dimension_semantics = [#tpu.dimension_semantics<parallel>], iteration_bounds = array<i64: 2>, scalar_prefetch = 0 : i64, scratch_operands = 0 : i64, tpu.core_type = #tpu.core_type<tc>, window_params = [{transform_indices = @transform_0, window_bounds = array<i64: 1, 8, 8, 128>}, {pipeline_mode = #tpu.pipeline_mode<synchronous>, transform_indices = @transform_1, window_bounds = array<i64: 2, 1, 128>}, {pipeline_mode = #tpu.pipeline_mode<synchronous>, transform_indices = @transform_2, window_bounds = array<i64: 2, 1, 128>}, {pipeline_mode = #tpu.pipeline_mode<synchronous>, transform_indices = @transform_3, window_bounds = array<i64: 1, 128>}, {pipeline_mode = #tpu.pipeline_mode<synchronous>, transform_indices = @transform_4, window_bounds = array<i64: 1, 128>}, {transform_indices = @transform_5, window_bounds = array<i64: 1, 8, 8, 128>}, {pipeline_mode = #tpu.pipeline_mode<synchronous>, transform_indices = @transform_6, window_bounds = array<i64: 2, 1, 128>}, {pipeline_mode = #tpu.pipeline_mode<synchronous>, transform_indices = @transform_7, window_bounds = array<i64: 2, 1, 128>}, {pipeline_mode = #tpu.pipeline_mode<synchronous>, transform_indices = @transform_8, window_bounds = array<i64: 1, 128>}, {pipeline_mode = #tpu.pipeline_mode<synchronous>, transform_indices = @transform_9, window_bounds = array<i64: 1, 128>}, {transform_indices = @transform_10, window_bounds = array<i64: 1, 8, 8, 128>}]} {
    %c0 = arith.constant 0 : index
    %c0_0 = arith.constant 0 : index
    %c0_1 = arith.constant 0 : index
    %0 = vector.load %arg2[%c0, %c0_0, %c0_1] : memref<2x1x128xf32, #tpu.memory_space<vmem>>, vector<2x1x128xf32>
    %c0_2 = arith.constant 0 : index
    %c0_3 = arith.constant 0 : index
    %c0_4 = arith.constant 0 : index
    %1 = vector.load %arg3[%c0_2, %c0_3, %c0_4] : memref<2x1x128xf32, #tpu.memory_space<vmem>>, vector<2x1x128xf32>
    %c0_5 = arith.constant 0 : index
    %c0_6 = arith.constant 0 : index
    %2 = vector.load %arg4[%c0_5, %c0_6] : memref<1x128xf32, #tpu.memory_space<vmem>>, vector<1x128xf32>
    %c0_7 = arith.constant 0 : index
    %c0_8 = arith.constant 0 : index
    %3 = vector.load %arg5[%c0_7, %c0_8] : memref<1x128xf32, #tpu.memory_space<vmem>>, vector<1x128xf32>
    %cst = arith.constant dense<0.000000e+00> : vector<1x128xf32>
    %4 = vector.multi_reduction <add>, %0, %cst [0] : vector<2x1x128xf32> to vector<1x128xf32>
    %cst_9 = arith.constant dense<0.000000e+00> : vector<1x128xf32>
    %5 = vector.multi_reduction <add>, %1, %cst_9 [0] : vector<2x1x128xf32> to vector<1x128xf32>
    %cst_10 = arith.constant 1.280000e+02 : f32
    %6 = vector.broadcast %cst_10 : f32 to vector<1x128xf32>
    %7 = arith.divf %4, %6 : vector<1x128xf32>
    %cst_11 = arith.constant 1.280000e+02 : f32
    %8 = vector.broadcast %cst_11 : f32 to vector<1x128xf32>
    %9 = arith.divf %5, %8 : vector<1x128xf32>
    %10 = arith.mulf %7, %7 : vector<1x128xf32>
    %11 = arith.subf %9, %10 : vector<1x128xf32>
    %cst_12 = arith.constant 0.000000e+00 : f32
    %12 = vector.broadcast %cst_12 : f32 to vector<1x128xf32>
    %13 = arith.maximumf %11, %12 : vector<1x128xf32>
    %cst_13 = arith.constant 9.99999974E-6 : f32
    %14 = vector.broadcast %cst_13 : f32 to vector<1x128xf32>
    %15 = arith.addf %13, %14 : vector<1x128xf32>
    %16 = math.rsqrt %15 : vector<1x128xf32>
    %17 = arith.mulf %16, %2 : vector<1x128xf32>
    %18 = arith.mulf %7, %17 : vector<1x128xf32>
    %19 = arith.subf %3, %18 : vector<1x128xf32>
    %c0_14 = arith.constant 0 : index
    %c0_15 = arith.constant 0 : index
    %c0_16 = arith.constant 0 : index
    %20 = vector.load %arg7[%c0_14, %c0_15, %c0_16] : memref<2x1x128xf32, #tpu.memory_space<vmem>>, vector<2x1x128xf32>
    %c0_17 = arith.constant 0 : index
    %c0_18 = arith.constant 0 : index
    %c0_19 = arith.constant 0 : index
    %21 = vector.load %arg8[%c0_17, %c0_18, %c0_19] : memref<2x1x128xf32, #tpu.memory_space<vmem>>, vector<2x1x128xf32>
    %c0_20 = arith.constant 0 : index
    %c0_21 = arith.constant 0 : index
    %22 = vector.load %arg9[%c0_20, %c0_21] : memref<1x128xf32, #tpu.memory_space<vmem>>, vector<1x128xf32>
    %c0_22 = arith.constant 0 : index
    %c0_23 = arith.constant 0 : index
    %23 = vector.load %arg10[%c0_22, %c0_23] : memref<1x128xf32, #tpu.memory_space<vmem>>, vector<1x128xf32>
    %cst_24 = arith.constant dense<0.000000e+00> : vector<1x128xf32>
    %24 = vector.multi_reduction <add>, %20, %cst_24 [0] : vector<2x1x128xf32> to vector<1x128xf32>
    %cst_25 = arith.constant dense<0.000000e+00> : vector<1x128xf32>
    %25 = vector.multi_reduction <add>, %21, %cst_25 [0] : vector<2x1x128xf32> to vector<1x128xf32>
    %cst_26 = arith.constant 1.280000e+02 : f32
    %26 = vector.broadcast %cst_26 : f32 to vector<1x128xf32>
    %27 = arith.divf %24, %26 : vector<1x128xf32>
    %cst_27 = arith.constant 1.280000e+02 : f32
    %28 = vector.broadcast %cst_27 : f32 to vector<1x128xf32>
    %29 = arith.divf %25, %28 : vector<1x128xf32>
    %30 = arith.mulf %27, %27 : vector<1x128xf32>
    %31 = arith.subf %29, %30 : vector<1x128xf32>
    %cst_28 = arith.constant 0.000000e+00 : f32
    %32 = vector.broadcast %cst_28 : f32 to vector<1x128xf32>
    %33 = arith.maximumf %31, %32 : vector<1x128xf32>
    %cst_29 = arith.constant 9.99999974E-6 : f32
    %34 = vector.broadcast %cst_29 : f32 to vector<1x128xf32>
    %35 = arith.addf %33, %34 : vector<1x128xf32>
    %36 = math.rsqrt %35 : vector<1x128xf32>
    %37 = arith.mulf %36, %22 : vector<1x128xf32>
    %38 = arith.mulf %27, %37 : vector<1x128xf32>
    %39 = arith.subf %23, %38 : vector<1x128xf32>
    %c0_30 = arith.constant 0 : index
    %c0_31 = arith.constant 0 : index
    %c0_32 = arith.constant 0 : index
    %c0_33 = arith.constant 0 : index
    %40 = vector.load %arg1[%c0_30, %c0_31, %c0_32, %c0_33] : memref<1x8x8x128xbf16, #tpu.memory_space<vmem>>, vector<1x8x8x128xbf16>
    %41 = arith.extf %40 : vector<1x8x8x128xbf16> to vector<1x8x8x128xf32>
    %42 = vector.shape_cast %41 : vector<1x8x8x128xf32> to vector<64x128xf32>
    %c0_34 = arith.constant 0 : index
    %c0_35 = arith.constant 0 : index
    %c0_36 = arith.constant 0 : index
    %c0_37 = arith.constant 0 : index
    %43 = vector.load %arg6[%c0_34, %c0_35, %c0_36, %c0_37] : memref<1x8x8x128xbf16, #tpu.memory_space<vmem>>, vector<1x8x8x128xbf16>
    %44 = arith.extf %43 : vector<1x8x8x128xbf16> to vector<1x8x8x128xf32>
    %45 = vector.shape_cast %44 : vector<1x8x8x128xf32> to vector<64x128xf32>
    %46 = vector.broadcast %17 : vector<1x128xf32> to vector<64x128xf32>
    %47 = arith.mulf %42, %46 : vector<64x128xf32>
    %48 = vector.broadcast %19 : vector<1x128xf32> to vector<64x128xf32>
    %49 = arith.addf %47, %48 : vector<64x128xf32>
    %50 = vector.broadcast %37 : vector<1x128xf32> to vector<64x128xf32>
    %51 = arith.mulf %45, %50 : vector<64x128xf32>
    %52 = vector.broadcast %39 : vector<1x128xf32> to vector<64x128xf32>
    %53 = arith.addf %51, %52 : vector<64x128xf32>
    %54 = arith.addf %49, %53 : vector<64x128xf32>
    %cst_38 = arith.constant 0.000000e+00 : f32
    %55 = vector.broadcast %cst_38 : f32 to vector<64x128xf32>
    %56 = arith.maximumf %54, %55 : vector<64x128xf32>
    %57 = vector.shape_cast %56 : vector<64x128xf32> to vector<1x8x8x128xf32>
    %c0_39 = arith.constant 0 : index
    %c0_40 = arith.constant 0 : index
    %c0_41 = arith.constant 0 : index
    %c0_42 = arith.constant 0 : index
    %58 = vector.load %arg11[%c0_39, %c0_40, %c0_41, %c0_42] : memref<1x8x8x128xf32, #tpu.memory_space<vmem>>, vector<1x8x8x128xf32>
    tpu.vector_store %arg11[%c0_39, %c0_40, %c0_41, %c0_42], %57 {strides = array<i32>} : memref<1x8x8x128xf32, #tpu.memory_space<vmem>>, vector<1x8x8x128xf32>,
    return
  }
  func.func @transform_0(%arg0: i32) -> (i32, i32, i32, i32) {
    %c0_i32 = arith.constant 0 : i32
    %c0_i32_0 = arith.constant 0 : i32
    %c0_i32_1 = arith.constant 0 : i32
    %c0_i32_2 = arith.constant 0 : i32
    return %arg0, %c0_i32, %c0_i32_0, %c0_i32_1 : i32, i32, i32, i32
  }
  func.func @transform_1(%arg0: i32) -> (i32, i32, i32) {
    %c0_i32 = arith.constant 0 : i32
    %c0_i32_0 = arith.constant 0 : i32
    %c0_i32_1 = arith.constant 0 : i32
    %c0_i32_2 = arith.constant 0 : i32
    return %c0_i32, %c0_i32_0, %c0_i32_1 : i32, i32, i32
  }
  func.func @transform_2(%arg0: i32) -> (i32, i32, i32) {
    %c0_i32 = arith.constant 0 : i32
    %c0_i32_0 = arith.constant 0 : i32
    %c0_i32_1 = arith.constant 0 : i32
    %c0_i32_2 = arith.constant 0 : i32
    return %c0_i32, %c0_i32_0, %c0_i32_1 : i32, i32, i32
  }
  func.func @transform_3(%arg0: i32) -> (i32, i32) {
    %c0_i32 = arith.constant 0 : i32
    %c0_i32_0 = arith.constant 0 : i32
    %c0_i32_1 = arith.constant 0 : i32
    return %c0_i32, %c0_i32_0 : i32, i32
  }
  func.func @transform_4(%arg0: i32) -> (i32, i32) {
    %c0_i32 = arith.constant 0 : i32
    %c0_i32_0 = arith.constant 0 : i32
    %c0_i32_1 = arith.constant 0 : i32
    return %c0_i32, %c0_i32_0 : i32, i32
  }
  func.func @transform_5(%arg0: i32) -> (i32, i32, i32, i32) {
    %c0_i32 = arith.constant 0 : i32
    %c0_i32_0 = arith.constant 0 : i32
    %c0_i32_1 = arith.constant 0 : i32
    %c0_i32_2 = arith.constant 0 : i32
    return %arg0, %c0_i32, %c0_i32_0, %c0_i32_1 : i32, i32, i32, i32
  }
  func.func @transform_6(%arg0: i32) -> (i32, i32, i32) {
    %c0_i32 = arith.constant 0 : i32
    %c0_i32_0 = arith.constant 0 : i32
    %c0_i32_1 = arith.constant 0 : i32
    %c0_i32_2 = arith.constant 0 : i32
    return %c0_i32, %c0_i32_0, %c0_i32_1 : i32, i32, i32
  }
  func.func @transform_7(%arg0: i32) -> (i32, i32, i32) {
    %c0_i32 = arith.constant 0 : i32
    %c0_i32_0 = arith.constant 0 : i32
    %c0_i32_1 = arith.constant 0 : i32
    %c0_i32_2 = arith.constant 0 : i32
    return %c0_i32, %c0_i32_0, %c0_i32_1 : i32, i32, i32
  }
  func.func @transform_8(%arg0: i32) -> (i32, i32) {
    %c0_i32 = arith.constant 0 : i32
    %c0_i32_0 = arith.constant 0 : i32
    %c0_i32_1 = arith.constant 0 : i32
    return %c0_i32, %c0_i32_0 : i32, i32
  }
  func.func @transform_9(%arg0: i32) -> (i32, i32) {
    %c0_i32 = arith.constant 0 : i32
    %c0_i32_0 = arith.constant 0 : i32
    %c0_i32_1 = arith.constant 0 : i32
    return %c0_i32, %c0_i32_0 : i32, i32
  }
  func.func @transform_10(%arg0: i32) -> (i32, i32, i32, i32) {
    %c0_i32 = arith.constant 0 : i32
    %c0_i32_0 = arith.constant 0 : i32
    %c0_i32_1 = arith.constant 0 : i32
    %c0_i32_2 = arith.constant 0 : i32
    return %arg0, %c0_i32, %c0_i32_0, %c0_i32_1 : i32, i32, i32, i32
  }
}

</mosaic_0001>

<bundles_post_ra>
// kernel: residual_block_pallas.5
= control target key start
LH: loop header
LB: loop body
LE: loop exit
PB: predicated region body
PF: predicated region fallthrough
CT: control target
= control target key end

     0   :  { %s730_s13 = smov 0   ;;  %s802_s0 = inlined_call_operand.vmem [shape: bf16[2,8,8,128], index: 0, kind: input, shape index: {}]   ;;  %s803_s1 = inlined_call_operand.vmem [shape: f32[2,1,128], index: 1, kind: input, shape index: {}]   ;;  %s804_s2 = inlined_call_operand.vmem [shape: f32[2,1,128], index: 2, kind: input, shape index: {}]   ;;  %s805_s3 = inlined_call_operand.vmem [shape: f32[1,128], index: 3, kind: input, shape index: {}]   ;;  %s806_s4 = inlined_call_operand.vmem [shape: f32[1,128], index: 4, kind: input, shape index: {}]   ;;  %s807_s5 = inlined_call_operand.vmem [shape: bf16[2,8,8,128], index: 5, kind: input, shape index: {}]   ;;  %s808_s6 = inlined_call_operand.vmem [shape: f32[2,1,128], index: 6, kind: input, shape index: {}]   ;;  %s809_s7 = inlined_call_operand.vmem [shape: f32[2,1,128], index: 7, kind: input, shape index: {}]   ;;  %s810_s8 = inlined_call_operand.vmem [shape: f32[1,128], index: 8, kind: input, shape index: {}]   ;;  %s811_s9 = inlined_call_operand.vmem [shape: f32[1,128], index: 9, kind: input, shape index: {}]   ;;  %s812_s10 = inlined_call_operand.vmem [shape: f32[2,8,8,128], index: 10, kind: output, shape index: {}]  }
   0x1 LB: > { %s601_s14 = sadd.s32 4294967295, %s673_s13   ;;  %p605_p0 = scmp.ge.s32.totalorder %s673_s13, 1  ;;  %s673_s13 = sphi %s730_s13, %s20_s13  }
   0x2   : > { %p322_p1 = scmp.lt.s32.totalorder %s673_s13, 3 }
   0x4   : > { %p323_p2 = pnand %p605_p0, %p322_p1 }
   0x5   : > { %v380_v0 = vld [vmem:[%s803_s1] sm:$0x1] (!%p323_p2)  ;;  %v381_v1 = vld [vmem:[%s803_s1 + $0x1] sm:$0x1] (!%p323_p2)  ;;  %vm386_vm0 = vcmask (!%p323_p2), 1040384   ;;  %p365_p3 = scmp.lt.s32.totalorder (!%p323_p2), %s601_s14, 1  ;;  %v458_v31 = vlaneseq (!%p323_p2) }
   0x6   : > { %326 = sbr.rel (%p323_p2) target bundleno = 54 (0x36), region = 60  ;;  %v382_v2 = vld [vmem:[%s804_s2] sm:$0x1] (!%p323_p2)  ;;  %v383_v3 = vld [vmem:[%s804_s2 + $0x1] sm:$0x1] (!%p323_p2)  ;;  %v387_v4 = vsel (!%p323_p2), %vm386_vm0, %v380_v0, 0.0 }
   0x7   : > { %v388_v5 = vsel (!%p323_p2), %vm386_vm0, %v381_v1, 0.0  ;;  %v390_v6 = vsel (!%p323_p2), %vm386_vm0, %v382_v2, 0.0  ;;  %v391_v8 = vsel (!%p323_p2), %vm386_vm0, %v383_v3, 0.0  ;;  %v404_v9 = vld [vmem:[%s808_s6] sm:$0x1] (!%p323_p2)  ;;  %v459_v33 = vshrl.u32 (!%p323_p2), %v458_v31, 7 }
   0x8   : > { %v389_v7 = vadd.f32 (!%p323_p2), %v388_v5, %v387_v4  ;;  %v405_v10 = vld [vmem:[%s808_s6 + $0x1] sm:$0x1] (!%p323_p2)  ;;  %v392_v11 = vadd.f32 (!%p323_p2), %v391_v8, %v390_v6  ;;  %v406_v12 = vld [vmem:[%s809_s7] sm:$0x1] (!%p323_p2)  ;;  %v410_v15 = vsel (!%p323_p2), %vm386_vm0, %v404_v9, 0.0 }
   0x9   : > { %v407_v13 = vld [vmem:[%s809_s7 + $0x1] sm:$0x1] (!%p323_p2)  ;;  %v411_v17 = vsel (!%p323_p2), %vm386_vm0, %v405_v10, 0.0  ;;  %v413_v18 = vsel (!%p323_p2), %vm386_vm0, %v406_v12, 0.0  ;;  %v384_v34 = vld [vmem:[%s805_s3] sm:$0x1] (!%p323_p2) }
   0xa   : > { %v394_v14 = vmul.f32 (!%p323_p2), 0.0078125, %v389_v7  ;;  %v395_v16 = vmul.f32 (!%p323_p2), 0.0078125, %v392_v11  ;;  %v414_v19 = vsel (!%p323_p2), %vm386_vm0, %v407_v13, 0.0  ;;  %v412_v21 = vadd.f32 (!%p323_p2), %v411_v17, %v410_v15  ;;  %v385_v48 = vld [vmem:[%s806_s4] sm:$0x1] (!%p323_p2) }
   0xb   : > { %v415_v22 = vadd.f32 (!%p323_p2), %v414_v19, %v413_v18  ;;  %v460_v37 = vsub.s32 (!%p323_p2), 0, %v459_v33  ;;  %v408_v49 = vld [vmem:[%s810_s8] sm:$0x1] (!%p323_p2) }
   0xc   : > { %v396_v20 = vmul.f32 (!%p323_p2), %v394_v14, %v394_v14  ;;  %v416_v24 = vmul.f32 (!%p323_p2), 0.0078125, %v412_v21  ;;  %v409_v4 = vld [vmem:[%s811_s9] sm:$0x1] (!%p323_p2) }
   0xd   : > { %v417_v25 = vmul.f32 0.0078125, %v415_v22  ;;  %s814_s14 = smov (!%p365_p3, %s601_s14), 1 }
   0xe   : > { %v397_v23 = vsub.f32 %v395_v16, %v396_v20  ;;  %v418_v27 = vmul.f32 %v416_v24, %v416_v24  ;;  %s614_s11 = sshll.u32 %s814_s14, 5  ;;  %s616_s28 = sshll.u32 %s814_s14, 6 }
   0xf   : > { %s369_s16 = scalar_lea.vmem %s802_s0, %s614_s11  ;;  %s374_s19 = scalar_lea.vmem %s807_s5, %s614_s11 }
  0x10   : > { %v398_v26 = vmax.f32 %v397_v23, 0.0  ;;  %v419_v29 = vsub.f32 %v417_v25, %v418_v27  ;;  %v618_v35 = vld [vmem:[%s369_s16] sm:$0xff]   ;;  %v649_v38 = vld [vmem:[%s369_s16 + $0x8] sm:$0xff]   ;;  %v650_v41 = vld [vmem:[%s369_s16 + $0x10] sm:$0xff]   ;;  %s379_s11 = scalar_lea.vmem %s812_s10, %s616_s28 }
  0x11   : > { %v634_v36 = vld [vmem:[%s374_s19] sm:$0xff]   ;;  %v652_v39 = vld [vmem:[%s374_s19 + $0x8] sm:$0xff]   ;;  %v619_v43 = vunpack.c.l.bf16 %v618_v35  ;;  %v620_v45 = vunpack.c.h.bf16 %v618_v35  ;;  %v653_v46 = vld [vmem:[%s374_s19 + $0x10] sm:$0xff]   ;;  %v623_v51 = vunpack.c.l.bf16 %v649_v38  ;;  %v624_v53 = vunpack.c.h.bf16 %v649_v38 }
  0x12   : > { %v399_v28 = vadd.f32 1e-05, %v398_v26  ;;  %v420_v30 = vmax.f32 %v419_v29, 0.0  ;;  %v635_v44 = vunpack.c.l.bf16 %v634_v36  ;;  %v651_v47 = vld [vmem:[%s369_s16 + $0x18] sm:$0xff]   ;;  %v636_v50 = vunpack.c.h.bf16 %v634_v36 }
  0x13   : > { %v639_v52 = vunpack.c.l.bf16 %v652_v39  ;;  %v640_v56 = vunpack.c.h.bf16 %v652_v39  ;;  %v627_v57 = vunpack.c.l.bf16 %v650_v41  ;;  %v654_v58 = vld [vmem:[%s374_s19 + $0x18] sm:$0xff]   ;;  %v643_v60 = vunpack.c.l.bf16 %v653_v46 }
  0x14   : > { %663 = vrsqrt.f32 %v399_v28  ;;  %v421_v32 = vadd.f32 1e-05, %v420_v30  ;;  %v628_v61 = vunpack.c.h.bf16 %v650_v41  ;;  %v631_v62 = vunpack.c.l.bf16 %v651_v47 }
  0x15   : > { %v632_v63 = vunpack.c.h.bf16 %v651_v47  ;;  %v644_v7 = vunpack.c.h.bf16 %v653_v46  ;;  %v647_v8 = vunpack.c.l.bf16 %v654_v58  ;;  %v648_v15 = vunpack.c.h.bf16 %v654_v58 }
  0x16   : > { %665 = vrsqrt.f32 %v421_v32 }
  0x1e   : > { %v664_v40 = vpop.eup %663 }
  0x1f   : > { %v401_v42 = vmul.f32 %v664_v40, %v384_v34 }
  0x20   : > { %v666_v59 = vpop.eup %665 }
  0x21   : > { %v402_v54 = vmul.f32 %v401_v42, %v394_v14  ;;  %v461_v55 = vrot.slane %v401_v42, %v460_v37  ;;  %v423_v1 = vmul.f32 %v666_v59, %v408_v49 }
  0x23   : > { %v403_v0 = vsub.f32 %v385_v48, %v402_v54  ;;  %v462_v2 = vmul.f32 %v619_v43, %v461_v55  ;;  %v463_v3 = vmul.f32 %v620_v45, %v461_v55  ;;  %v464_v5 = vmul.f32 %v623_v51, %v461_v55 }
  0x24   : > { %v465_v6 = vmul.f32 %v624_v53, %v461_v55  ;;  %v424_v9 = vmul.f32 %v423_v1, %v416_v24  ;;  %v487_v11 = vrot.slane %v423_v1, %v460_v37  ;;  %v466_v12 = vmul.f32 %v627_v57, %v461_v55 }
  0x25   : > { %v474_v10 = vrot.slane %v403_v0, %v460_v37  ;;  %v467_v13 = vmul.f32 %v628_v61, %v461_v55  ;;  %v468_v14 = vmul.f32 %v631_v62, %v461_v55  ;;  %v469_v16 = vmul.f32 %v632_v63, %v461_v55 }
  0x26   : > { %v425_v17 = vsub.f32 %v409_v4, %v424_v9  ;;  %v488_v19 = vmul.f32 %v635_v44, %v487_v11  ;;  %v489_v21 = vmul.f32 %v636_v50, %v487_v11  ;;  %v490_v23 = vmul.f32 %v639_v52, %v487_v11 }
  0x27   : > { %v476_v18 = vadd.f32 %v474_v10, %v462_v2  ;;  %v477_v20 = vadd.f32 %v474_v10, %v463_v3  ;;  %v478_v22 = vadd.f32 %v474_v10, %v464_v5  ;;  %v479_v25 = vadd.f32 %v474_v10, %v465_v6 }
  0x28   : > { %v500_v26 = vrot.slane %v425_v17, %v460_v37  ;;  %v491_v27 = vmul.f32 %v640_v56, %v487_v11  ;;  %v480_v28 = vadd.f32 %v474_v10, %v466_v12  ;;  %v492_v24 = vmul.f32 %v643_v60, %v487_v11 }
  0x29   : > { %v481_v29 = vadd.f32 %v474_v10, %v467_v13  ;;  %v493_v30 = vmul.f32 %v644_v7, %v487_v11  ;;  %v482_v31 = vadd.f32 %v474_v10, %v468_v14  ;;  %v494_v32 = vmul.f32 %v647_v8, %v487_v11 }
  0x2a   : > { %v502_v33 = vadd.f32 %v500_v26, %v488_v19  ;;  %v503_v34 = vadd.f32 %v500_v26, %v489_v21  ;;  %v504_v35 = vadd.f32 %v500_v26, %v490_v23  ;;  %v505_v36 = vadd.f32 %v500_v26, %v491_v27 }
  0x2b   : > { %v506_v38 = vadd.f32 %v500_v26, %v492_v24  ;;  %v507_v39 = vadd.f32 %v500_v26, %v493_v30  ;;  %v508_v40 = vadd.f32 %v500_v26, %v494_v32  ;;  %v483_v41 = vadd.f32 %v474_v10, %v469_v16 }
  0x2c   : > { %v510_v42 = vadd.f32 %v502_v33, %v476_v18  ;;  %v511_v43 = vadd.f32 %v503_v34, %v477_v20  ;;  %v512_v44 = vadd.f32 %v504_v35, %v478_v22  ;;  %v513_v37 = vadd.f32 %v505_v36, %v479_v25 }
  0x2d   : > { %v514_v45 = vadd.f32 %v506_v38, %v480_v28  ;;  %v515_v46 = vadd.f32 %v507_v39, %v481_v29  ;;  %v516_v47 = vadd.f32 %v508_v40, %v482_v31  ;;  %v495_v48 = vmul.f32 %v648_v15, %v487_v11 }
  0x2e   : > { %v518_v49 = vmax.f32 %v510_v42, 0.0  ;;  %v519_v50 = vmax.f32 %v511_v43, 0.0  ;;  %v520_v51 = vmax.f32 %v512_v44, 0.0  ;;  %v521_v52 = vmax.f32 %v513_v37, 0.0 }
  0x2f   : > { %v522_v53 = vmax.f32 %v514_v45, 0.0  ;;  %v523_v54 = vmax.f32 %v515_v46, 0.0  ;;  %v524_v55 = vmax.f32 %v516_v47, 0.0  ;;  %v509_v56 = vadd.f32 %v500_v26, %v495_v48 }
  0x30   : > { %526 = vst [vmem:[%s379_s11] sm:$0xff] %v518_v49  ;;  %527 = vst [vmem:[%s379_s11 + $0x8] sm:$0xff] %v519_v50 }
  0x31   : > { %528 = vst [vmem:[%s379_s11 + $0x10] sm:$0xff] %v520_v51  ;;  %529 = vst [vmem:[%s379_s11 + $0x18] sm:$0xff] %v521_v52  ;;  %v517_v57 = vadd.f32 %v509_v56, %v483_v41 }
  0x32   : > { %530 = vst [vmem:[%s379_s11 + $0x20] sm:$0xff] %v522_v53  ;;  %531 = vst [vmem:[%s379_s11 + $0x28] sm:$0xff] %v523_v54 }
  0x33   : > { %532 = vst [vmem:[%s379_s11 + $0x30] sm:$0xff] %v524_v55  ;;  %v525_v58 = vmax.f32 %v517_v57, 0.0 }
  0x35   : > { %533 = vst [vmem:[%s379_s11 + $0x38] sm:$0xff] %v525_v58 }
  0x36 PF: > { %s20_s13 = sadd.s32 1, %s673_s13  }
  0x37   : > { %p17_p4 = scmp.ge.s32.totalorder %s20_s13, 4  }
  0x39   :  { %19 = sbr.rel (!%p17_p4) target bundleno = 1 (0x1), region = 93 }

// kernel: residual_block_pallas.3
= control target key start
LH: loop header
LB: loop body
LE: loop exit
PB: predicated region body
PF: predicated region fallthrough
CT: control target
= control target key end

     0   :  { %s3062_s27 = smov 0   ;;  %s3064_s28 = smov 0   ;;  %s3638_s0 = inlined_call_operand.vmem [shape: bf16[2,10,10,512], index: 0, kind: input, shape index: {}]   ;;  %s3639_s1 = inlined_call_operand.vmem [shape: bf16[1152,128], index: 1, kind: input, shape index: {}]   ;;  %s3640_s2 = inlined_call_operand.vmem [shape: bf16[128,128], index: 2, kind: input, shape index: {}]   ;;  %s3641_s3 = inlined_call_operand.vmem [shape: bf16[2,8,8,128], index: 3, kind: output, shape index: {0}]   ;;  %s3642_s4 = inlined_call_operand.vmem [shape: f32[2,1,128], index: 4, kind: output, shape index: {1}]   ;;  %s3643_s5 = inlined_call_operand.vmem [shape: f32[2,1,128], index: 5, kind: output, shape index: {2}]   ;;  %s3644_s6 = inlined_call_operand.vmem [shape: bf16[2,8,8,128], index: 6, kind: output, shape index: {3}]   ;;  %s3645_s7 = inlined_call_operand.vmem [shape: f32[2,1,128], index: 7, kind: output, shape index: {4}]   ;;  %s3646_s8 = inlined_call_operand.vmem [shape: f32[2,1,128], index: 8, kind: output, shape index: {5}]  }
   0x1   :  { %s3066_s29 = smov 0  }
   0x2 LB: > { %s31_s30 = sadd.s32 1, %s3010_s28  ;;  %p2422_p0 = scmp.ge.s32.totalorder %s3014_s29, 1  ;;  %s3014_s29 = sphi %s3066_s29, %s19_s29   ;;  %s3010_s28 = sphi %s3064_s28, %s3650_s28   ;;  %s3006_s27 = sphi %s3062_s27, %s3649_s27  }
   0x3   : > { %p33_p1 = scmp.ge.s32.totalorder %s31_s30, 2  ;;  %p293_p2 = scmp.lt.s32.totalorder %s3014_s29, 3 }
   0x5   : > { %s3652_s30 = smov (%p33_p1, %s31_s30), 0  ;;  %p294_p3 = pnand %p2422_p0, %p293_p2 }
   0x6   : > { %v2912_v0 = vld [vmem:[%s3639_s1 + $0x40] sm:$0xff] (!%p294_p3)   ;;  %v2916_v4 = vld [vmem:[%s3639_s1 + $0x48] sm:$0xff] (!%p294_p3)   ;;  %v2920_v8 = vld [vmem:[%s3639_s1 + $0x50] sm:$0xff] (!%p294_p3)   ;;  %p348_p4 = scmp.lt.s32.totalorder (!%p294_p3), %s3006_s27, 1  ;;  %vm413_vm0 = vsmask.f32 (!%p294_p3), 3328 }
   0x7   : > { %297 = sbr.rel (%p294_p3) target bundleno = 354 (0x162), region = 32  ;;  %v2913_v1 = vld [vmem:[%s3639_s1 + $0xc0] sm:$0xff] (!%p294_p3)   ;;  %2654 = vmatprep.subr.bf16.mxu0 (!%p294_p3), %v2912_v0  ;;  %v2917_v5 = vld [vmem:[%s3639_s1 + $0xc8] sm:$0xff] (!%p294_p3)   ;;  %v2921_v9 = vld [vmem:[%s3639_s1 + $0xd0] sm:$0xff] (!%p294_p3)   ;;  %vm414_vm1 = vsmask.f32 (!%p294_p3), 7440 }
   0x8   : > { %v2914_v2 = vld [vmem:[%s3639_s1] sm:$0xff] (!%p294_p3)   ;;  %2694 = vmatprep.subr.bf16.mxu1 (!%p294_p3), %v2913_v1  ;;  %v2918_v6 = vld [vmem:[%s3639_s1 + $0x8] sm:$0xff] (!%p294_p3)   ;;  %v2922_v10 = vld [vmem:[%s3639_s1 + $0x10] sm:$0xff] (!%p294_p3)  }
   0x9   : > { %v2915_v3 = vld [vmem:[%s3639_s1 + $0x80] sm:$0xff] (!%p294_p3)   ;;  %2655 = vmatpush3.bf16.msra.mxu0 (!%p294_p3), %v2914_v2  ;;  %v2919_v7 = vld [vmem:[%s3639_s1 + $0x88] sm:$0xff] (!%p294_p3)   ;;  %v2923_v11 = vld [vmem:[%s3639_s1 + $0x90] sm:$0xff] (!%p294_p3)  }
   0xa   : > { %2695 = vmatpush3.bf16.msra.mxu1 (!%p294_p3), %v2915_v3  ;;  %2656 = vmatprep.subr.bf16.mxu0 (!%p294_p3), %v2916_v4  ;;  %v2924_v12 = vld [vmem:[%s3639_s1 + $0x58] sm:$0xff] (!%p294_p3)   ;;  %v2928_v16 = vld [vmem:[%s3639_s1 + $0x60] sm:$0xff] (!%p294_p3)   ;;  %v2932_v20 = vld [vmem:[%s3639_s1 + $0x68] sm:$0xff] (!%p294_p3)  }
   0xb   : > { %2696 = vmatprep.subr.bf16.mxu1 (!%p294_p3), %v2917_v5  ;;  %v2925_v13 = vld [vmem:[%s3639_s1 + $0xd8] sm:$0xff] (!%p294_p3)   ;;  %v2929_v17 = vld [vmem:[%s3639_s1 + $0xe0] sm:$0xff] (!%p294_p3)   ;;  %v2933_v21 = vld [vmem:[%s3639_s1 + $0xe8] sm:$0xff] (!%p294_p3)  }
   0xc   : > { %v2926_v14 = vld [vmem:[%s3639_s1 + $0x18] sm:$0xff] (!%p294_p3)   ;;  %v2930_v18 = vld [vmem:[%s3639_s1 + $0x20] sm:$0xff] (!%p294_p3)   ;;  %v2934_v22 = vld [vmem:[%s3639_s1 + $0x28] sm:$0xff] (!%p294_p3)  }
   0xd   : > { %2657 = vmatpush3.bf16.msra.mxu0 (!%p294_p3), %v2918_v6  ;;  %v2927_v15 = vld [vmem:[%s3639_s1 + $0x98] sm:$0xff] (!%p294_p3)   ;;  %v2931_v19 = vld [vmem:[%s3639_s1 + $0xa0] sm:$0xff] (!%p294_p3)   ;;  %v2935_v23 = vld [vmem:[%s3639_s1 + $0xa8] sm:$0xff] (!%p294_p3)  }
   0xe   : > { %2697 = vmatpush3.bf16.msra.mxu1 %v2919_v7  ;;  %2658 = vmatprep.subr.bf16.mxu0 %v2920_v8  ;;  %s3654_s27 = smov (!%p348_p4, %s3006_s27), 1  ;;  %v2936_v24 = vld [vmem:[%s3639_s1 + $0x70] sm:$0xff]   ;;  %v2940_v28 = vld [vmem:[%s3639_s1 + $0x78] sm:$0xff]   ;;  %v2944_v42 = vld [vmem:[%s3639_s1 + $0x140] sm:$0xff]  }
   0xf   : > { %2698 = vmatprep.subr.bf16.mxu1 %v2921_v9  ;;  %v2937_v25 = vld [vmem:[%s3639_s1 + $0xf0] sm:$0xff]   ;;  %s2886_s9 = smul.u32 320, %s3654_s27  ;;  %v2941_v29 = vld [vmem:[%s3639_s1 + $0xf8] sm:$0xff]   ;;  %v2945_v55 = vld [vmem:[%s3639_s1 + $0x1c0] sm:$0xff]   ;;  %s3572_s21 = scalar_lea.vmem %s3643_s5, %s3654_s27 }
  0x10   : > { %v2938_v26 = vld [vmem:[%s3639_s1 + $0x30] sm:$0xff]   ;;  %v2942_v30 = vld [vmem:[%s3639_s1 + $0x38] sm:$0xff]   ;;  %v2946_v60 = vld [vmem:[%s3639_s1 + $0x100] sm:$0xff]   ;;  %s3580_s24 = scalar_lea.vmem %s3645_s7, %s3654_s27  ;;  %s2590_s10 = sshll.u32 %s3654_s27, 5 }
  0x11   : > { %2659 = vmatpush3.bf16.msra.mxu0 %v2922_v10  ;;  %v2939_v27 = vld [vmem:[%s3639_s1 + $0xb0] sm:$0xff]   ;;  %s3183_s20 = scalar_lea.vmem %s3638_s0, %s2886_s9  ;;  %v2943_v31 = vld [vmem:[%s3639_s1 + $0xb8] sm:$0xff]   ;;  %vm3209_vm2 = vmor %vm413_vm0, %vm414_vm1  ;;  %s3587_s9 = scalar_lea.vmem %s3646_s8, %s3654_s27 }
  0x12   : > { %2699 = vmatpush3.bf16.msra.mxu1 %v2923_v11  ;;  %2660 = vmatprep.subr.bf16.mxu0 %v2924_v12  ;;  %v397_v32 = vld [vmem:[%s3183_s20 + $0x4] sm:$0xf]  ;;  %v528_v34 = vld [vmem:[%s3183_s20 + $0x8] sm:$0xf]  ;;  %v389_v37 = vld [vmem:[%s3183_s20] sm:$0xf]  ;;  %s3602_s13 = scalar_lea.vmem %s3644_s6, %s2590_s10  ;;  %s3610_s15 = scalar_lea.vmem %s3641_s3, %s2590_s10 }
  0x13   : > { %2700 = vmatprep.subr.bf16.mxu1 %v2925_v13  ;;  %v398_v33 = vld [vmem:[%s3183_s20 + $0x24] sm:$0xf]  ;;  %v529_v36 = vld [vmem:[%s3183_s20 + $0x28] sm:$0xf]  ;;  %v553_v38 = vshrl.u32 %v528_v34, 16  ;;  %v417_v41 = vshrl.u32 %v389_v37, 16 }
  0x14   : > { %v2456_v35 = vcombine.low %v397_v32, %v398_v33  ;;  %v2464_v39 = vcombine.low %v528_v34, %v529_v36  ;;  %v390_v40 = vld [vmem:[%s3183_s20 + $0x20] sm:$0xf]  ;;  %v556_v43 = vshll.u32 %v528_v34, 16  ;;  %v567_v44 = vshrl.u32 %v529_v36, 16  ;;  %v405_v49 = vld [vmem:[%s3183_s20 + $0x10] sm:$0x1] }
  0x15   : > { %2661 = vmatpush3.bf16.msra.mxu0 %v2926_v14  ;;  %v420_v45 = vshll.u32 %v389_v37, 16  ;;  %v431_v46 = vshrl.u32 %v390_v40, 16  ;;  %v419_v47 = vrot.slane %v417_v41, 4  ;;  %v434_v48 = vshll.u32 %v390_v40, 16  ;;  %v406_v50 = vld [vmem:[%s3183_s20 + $0x30] sm:$0x1] }
  0x16   : > { %2701 = vmatpush3.bf16.msra.mxu1 %v2927_v15  ;;  %2662 = vmatprep.subr.bf16.mxu0 %v2928_v16  ;;  %v2452_v53 = vcombine.low %v389_v37, %v390_v40  ;;  %v570_v56 = vshll.u32 %v529_v36, 16  ;;  %v426_v58 = vshll.u32 %v405_v49, 16  ;;  %v440_v59 = vshll.u32 %v406_v50, 16  ;;  %v2948_v4 = vld [vmem:[%s3639_s1 + $0x148] sm:$0xff]   ;;  %v2947_v6 = vld [vmem:[%s3639_s1 + $0x180] sm:$0xff]   ;;  %v2954_v50 = vld [vmem:[%s3639_s1 + $0x110] sm:$0xff]  }
  0x17   : > { %2702 = vmatprep.subr.bf16.mxu1 %v2929_v17  ;;  %1601 = vmatprep.mubr.bf16.mxu0 %v2456_v35  ;;  %v422_v51 = vrot.slane %v420_v45, 5  ;;  %v433_v52 = vrot.slane %v431_v46, 4  ;;  %v436_v54 = vrot.slane %v434_v48, 5  ;;  %v3205_v61 = vrot.slane %v553_v38, 4  ;;  %v2949_v8 = vld [vmem:[%s3639_s1 + $0x1c8] sm:$0xff]   ;;  %v2953_v46 = vld [vmem:[%s3639_s1 + $0x1d0] sm:$0xff]  }
  0x18   : > { %1666 = vmatprep.mubr.bf16.mxu1 %v2464_v39  ;;  %v3207_v62 = vrot.slane %v556_v43, 5  ;;  %v428_v2 = vrot.slane %v426_v58, 5  ;;  %v442_v3 = vrot.slane %v440_v59, 5  ;;  %v3226_v10 = vrot.slane %v567_v44, 4  ;;  %v2950_v12 = vld [vmem:[%s3639_s1 + $0x108] sm:$0xff]   ;;  %v2957_v58 = vld [vmem:[%s3639_s1 + $0x1d8] sm:$0xff]  }
  0x19   : > { %2663 = vmatpush3.bf16.msra.mxu0 %v2930_v18  ;;  %v423_v57 = vor.u32 %v422_v51, %v419_v47  ;;  %v437_v0 = vor.u32 %v436_v54, %v433_v52  ;;  %v3231_v13 = vrot.slane %v570_v56, 5  ;;  %v2951_v14 = vld [vmem:[%s3639_s1 + $0x188] sm:$0xff]   ;;  %v399_v15 = vld [vmem:[%s3183_s20 + $0x44] sm:$0xf]  ;;  %v408_v36 = vld [vmem:[%s3183_s20 + $0x70] sm:$0x1] }
  0x1a   : > { %2703 = vmatpush3.bf16.msra.mxu1 %v2931_v19  ;;  %2664 = vmatprep.subr.bf16.mxu0 %v2932_v20  ;;  %v400_v16 = vld [vmem:[%s3183_s20 + $0x64] sm:$0xf]  ;;  %v530_v18 = vld [vmem:[%s3183_s20 + $0x48] sm:$0xf]  ;;  %v391_v20 = vld [vmem:[%s3183_s20 + $0x40] sm:$0xf]  ;;  %v559_v47 = vor.u32 %v3207_v62, %v3205_v61 }
  0x1b   : > { %2704 = vmatprep.subr.bf16.mxu1 %v2933_v21  ;;  %v424_v1 = vrot.slane %v423_v57, 4  ;;  %v438_v5 = vrot.slane %v437_v0, 4  ;;  %v2457_v17 = vcombine.low %v399_v15, %v400_v16  ;;  %v531_v19 = vld [vmem:[%s3183_s20 + $0x68] sm:$0xf]  ;;  %v581_v21 = vshrl.u32 %v530_v18, 16  ;;  %v2955_v51 = vld [vmem:[%s3639_s1 + $0x190] sm:$0xff]  }
  0x1c   : > { %v468_v43 = vshll.u32 %v408_v36, 16  ;;  %v573_v52 = vor.u32 %v3231_v13, %v3226_v10  ;;  %v2958_v61 = vld [vmem:[%s3639_s1 + $0x118] sm:$0xff]   ;;  %v394_v15 = vld [vmem:[%s3183_s20 + $0xa0] sm:$0xf] }
  0x1d   : > { %2665 = vmatpush3.bf16.msra.mxu0 %v2934_v22  ;;  %v429_v7 = vsel %vm3209_vm2, %v424_v1, %v428_v2  ;;  %v443_v9 = vsel %vm3209_vm2, %v438_v5, %v442_v3  ;;  %v584_v22 = vshll.u32 %v530_v18, 16  ;;  %v583_v32 = vrot.slane %v581_v21, 4  ;;  %v2959_v2 = vld [vmem:[%s3639_s1 + $0x198] sm:$0xff]   ;;  %v401_v3 = vld [vmem:[%s3183_s20 + $0x84] sm:$0xf] }
  0x1e   : > { %2705 = vmatpush3.bf16.msra.mxu1 %v2935_v23  ;;  %2666 = vmatprep.subr.bf16.mxu0 %v2936_v24  ;;  %v2460_v11 = vcombine.low %v429_v7, %v443_v9  ;;  %v595_v23 = vshrl.u32 %v531_v19, 16  ;;  %v598_v24 = vshll.u32 %v531_v19, 16  ;;  %v470_v49 = vrot.slane %v468_v43, 5  ;;  %v402_v5 = vld [vmem:[%s3183_s20 + $0xa4] sm:$0xf] }
  0x1f   : > { %2706 = vmatprep.subr.bf16.mxu1 %v2937_v25  ;;  %v392_v25 = vld [vmem:[%s3183_s20 + $0x60] sm:$0xf]  ;;  %v586_v33 = vrot.slane %v584_v22, 5  ;;  %v3273_v0 = vrot.slane %v573_v52, 4  ;;  %v533_v7 = vld [vmem:[%s3183_s20 + $0xa8] sm:$0xf] }
  0x20   : > { %v597_v34 = vrot.slane %v595_v23, 4  ;;  %v600_v35 = vrot.slane %v598_v24, 5  ;;  %v462_v40 = vshll.u32 %v392_v25, 16  ;;  %v2453_v41 = vcombine.low %v391_v20, %v392_v25  ;;  %v409_v24 = vld [vmem:[%s3183_s20 + $0x90] sm:$0x1] }
  0x21   : > { %2667 = vmatpush3.bf16.msra.mxu0 %v2938_v26  ;;  %v2465_v26 = vcombine.low %v530_v18, %v531_v19  ;;  %v587_v59 = vor.u32 %v586_v33, %v583_v32  ;;  %v2961_v18 = vld [vmem:[%s3639_s1 + $0x1e0] sm:$0xff]   ;;  %v623_v21 = vshrl.u32 %v533_v7, 16  ;;  %v626_v22 = vshll.u32 %v533_v7, 16 }
  0x22   : > { %2707 = vmatpush3.bf16.msra.mxu1 %v2939_v27  ;;  %2668 = vmatprep.subr.bf16.mxu0 %v2940_v28  ;;  %v445_v27 = vshrl.u32 %v391_v20, 16  ;;  %v448_v28 = vshll.u32 %v391_v20, 16  ;;  %v464_v44 = vrot.slane %v462_v40, 5  ;;  %v601_v62 = vor.u32 %v600_v35, %v597_v34  ;;  %v2962_v34 = vld [vmem:[%s3639_s1 + $0x120] sm:$0xff]  }
  0x23   : > { %2708 = vmatprep.subr.bf16.mxu1 %v2941_v29  ;;  %v459_v29 = vshrl.u32 %v392_v25, 16  ;;  %v3288_v13 = vrot.slane %v587_v59, 4  ;;  %v487_v23 = vshrl.u32 %v394_v15, 16  ;;  %v482_v32 = vshll.u32 %v409_v24, 16  ;;  %v403_v52 = vld [vmem:[%s3183_s20 + $0xc4] sm:$0xf] }
  0x24   : > { %v447_v37 = vrot.slane %v445_v27, 4  ;;  %v450_v38 = vrot.slane %v448_v28, 5  ;;  %v3294_v19 = vrot.slane %v601_v62, 4  ;;  %v490_v28 = vshll.u32 %v394_v15, 16  ;;  %v395_v59 = vld [vmem:[%s3183_s20 + $0xc0] sm:$0xf] }
  0x25   : > { %2669 = vmatpush3.bf16.msra.mxu0 %v2942_v30  ;;  %v407_v30 = vld [vmem:[%s3183_s20 + $0x50] sm:$0x1]  ;;  %v461_v39 = vrot.slane %v459_v29, 4 }
  0x26   : > { %2709 = vmatpush3.bf16.msra.mxu1 %v2943_v31  ;;  %2734 = vmatprep.subr.bf16.mxu0 %v2944_v42  ;;  %v2952_v31 = vld [vmem:[%s3639_s1 + $0x150] sm:$0xff]   ;;  %v454_v42 = vshll.u32 %v407_v30, 16  ;;  %v451_v45 = vor.u32 %v450_v38, %v447_v37  ;;  %v489_v30 = vrot.slane %v487_v23, 4  ;;  %v492_v35 = vrot.slane %v490_v28, 5  ;;  %v2963_v37 = vld [vmem:[%s3639_s1 + $0x1a0] sm:$0xff]  }
  0x27   : > { %2774 = vmatprep.subr.bf16.mxu1 %v2945_v55  ;;  %v465_v54 = vor.u32 %v464_v44, %v461_v39  ;;  %v2956_v55 = vld [vmem:[%s3639_s1 + $0x158] sm:$0xff]   ;;  %v410_v29 = vld [vmem:[%s3183_s20 + $0xb0] sm:$0x1]  ;;  %v484_v38 = vrot.slane %v482_v32, 5 }
  0x28   : > { %1602 = vmatmul.mubr.bf16.vlgmr.msra.gmra.mrb[0].mxu0 %v2452_v53  ;;  %v456_v48 = vrot.slane %v454_v42, 5  ;;  %v452_v53 = vrot.slane %v451_v45, 4  ;;  %v496_v33 = vshll.u32 %v410_v29, 16  ;;  %v2964_v42 = vld [vmem:[%s3639_s1 + $0x168] sm:$0xff]   ;;  %v2970_v28 = vld [vmem:[%s3639_s1 + $0x130] sm:$0xff]  }
  0x29   : > { %2735 = vmatpush3.bf16.msra.mxu0 %v2946_v60  ;;  %1667 = vmatmul.mubr.bf16.vlgmr.msra.gmra.mrb[0].mxu1 %v2460_v11  ;;  %v466_v57 = vrot.slane %v465_v54, 4  ;;  %v3268_v60 = vrot.slane %v559_v47, 4  ;;  %v393_v11 = vld [vmem:[%s3183_s20 + $0x80] sm:$0xf]  ;;  %v2965_v45 = vld [vmem:[%s3639_s1 + $0x1e8] sm:$0xff]  }
  0x2a   : > { %2736 = vmatprep.subr.bf16.mxu0 %v2948_v4  ;;  %2775 = vmatpush3.bf16.msra.mxu1 %v2947_v6  ;;  %v457_v56 = vsel %vm3209_vm2, %v452_v53, %v456_v48  ;;  %v532_v6 = vld [vmem:[%s3183_s20 + $0x88] sm:$0xf]  ;;  %v473_v16 = vshrl.u32 %v393_v11, 16  ;;  %v498_v39 = vrot.slane %v496_v33, 5  ;;  %v3321_v48 = vrot.slane %v626_v22, 5  ;;  %v2969_v22 = vld [vmem:[%s3639_s1 + $0x1f0] sm:$0xff]  }
  0x2b   : > { %2776 = vmatprep.subr.bf16.mxu1 %v2949_v8  ;;  %1609 = vmatprep.mubr.bf16.mxu0 %v2457_v17  ;;  %v471_v1 = vsel %vm3209_vm2, %v466_v57, %v470_v49  ;;  %v2458_v8 = vcombine.low %v401_v3, %v402_v5  ;;  %v609_v9 = vshrl.u32 %v532_v6, 16  ;;  %v612_v10 = vshll.u32 %v532_v6, 16  ;;  %v2966_v47 = vld [vmem:[%s3639_s1 + $0x128] sm:$0xff]   ;;  %v404_v53 = vld [vmem:[%s3183_s20 + $0xe4] sm:$0xf] }
  0x2c   : > { %1674 = vmatprep.mubr.bf16.mxu1 %v2465_v26  ;;  %v2461_v4 = vcombine.low %v457_v56, %v471_v1  ;;  %v476_v17 = vshll.u32 %v393_v11, 16  ;;  %v475_v26 = vrot.slane %v473_v16, 4  ;;  %v534_v54 = vld [vmem:[%s3183_s20 + $0xc8] sm:$0xf]  ;;  %v501_v3 = vshrl.u32 %v395_v59, 16 }
  0x2d   : > { %2737 = vmatpush3.bf16.msra.mxu0 %v2950_v12  ;;  %v2960_v12 = vld [vmem:[%s3639_s1 + $0x160] sm:$0xff]   ;;  %v3296_v20 = vrot.slane %v609_v9, 4  ;;  %v3299_v25 = vrot.slane %v612_v10, 5  ;;  %v535_v56 = vld [vmem:[%s3183_s20 + $0xe8] sm:$0xf]  ;;  %v637_v57 = vshrl.u32 %v534_v54, 16 }
  0x2e   : > { %2738 = vmatprep.subr.bf16.mxu0 %v2952_v31  ;;  %2777 = vmatpush3.bf16.msra.mxu1 %v2951_v14  ;;  %v2466_v14 = vcombine.low %v532_v6, %v533_v7  ;;  %v478_v27 = vrot.slane %v476_v17, 5  ;;  %v2454_v31 = vcombine.low %v393_v11, %v394_v15  ;;  %v654_v62 = vshll.u32 %v535_v56, 16  ;;  %v411_v9 = vld [vmem:[%s3183_s20 + $0xd0] sm:$0x1] }
  0x2f   : > { %2778 = vmatprep.subr.bf16.mxu1 %v2953_v46  ;;  %v3316_v46 = vrot.slane %v623_v21, 4  ;;  %v2467_v1 = vcombine.low %v534_v54, %v535_v56  ;;  %v3337_v5 = vrot.slane %v637_v57, 4  ;;  %v504_v7 = vshll.u32 %v395_v59, 16  ;;  %v412_v15 = vld [vmem:[%s3183_s20 + $0xf0] sm:$0x1] }
  0x30   : > { %1610 = vmatmul.mubr.bf16.gmra.mrb[4].mxu0 %v2453_v41  ;;  %v479_v36 = vor.u32 %v478_v27, %v475_v26  ;;  %v493_v41 = vor.u32 %v492_v35, %v489_v30  ;;  %v3344_v11 = vrot.slane %v654_v62, 5  ;;  %v510_v21 = vshll.u32 %v411_v9, 16  ;;  %v3392_v57 = vld [vmem:[%s3183_s20 + $0x40] sm:$0xf]  ;;  %v2979_v9 = vld [vmem:[%s3640_s2 + $0x8] sm:$0xff]  }
  0x31   : > { %2739 = vmatpush3.bf16.msra.mxu0 %v2954_v50  ;;  %1675 = vmatmul.mubr.bf16.gmra.mrb[4].mxu1 %v2461_v4  ;;  %v2967_v50 = vld [vmem:[%s3639_s1 + $0x1a8] sm:$0xff]   ;;  %v2968_v4 = vld [vmem:[%s3639_s1 + $0x170] sm:$0xff]   ;;  %v506_v16 = vrot.slane %v504_v7, 5  ;;  %v524_v24 = vshll.u32 %v412_v15, 16  ;;  %v615_v32 = vor.u32 %v3299_v25, %v3296_v20  ;;  %v629_v35 = vor.u32 %v3321_v48, %v3316_v46  ;;  %v2437_v48 = vld [vmem:[%s3183_s20 + $0x44] sm:$0xf] }
  0x32   : > { %2779 = vmatpush3.bf16.msra.mxu1 %v2955_v51  ;;  %2740 = vmatprep.subr.bf16.mxu0 %v2956_v55  ;;  %v480_v40 = vrot.slane %v479_v36, 4  ;;  %v494_v44 = vrot.slane %v493_v41, 4  ;;  %v2459_v55 = vcombine.low %v403_v52, %v404_v53  ;;  %v512_v27 = vrot.slane %v510_v21, 5  ;;  %v2975_v41 = vld [vmem:[%s3639_s1 + $0x1b8] sm:$0xff]   ;;  %v2428_v52 = vld [vmem:[%s3183_s20 + $0x20] sm:$0xf] }
  0x33   : > { %2780 = vmatprep.subr.bf16.mxu1 %v2957_v58  ;;  %1617 = vmatprep.mubr.bf16.mxu0 %v2458_v8  ;;  %v640_v58 = vshll.u32 %v534_v54, 16  ;;  %v526_v30 = vrot.slane %v524_v24, 5  ;;  %v546_v7 = vld [vmem:[%s3183_s20 + $0x58] sm:$0x1]  ;;  %v2439_v15 = vld [vmem:[%s3183_s20 + $0x84] sm:$0xf] }
  0x34   : > { %1682 = vmatprep.mubr.bf16.mxu1 %v2466_v14  ;;  %v485_v43 = vsel %vm3209_vm2, %v480_v40, %v484_v38  ;;  %v499_v49 = vsel %vm3209_vm2, %v494_v44, %v498_v39  ;;  %v2974_v38 = vld [vmem:[%s3639_s1 + $0x138] sm:$0xff]   ;;  %v3373_v39 = vrot.slane %v615_v32, 4  ;;  %v3380_v44 = vrot.slane %v629_v35, 4  ;;  %v2980_v24 = vld [vmem:[%s3639_s1 + $0x210] sm:$0xff]  }
  0x35   : > { %2741 = vmatpush3.bf16.msra.mxu0 %v2958_v61  ;;  %v2462_v51 = vcombine.low %v485_v43, %v499_v49  ;;  %v651_v61 = vshrl.u32 %v535_v56, 16  ;;  %v3339_v6 = vrot.slane %v640_v58, 5  ;;  %v545_v43 = vld [vmem:[%s3183_s20 + $0x38] sm:$0x1]  ;;  %v2976_v58 = vld [vmem:[%s3639_s1 + $0x200] sm:$0xff]  }
  0x36   : > { %2781 = vmatpush3.bf16.msra.mxu1 %v2959_v2  ;;  %2742 = vmatprep.subr.bf16.mxu0 %v2960_v12  ;;  %v396_v2 = vld [vmem:[%s3183_s20 + $0xe0] sm:$0xf]  ;;  %v503_v12 = vrot.slane %v501_v3, 4  ;;  %v576_v46 = vshll.u32 %v545_v43, 16  ;;  %v693_v3 = vshll.u32 %v2428_v52, 16 }
  0x37   : > { %2782 = vmatprep.subr.bf16.mxu1 %v2961_v18  ;;  %v515_v8 = vshrl.u32 %v396_v2, 16  ;;  %v3342_v10 = vrot.slane %v651_v61, 4  ;;  %v518_v14 = vshll.u32 %v396_v2, 16  ;;  %v2455_v18 = vcombine.low %v395_v59, %v396_v2  ;;  %v2977_v2 = vld [vmem:[%s3640_s2] sm:$0xff]   ;;  %v549_v43 = vld [vmem:[%s3183_s20 + $0xb8] sm:$0x1] }
  0x38   : > { %1618 = vmatmul.mubr.bf16.gmra.mrb[8].mxu0 %v2454_v31  ;;  %v507_v26 = vor.u32 %v506_v16, %v503_v12  ;;  %v2971_v31 = vld [vmem:[%s3639_s1 + $0x1b0] sm:$0xff]   ;;  %v643_v53 = vor.u32 %v3339_v6, %v3337_v5  ;;  %v578_v56 = vrot.slane %v576_v46, 5  ;;  %v690_v59 = vshrl.u32 %v2428_v52, 16  ;;  %v2438_v12 = vld [vmem:[%s3183_s20 + $0x64] sm:$0xf] }
  0x39   : > { %2743 = vmatpush3.bf16.msra.mxu0 %v2962_v34  ;;  %1683 = vmatmul.mubr.bf16.gmra.mrb[8].mxu1 %v2462_v51  ;;  %v517_v17 = vrot.slane %v515_v8, 4  ;;  %v520_v23 = vrot.slane %v518_v14, 5  ;;  %v2972_v34 = vld [vmem:[%s3639_s1 + $0x178] sm:$0xff]   ;;  %v537_v51 = vld [vmem:[%s3183_s20 + $0x2c] sm:$0xf]  ;;  %v657_v54 = vor.u32 %v3344_v11, %v3342_v10  ;;  %v2476_v5 = vcombine.low %v2428_v52, %v3392_v57 }
  0x3a   : > { %2783 = vmatpush3.bf16.msra.mxu1 %v2963_v37  ;;  %2744 = vmatprep.subr.bf16.mxu0 %v2964_v42  ;;  %v508_v33 = vrot.slane %v507_v26, 4  ;;  %v2973_v37 = vld [vmem:[%s3639_s1 + $0x1f8] sm:$0xff]   ;;  %v579_v62 = vsel %vm3209_vm2, %v3273_v0, %v578_v56  ;;  %v3407_v6 = vrot.slane %v643_v53, 4  ;;  %v2978_v0 = vld [vmem:[%s3639_s1 + $0x208] sm:$0xff]   ;;  %v3415_v8 = vrot.slane %v690_v59, 4 }
  0x3b   : > { %2784 = vmatprep.subr.bf16.mxu1 %v2965_v45  ;;  %1625 = vmatprep.mubr.bf16.mxu0 %v2459_v55  ;;  %v521_v29 = vor.u32 %v520_v23, %v517_v17  ;;  %v544_v42 = vld [vmem:[%s3183_s20 + $0x18] sm:$0x1]  ;;  %v590_v11 = vshll.u32 %v546_v7, 16  ;;  %v538_v16 = vld [vmem:[%s3183_s20 + $0x4c] sm:$0xf]  ;;  %v3424_v17 = vrot.slane %v693_v3, 5  ;;  %v2481_v21 = vcombine.low %v2438_v12, %v2439_v15 }
  0x3c   : > { %1690 = vmatprep.mubr.bf16.mxu1 %v2467_v1  ;;  %v513_v20 = vsel %vm3209_vm2, %v508_v33, %v512_v27  ;;  %v562_v45 = vshll.u32 %v544_v42, 16  ;;  %v547_v10 = vld [vmem:[%s3183_s20 + $0x78] sm:$0x1]  ;;  %v2430_v23 = vld [vmem:[%s3183_s20 + $0x60] sm:$0xf]  ;;  %v2987_v15 = vld [vmem:[%s3640_s2 + $0x28] sm:$0xff]  }
  0x3d   : > { %2745 = vmatpush3.bf16.msra.mxu0 %v2966_v47  ;;  %v522_v36 = vrot.slane %v521_v29, 4  ;;  %v2436_v47 = vld [vmem:[%s3183_s20 + $0x24] sm:$0xf]  ;;  %v604_v14 = vshll.u32 %v547_v10, 16  ;;  %v2431_v27 = vld [vmem:[%s3183_s20 + $0x80] sm:$0xf] }
  0x3e   : > { %2785 = vmatpush3.bf16.msra.mxu1 %v2967_v50  ;;  %2746 = vmatprep.subr.bf16.mxu0 %v2968_v4  ;;  %v2480_v49 = vcombine.low %v2436_v47, %v2437_v48  ;;  %v536_v50 = vld [vmem:[%s3183_s20 + $0xc] sm:$0xf]  ;;  %v564_v55 = vrot.slane %v562_v45, 5  ;;  %v721_v29 = vshll.u32 %v2430_v23, 16  ;;  %v732_v32 = vshrl.u32 %v2431_v27, 16  ;;  %v2983_v42 = vld [vmem:[%s3640_s2 + $0x18] sm:$0xff]  }
  0x3f   : > { %2786 = vmatprep.subr.bf16.mxu1 %v2969_v22  ;;  %v527_v25 = vsel %vm3209_vm2, %v522_v36, %v526_v30  ;;  %v2468_v1 = vcombine.low %v536_v50, %v537_v51  ;;  %v539_v22 = vld [vmem:[%s3183_s20 + $0x6c] sm:$0xf]  ;;  %v606_v26 = vrot.slane %v604_v14, 5  ;;  %v2981_v30 = vld [vmem:[%s3640_s2 + $0x10] sm:$0xff]   ;;  %v735_v33 = vshll.u32 %v2431_v27, 16  ;;  %v2984_v51 = vld [vmem:[%s3639_s1 + $0x220] sm:$0xff]  }
  0x40   : > { %1626 = vmatmul.mubr.bf16.gmra.mrb[12].mxu0 %v2455_v18  ;;  %v2463_v40 = vcombine.low %v513_v20, %v527_v25  ;;  %v565_v61 = vsel %vm3209_vm2, %v3268_v60, %v564_v55  ;;  %v3409_v60 = vrot.slane %v657_v54, 4  ;;  %v592_v18 = vrot.slane %v590_v11, 5  ;;  %v2982_v20 = vld [vmem:[%s3639_s1 + $0x218] sm:$0xff]   ;;  %v2440_v46 = vld [vmem:[%s3183_s20 + $0xa4] sm:$0xf] }
  0x41   : > { %2747 = vmatpush3.bf16.msra.mxu0 %v2970_v28  ;;  %v2472_v4 = vcombine.low %v565_v61, %v579_v62  ;;  %v718_v28 = vshrl.u32 %v2430_v23, 16  ;;  %v2469_v35 = vcombine.low %v538_v16, %v539_v22  ;;  %v632_v48 = vshll.u32 %v549_v43, 16  ;;  %v540_v50 = vld [vmem:[%s3183_s20 + $0x8c] sm:$0xf]  ;;  %v2432_v56 = vld [vmem:[%s3183_s20 + $0xa0] sm:$0xf] }
  0x42   : > { %2787 = vmatpush3.bf16.msra.mxu1 %v2971_v31  ;;  %2748 = vmatprep.subr.bf16.mxu0 %v2972_v34  ;;  %v593_v31 = vsel %vm3209_vm2, %v3288_v13, %v592_v18  ;;  %v607_v34 = vsel %vm3209_vm2, %v3294_v19, %v606_v26  ;;  %v734_v13 = vrot.slane %v732_v32, 4  ;;  %v548_v19 = vld [vmem:[%s3183_s20 + $0x98] sm:$0x1]  ;;  %v541_v55 = vld [vmem:[%s3183_s20 + $0xac] sm:$0xf]  ;;  %v746_v61 = vshrl.u32 %v2432_v56, 16 }
  0x43   : > { %2788 = vmatprep.subr.bf16.mxu1 %v2973_v37  ;;  %1691 = vmatmul.mubr.bf16.gmra.mrb[12].mxu1 %v2463_v40  ;;  %v720_v36 = vrot.slane %v718_v28, 4  ;;  %v723_v37 = vrot.slane %v721_v29, 5  ;;  %v2473_v25 = vcombine.low %v593_v31, %v607_v34  ;;  %v2477_v40 = vcombine.low %v2430_v23, %v2431_v27  ;;  %v2433_v59 = vld [vmem:[%s3183_s20 + $0xc0] sm:$0xf]  ;;  %v550_v16 = vld [vmem:[%s3183_s20 + $0xd8] sm:$0x1] }
  0x44   : > { %1796 = vmatprep.mubr.bf16.mxu1 %v2480_v49  ;;  %1731 = vmatprep.mubr.bf16.mxu0 %v2472_v4  ;;  %v618_v45 = vshll.u32 %v548_v19, 16  ;;  %v2441_v49 = vld [vmem:[%s3183_s20 + $0xc4] sm:$0xf]  ;;  %v749_v62 = vshll.u32 %v2432_v56, 16  ;;  %v760_v3 = vshrl.u32 %v2433_v59, 16  ;;  %v763_v4 = vshll.u32 %v2433_v59, 16 }
  0x45   : > { %2749 = vmatpush3.bf16.msra.mxu0 %v2974_v38  ;;  %v737_v38 = vrot.slane %v735_v33, 5  ;;  %v2482_v54 = vcombine.low %v2440_v46, %v2441_v49  ;;  %v2470_v7 = vcombine.low %v540_v50, %v541_v55  ;;  %v2478_v12 = vcombine.low %v2432_v56, %v2433_v59  ;;  %v551_v18 = vld [vmem:[%s3183_s20 + $0xf8] sm:$0x1]  ;;  %v2443_v26 = vld [vmem:[%s3183_s20 + $0x104] sm:$0xf] }
  0x46   : > { %2789 = vmatpush3.bf16.msra.mxu1 %v2975_v41  ;;  %2838 = vmatprep.subr.bf16.mxu0 %v2976_v58  ;;  %v724_v41 = vor.u32 %v723_v37, %v720_v36  ;;  %v620_v53 = vrot.slane %v618_v45, 5  ;;  %v3473_v11 = vrot.slane %v749_v62, 5  ;;  %v3477_v14 = vrot.slane %v763_v4, 5  ;;  %v542_v28 = vld [vmem:[%s3183_s20 + $0xcc] sm:$0xf] }
  0x47   : > { %2862 = vmatprep.subr.bf16.mxu1 %v2977_v2  ;;  %v738_v47 = vor.u32 %v737_v38, %v734_v13  ;;  %v646_v22 = vshll.u32 %v550_v16, 16  ;;  %v660_v23 = vshll.u32 %v551_v18, 16  ;;  %v543_v29 = vld [vmem:[%s3183_s20 + $0xec] sm:$0xf]  ;;  %v2435_v33 = vld [vmem:[%s3183_s20 + $0x100] sm:$0xf] }
  0x48   : > { %1732 = vmatmul.mubr.bf16.vlgmr.msra.gmra.mrb[16].mxu0 %v2468_v1  ;;  %v3455_v52 = vrot.slane %v724_v41, 4  ;;  %v2985_v1 = vld [vmem:[%s3640_s2 + $0x20] sm:$0xff]   ;;  %v2471_v36 = vcombine.low %v542_v28, %v543_v29  ;;  %v2989_v13 = vld [vmem:[%s3640_s2 + $0x30] sm:$0xff]   ;;  %v1974_v56 = vld [vmem:[%s3183_s20 + $0xc] sm:$0xf] }
  0x49   : > { %2839 = vmatpush3.bf16.msra.mxu0 %v2976_v58  ;;  %1739 = vmatprep.mubr.bf16.mxu0 %v2473_v25  ;;  %v634_v58 = vrot.slane %v632_v48, 5  ;;  %v648_v31 = vrot.slane %v646_v22, 5  ;;  %v662_v32 = vrot.slane %v660_v23, 5  ;;  %v791_v25 = vshll.u32 %v2435_v33, 16  ;;  %v2444_v48 = vld [vmem:[%s3183_s20 + $0x30] sm:$0x1] }
  0x4a   : > { %2840 = vmatprep.subr.bf16.mxu0 %v2978_v0  ;;  %v2445_v49 = vld [vmem:[%s3183_s20 + $0x50] sm:$0x1]  ;;  %v1979_v23 = vld [vmem:[%s3183_s20 + $0xac] sm:$0xf] }
  0x4b   : > { %1797 = vmatmul.mubr.bf16.vlgmr.msra.gmra.mrb[16].mxu1 %v2476_v5  ;;  %v3466_v5 = vrot.slane %v738_v47, 4  ;;  %v649_v38 = vsel %vm3209_vm2, %v3407_v6, %v648_v31  ;;  %v3513_v6 = vrot.slane %v791_v25, 5  ;;  %v696_v47 = vor.u32 %v3424_v17, %v3415_v8  ;;  %v1975_v8 = vld [vmem:[%s3183_s20 + $0x2c] sm:$0xf]  ;;  %v2446_v17 = vld [vmem:[%s3183_s20 + $0x70] sm:$0x1] }
  0x4c   : > { %2863 = vmatpush3.bf16.msra.mxu1 %v2977_v2  ;;  %1804 = vmatprep.mubr.bf16.mxu1 %v2481_v21  ;;  %v621_v2 = vsel %vm3209_vm2, %v3373_v39, %v620_v53  ;;  %v3475_v39 = vrot.slane %v760_v3, 4  ;;  %v704_v21 = vshrl.u32 %v3392_v57, 16  ;;  %v713_v55 = vshll.u32 %v2445_v49, 16  ;;  %v2450_v29 = vld [vmem:[%s3183_s20 + $0xf0] sm:$0x1] }
  0x4d   : > { %2864 = vmatprep.subr.bf16.mxu1 %v2979_v9  ;;  %2841 = vmatpush3.bf16.msra.mxu0 %v2978_v0  ;;  %v635_v0 = vsel %vm3209_vm2, %v3380_v44, %v634_v58  ;;  %v2986_v44 = vld [vmem:[%s3639_s1 + $0x228] sm:$0xff]   ;;  %v2447_v58 = vld [vmem:[%s3183_s20 + $0x90] sm:$0x1]  ;;  %v727_v3 = vshll.u32 %v2446_v17, 16 }
  0x4e   : > { %2842 = vmatprep.subr.bf16.mxu0 %v2980_v24  ;;  %v2474_v10 = vcombine.low %v621_v2, %v635_v0  ;;  %v706_v53 = vrot.slane %v704_v21, 4  ;;  %v766_v59 = vor.u32 %v3477_v14, %v3475_v39  ;;  %v1976_v2 = vld [vmem:[%s3183_s20 + $0x4c] sm:$0xf]  ;;  %v741_v4 = vshll.u32 %v2447_v58, 16  ;;  %v2449_v14 = vld [vmem:[%s3183_s20 + $0xd0] sm:$0x1] }
  0x4f   : > { %v1977_v0 = vld [vmem:[%s3183_s20 + $0x6c] sm:$0xf]  ;;  %v715_v39 = vrot.slane %v713_v55, 5  ;;  %v729_v16 = vrot.slane %v727_v3, 5 }
  0x50   : > { %2865 = vmatpush3.bf16.msra.mxu1 %v2979_v9  ;;  %1740 = vmatmul.mubr.bf16.gmra.mrb[20].mxu0 %v2469_v35  ;;  %v3471_v9 = vrot.slane %v746_v61, 4  ;;  %v2988_v35 = vld [vmem:[%s3639_s1 + $0x230] sm:$0xff]   ;;  %v697_v61 = vrot.slane %v696_v47, 4  ;;  %v743_v18 = vrot.slane %v741_v4, 5  ;;  %v767_v22 = vrot.slane %v766_v59, 4 }
  0x51   : > { %2866 = vmatprep.subr.bf16.mxu1 %v2981_v30  ;;  %2843 = vmatpush3.bf16.msra.mxu0 %v2980_v24  ;;  %v2442_v24 = vld [vmem:[%s3183_s20 + $0xe4] sm:$0xf]  ;;  %v730_v31 = vsel %vm3209_vm2, %v3455_v52, %v729_v16  ;;  %v3016_v47 = vmov 0.0  }
  0x52   : > { %2844 = vmatprep.subr.bf16.mxu0 %v2982_v20  ;;  %1747 = vmatprep.mubr.bf16.mxu0 %v2474_v10  ;;  %v2483_v27 = vcombine.low %v2442_v24, %v2443_v26  ;;  %v752_v50 = vor.u32 %v3473_v11, %v3471_v9  ;;  %386 = vst [vmem:[%s3572_s21] sm:$0x1] %v3016_v47  ;;  %387 = vst [vmem:[%s3580_s24] sm:$0x1] %v3016_v47 }
  0x53   : > { %1805 = vmatmul.mubr.bf16.gmra.mrb[20].mxu1 %v2477_v40  ;;  %v663_v40 = vsel %vm3209_vm2, %v3409_v60, %v662_v32  ;;  %v2991_v60 = vld [vmem:[%s3640_s2 + $0x38] sm:$0xff]   ;;  %v744_v32 = vsel %vm3209_vm2, %v3466_v5, %v743_v18  ;;  %388 = vst [vmem:[%s3587_s9] sm:$0x1] %v3016_v47 }
  0x54   : > { %2867 = vmatpush3.bf16.msra.mxu1 %v2981_v30  ;;  %1812 = vmatprep.mubr.bf16.mxu1 %v2482_v54  ;;  %v2434_v30 = vld [vmem:[%s3183_s20 + $0xe0] sm:$0xf]  ;;  %v2475_v43 = vcombine.low %v649_v38, %v663_v40  ;;  %v707_v54 = vshll.u32 %v3392_v57, 16  ;;  %v2568_v57 = vcombine.low %v1974_v56, %v1975_v8 }
  0x55   : > { %2868 = vmatprep.subr.bf16.mxu1 %v2983_v42  ;;  %2845 = vmatpush3.bf16.msra.mxu0 %v2982_v20  ;;  %v774_v34 = vshrl.u32 %v2434_v30, 16  ;;  %v777_v37 = vshll.u32 %v2434_v30, 16  ;;  %v788_v20 = vshrl.u32 %v2435_v33, 16  ;;  %v2479_v19 = vcombine.low %v2434_v30, %v2435_v33  ;;  %v2451_v30 = vld [vmem:[%s3183_s20 + $0x110] sm:$0x1] }
  0x56   : > { %2846 = vmatprep.subr.bf16.mxu0 %v2984_v51  ;;  %v797_v38 = vshll.u32 %v2451_v30, 16 }
  0x57   : > { %v3506_v41 = vrot.slane %v774_v34, 4  ;;  %v779_v45 = vrot.slane %v777_v37, 5  ;;  %v3511_v46 = vrot.slane %v788_v20, 4  ;;  %v783_v20 = vshll.u32 %v2450_v29, 16 }
  0x58   : > { %2869 = vmatpush3.bf16.msra.mxu1 %v2983_v42  ;;  %1748 = vmatmul.mubr.bf16.gmra.mrb[24].mxu0 %v2470_v7  ;;  %v2990_v42 = vld [vmem:[%s3639_s1 + $0x238] sm:$0xff]   ;;  %v2448_v7 = vld [vmem:[%s3183_s20 + $0xb0] sm:$0x1] }
  0x59   : > { %2870 = vmatprep.subr.bf16.mxu1 %v2985_v1  ;;  %2847 = vmatpush3.bf16.msra.mxu0 %v2984_v51  ;;  %v699_v51 = vshll.u32 %v2444_v48, 16  ;;  %v780_v9 = vor.u32 %v779_v45, %v3506_v41  ;;  %v794_v10 = vor.u32 %v3513_v6, %v3511_v46  ;;  %v755_v21 = vshll.u32 %v2448_v7, 16  ;;  %v1980_v41 = vld [vmem:[%s3183_s20 + $0xcc] sm:$0xf] }
  0x5a   : > { %2848 = vmatprep.subr.bf16.mxu0 %v2986_v44  ;;  %1755 = vmatprep.mubr.bf16.mxu0 %v2475_v43  ;;  %v785_v5 = vrot.slane %v783_v20, 5  ;;  %v799_v43 = vrot.slane %v797_v38, 5 }
  0x5b   : > { %1813 = vmatmul.mubr.bf16.gmra.mrb[24].mxu1 %v2478_v12  ;;  %v701_v62 = vrot.slane %v699_v51, 5  ;;  %v2569_v12 = vcombine.low %v1976_v2, %v1977_v0  ;;  %v757_v33 = vrot.slane %v755_v21, 5  ;;  %v781_v34 = vrot.slane %v780_v9, 4 }
  0x5c   : > { %2871 = vmatpush3.bf16.msra.mxu1 %v2985_v1  ;;  %1820 = vmatprep.mubr.bf16.mxu1 %v2483_v27  ;;  %v709_v1 = vrot.slane %v707_v54, 5  ;;  %v769_v27 = vshll.u32 %v2449_v14, 16  ;;  %v795_v52 = vrot.slane %v794_v10, 4 }
  0x5d   : > { %2872 = vmatprep.subr.bf16.mxu1 %v2987_v15  ;;  %2849 = vmatpush3.bf16.msra.mxu0 %v2986_v44  ;;  %v753_v44 = vrot.slane %v752_v50, 4  ;;  %v702_v24 = vsel %vm3209_vm2, %v697_v61, %v701_v62  ;;  %v786_v45 = vsel %vm3209_vm2, %v781_v34, %v785_v5 }
  0x5e   : > { %2850 = vmatprep.subr.bf16.mxu0 %v2988_v35  ;;  %v710_v11 = vor.u32 %v709_v1, %v706_v53  ;;  %v771_v37 = vrot.slane %v769_v27, 5  ;;  %v800_v46 = vsel %vm3209_vm2, %v795_v52, %v799_v43 }
  0x60   : > { %2873 = vmatpush3.bf16.msra.mxu1 %v2987_v15  ;;  %1756 = vmatmul.mubr.bf16.gmra.mrb[28].mxu0 %v2471_v36  ;;  %v1978_v15 = vld [vmem:[%s3183_s20 + $0x8c] sm:$0xf]  ;;  %v711_v26 = vrot.slane %v710_v11, 4  ;;  %v2485_v36 = vcombine.low %v730_v31, %v744_v32  ;;  %v772_v40 = vsel %vm3209_vm2, %v767_v22, %v771_v37 }
  0x61   : > { %2874 = vmatprep.subr.bf16.mxu1 %v2989_v13  ;;  %2851 = vmatpush3.bf16.msra.mxu0 %v2988_v35  ;;  %v2570_v28 = vcombine.low %v1978_v15, %v1979_v23 }
  0x62   : > { %2852 = vmatprep.subr.bf16.mxu0 %v2990_v42  ;;  %v716_v35 = vsel %vm3209_vm2, %v711_v26, %v715_v39 }
  0x63   : > { %1821 = vmatmul.mubr.bf16.gmra.mrb[28].mxu1 %v2479_v19  ;;  %v2484_v25 = vcombine.low %v702_v24, %v716_v35  ;;  %v1981_v19 = vld [vmem:[%s3183_s20 + $0xec] sm:$0xf]  ;;  %s3566_s20 = scalar_lea.vmem %s3642_s4, %s3654_s27 }
  0x64   : > { %2875 = vmatpush3.bf16.msra.mxu1 %v2989_v13  ;;  %2878 = vmatprep.mubr.bf16.mxu1 %v2568_v57  ;;  %v758_v13 = vsel %vm3209_vm2, %v753_v44, %v757_v33  ;;  %v2571_v6 = vcombine.low %v1980_v41, %v1981_v19  ;;  %385 = vst [vmem:[%s3566_s20] sm:$0x1] %v3016_v47 }
  0x65   : > { %2876 = vmatprep.subr.bf16.mxu1 %v2991_v60  ;;  %2853 = vmatpush3.bf16.msra.mxu0 %v2990_v42  ;;  %v2486_v42 = vcombine.low %v758_v13, %v772_v40 }
  0x66   : > { %2854 = vmatprep.mubr.bf16.mxu0 %v2484_v25 }
  0x68   : > { %2877 = vmatpush3.bf16.msra.mxu1 %v2991_v60  ;;  %2855 = vmatmul.mubr.bf16.vlgmr.msra.gmra.mrb[32].mxu0 %v2485_v36  ;;  %v2487_v60 = vcombine.low %v786_v45, %v800_v46 }
  0x69   : > { %2858 = vmatprep.mubr.bf16.mxu0 %v2486_v42 }
  0x6b   : > { %2879 = vmatmul.mubr.bf16.vlgmr.msra.gmra.mrb[32].mxu1 %v2569_v12 }
  0x6c   : > { %2882 = vmatprep.mubr.bf16.mxu1 %v2570_v28 }
  0x70   : > { %2859 = vmatmul.mubr.bf16.gmra.mrb[36].mxu0 %v2487_v60 }
  0x73   : > { %2883 = vmatmul.mubr.bf16.gmra.mrb[36].mxu1 %v2571_v6 }
  0xfb   : > { %v2670_v63 = vpop.f32.mrb[0].mxu0 }
  0xfc   : > { %v2671_v48 = vpop.f32.mrb[1].mxu0  ;;  %v2710_v54 = vpop.f32.mrb[0].mxu1 }
  0xfd   : > { %v2672_v49 = vadd.f32 %v2671_v48, %v2670_v63  ;;  %v2673_v50 = vpop.f32.mrb[2].mxu0  ;;  %v2711_v55 = vpop.f32.mrb[1].mxu1 }
  0xfe   : > { %v2674_v51 = vpop.f32.mrb[3].mxu0  ;;  %v2712_v56 = vadd.f32 %v2711_v55, %v2710_v54  ;;  %v2713_v8 = vpop.f32.mrb[2].mxu1 }
  0xff   : > { %v2675_v53 = vadd.f32 %v2674_v51, %v2673_v50  ;;  %v2714_v17 = vpop.f32.mrb[3].mxu1 }
 0x100   : > { %v1669_v58 = vadd.f32 %v2712_v56, %v2672_v49  ;;  %v2715_v59 = vadd.f32 %v2714_v17, %v2713_v8 }
 0x102   : > { %v1672_v61 = vadd.f32 %v2715_v59, %v2675_v53 }
 0x103   : > { %v2676_v62 = vpop.f32.mrb[4].mxu0 }
 0x104   : > { %v2677_v1 = vpop.f32.mrb[5].mxu0  ;;  %v2716_v0 = vpop.f32.mrb[4].mxu1 }
 0x105   : > { %v2678_v57 = vadd.f32 %v2677_v1, %v2676_v62  ;;  %v2679_v2 = vpop.f32.mrb[6].mxu0  ;;  %v2717_v7 = vpop.f32.mrb[5].mxu1 }
 0x106   : > { %v2680_v3 = vpop.f32.mrb[7].mxu0  ;;  %v2718_v9 = vadd.f32 %v2717_v7, %v2716_v0  ;;  %v2719_v10 = vpop.f32.mrb[6].mxu1 }
 0x107   : > { %v2681_v4 = vadd.f32 %v2680_v3, %v2679_v2  ;;  %v2720_v11 = vpop.f32.mrb[7].mxu1 }
 0x108   : > { %v1677_v39 = vadd.f32 %v2718_v9, %v2678_v57  ;;  %v2721_v12 = vadd.f32 %v2720_v11, %v2719_v10 }
 0x10a   : > { %v1680_v44 = vadd.f32 %v2721_v12, %v2681_v4 }
 0x10b   : > { %v2682_v14 = vpop.f32.mrb[8].mxu0 }
 0x10c   : > { %v2683_v15 = vpop.f32.mrb[9].mxu0  ;;  %v2722_v23 = vpop.f32.mrb[8].mxu1 }
 0x10d   : > { %v2684_v16 = vadd.f32 %v2683_v15, %v2682_v14  ;;  %v2685_v18 = vpop.f32.mrb[10].mxu0  ;;  %v2723_v24 = vpop.f32.mrb[9].mxu1 }
 0x10e   : > { %v2686_v21 = vpop.f32.mrb[11].mxu0  ;;  %v2724_v26 = vadd.f32 %v2723_v24, %v2722_v23  ;;  %v2725_v27 = vpop.f32.mrb[10].mxu1 }
 0x10f   : > { %v2687_v22 = vadd.f32 %v2686_v21, %v2685_v18  ;;  %v2726_v28 = vpop.f32.mrb[11].mxu1 }
 0x110   : > { %v1685_v29 = vadd.f32 %v2724_v26, %v2684_v16  ;;  %v2727_v30 = vadd.f32 %v2726_v28, %v2725_v27 }
 0x112   : > { %v1688_v32 = vadd.f32 %v2727_v30, %v2687_v22 }
 0x113   : > { %v2688_v31 = vpop.f32.mrb[12].mxu0 }
 0x114   : > { %v2689_v33 = vpop.f32.mrb[13].mxu0 }
 0x115   : > { %v2690_v34 = vadd.f32 %v2689_v33, %v2688_v31  ;;  %v2691_v35 = vpop.f32.mrb[14].mxu0 }
 0x116   : > { %v2692_v36 = vpop.f32.mrb[15].mxu0  ;;  %v2728_v20 = vpop.f32.mrb[12].mxu1 }
 0x117   : > { %v2693_v37 = vadd.f32 %v2692_v36, %v2691_v35  ;;  %v2729_v25 = vpop.f32.mrb[13].mxu1 }
 0x118   : > { %v2730_v13 = vadd.f32 %v2729_v25, %v2728_v20  ;;  %v2731_v52 = vpop.f32.mrb[14].mxu1 }
 0x119   : > { %v2732_v38 = vpop.f32.mrb[15].mxu1 }
 0x11a   : > { %v1693_v40 = vadd.f32 %v2730_v13, %v2690_v34  ;;  %v2733_v5 = vadd.f32 %v2732_v38, %v2731_v52 }
 0x11b   : > { %v2750_v19 = vpop.f32.mrb[16].mxu0 }
 0x11c   : > { %v1696_v41 = vadd.f32 %v2733_v5, %v2693_v37  ;;  %v2751_v43 = vpop.f32.mrb[17].mxu0 }
 0x11d   : > { %v2752_v45 = vadd.f32 %v2751_v43, %v2750_v19  ;;  %v2753_v6 = vpop.f32.mrb[18].mxu0 }
 0x11e   : > { %v2790_v42 = vpop.f32.mrb[16].mxu1  ;;  %v2754_v63 = vpop.f32.mrb[19].mxu0 }
 0x11f   : > { %v2791_v46 = vpop.f32.mrb[17].mxu1  ;;  %v1734_v48 = vadd.f32 %v2752_v45, %v1669_v58  ;;  %v2755_v49 = vadd.f32 %v2754_v63, %v2753_v6 }
 0x120   : > { %v2792_v60 = vadd.f32 %v2791_v46, %v2790_v42  ;;  %v2793_v47 = vpop.f32.mrb[18].mxu1 }
 0x121   : > { %v2794_v50 = vpop.f32.mrb[19].mxu1  ;;  %v1737_v53 = vadd.f32 %v2755_v49, %v1672_v61 }
 0x122   : > { %v2795_v51 = vadd.f32 %v2794_v50, %v2793_v47  ;;  %v3590_v54 = vadd.f32 %v2792_v60, %v1734_v48 }
 0x123   : > { %v2756_v55 = vpop.f32.mrb[20].mxu0 }
 0x124   : > { %v3592_v56 = vadd.f32 %v2795_v51, %v1737_v53  ;;  %v2757_v17 = vpop.f32.mrb[21].mxu0 }
 0x125   : > { %v2758_v59 = vadd.f32 %v2757_v17, %v2756_v55  ;;  %v2759_v1 = vpop.f32.mrb[22].mxu0 }
 0x126   : > { %v2796_v8 = vpop.f32.mrb[20].mxu1  ;;  %v2760_v3 = vpop.f32.mrb[23].mxu0 }
 0x127   : > { %v2797_v62 = vpop.f32.mrb[21].mxu1  ;;  %v1742_v4 = vadd.f32 %v2758_v59, %v1677_v39  ;;  %v2761_v0 = vadd.f32 %v2760_v3, %v2759_v1 }
 0x128   : > { %v2798_v57 = vadd.f32 %v2797_v62, %v2796_v8  ;;  %v2799_v2 = vpop.f32.mrb[22].mxu1 }
 0x129   : > { %v2800_v58 = vpop.f32.mrb[23].mxu1  ;;  %v1745_v9 = vadd.f32 %v2761_v0, %v1680_v44 }
 0x12a   : > { %v2801_v7 = vadd.f32 %v2800_v58, %v2799_v2  ;;  %v1807_v10 = vadd.f32 %v2798_v57, %v1742_v4 }
 0x12b   : > { %v2762_v61 = vpop.f32.mrb[24].mxu0 }
 0x12c   : > { %v1810_v11 = vadd.f32 %v2801_v7, %v1745_v9  ;;  %v2763_v14 = vpop.f32.mrb[25].mxu0 }
 0x12d   : > { %v2764_v15 = vadd.f32 %v2763_v14, %v2762_v61  ;;  %v2765_v18 = vpop.f32.mrb[26].mxu0 }
 0x12e   : > { %v2802_v12 = vpop.f32.mrb[24].mxu1  ;;  %v2766_v23 = vpop.f32.mrb[27].mxu0 }
 0x12f   : > { %v2803_v16 = vpop.f32.mrb[25].mxu1  ;;  %v1750_v24 = vadd.f32 %v2764_v15, %v1685_v29  ;;  %v2767_v26 = vadd.f32 %v2766_v23, %v2765_v18 }
 0x130   : > { %v2804_v21 = vadd.f32 %v2803_v16, %v2802_v12  ;;  %v2805_v22 = vpop.f32.mrb[26].mxu1 }
 0x131   : > { %v2806_v27 = vpop.f32.mrb[27].mxu1  ;;  %v1753_v39 = vadd.f32 %v2767_v26, %v1688_v32 }
 0x132   : > { %v2807_v28 = vadd.f32 %v2806_v27, %v2805_v22  ;;  %v3594_v30 = vadd.f32 %v2804_v21, %v1750_v24 }
 0x133   : > { %v2768_v31 = vpop.f32.mrb[28].mxu0 }
 0x134   : > { %v3596_v44 = vadd.f32 %v2807_v28, %v1753_v39  ;;  %v2769_v34 = vpop.f32.mrb[29].mxu0 }
 0x135   : > { %v2770_v35 = vadd.f32 %v2769_v34, %v2768_v31  ;;  %v2771_v37 = vpop.f32.mrb[30].mxu0 }
 0x136   : > { %v2808_v33 = vpop.f32.mrb[28].mxu1  ;;  %v2772_v13 = vpop.f32.mrb[31].mxu0 }
 0x137   : > { %v2809_v36 = vpop.f32.mrb[29].mxu1  ;;  %v1758_v52 = vadd.f32 %v2770_v35, %v1693_v40  ;;  %v2773_v29 = vadd.f32 %v2772_v13, %v2771_v37 }
 0x138   : > { %v2810_v20 = vadd.f32 %v2809_v36, %v2808_v33  ;;  %v2811_v25 = vpop.f32.mrb[30].mxu1 }
 0x139   : > { %v2812_v38 = vpop.f32.mrb[31].mxu1  ;;  %v1761_v19 = vadd.f32 %v2773_v29, %v1696_v41 }
 0x13a   : > { %v2813_v5 = vadd.f32 %v2812_v38, %v2811_v25  ;;  %v1823_v32 = vadd.f32 %v2810_v20, %v1758_v52 }
 0x13b   : > { %v2856_v60 = vpop.f32.mrb[32].mxu0 }
 0x13c   : > { %v1826_v42 = vadd.f32 %v2813_v5, %v1761_v19  ;;  %v1872_v63 = vadd.f32 %v2856_v60, %v1807_v10  ;;  %v1863_v48 = vpop.f32.mrb[33].mxu0 }
 0x13d   : > { %v1864_v51 = vadd.f32 %v1863_v48, %v3590_v54  ;;  %v2857_v53 = vpop.f32.mrb[34].mxu0 }
 0x13e   : > { %v2880_v43 = vpop.f32.mrb[32].mxu1  ;;  %v1875_v8 = vadd.f32 %v2857_v53, %v1810_v11  ;;  %v1866_v17 = vpop.f32.mrb[35].mxu0  ;;  %v1953_v61 = vmul.f32 %v1872_v63, %v1872_v63 }
 0x13f   : > { %v2104_v45 = vpop.f32.mrb[33].mxu1  ;;  %v2194_v55 = vmul.f32 %v2880_v43, %v2880_v43  ;;  %v1867_v1 = vadd.f32 %v1866_v17, %v3592_v56  ;;  %v1951_v0 = vmul.f32 %v1864_v51, %v1864_v51 }
 0x140   : > { %v2192_v46 = vmul.f32 %v2104_v45, %v2104_v45  ;;  %v2881_v6 = vpop.f32.mrb[34].mxu1  ;;  %v2616_v57 = vpack.c.bf16 %v1875_v8, %v1872_v63  ;;  %v1954_v16 = vmul.f32 %v1875_v8, %v1875_v8 }
 0x141   : > { %v2636_v40 = vpack.c.bf16 %v2881_v6, %v2880_v43  ;;  %v2107_v47 = vpop.f32.mrb[35].mxu1  ;;  %v2195_v2 = vmul.f32 %v2881_v6, %v2881_v6  ;;  %v2611_v58 = vpack.c.bf16 %v1867_v1, %v1864_v51  ;;  %v1935_v7 = vadd.f32 %v1867_v1, %v1864_v51 }
 0x142   : > { %v2631_v41 = vpack.c.bf16 %v2107_v47, %v2104_v45  ;;  %v2176_v49 = vadd.f32 %v2107_v47, %v2104_v45  ;;  %v2193_v50 = vmul.f32 %v2107_v47, %v2107_v47  ;;  %v1952_v9 = vmul.f32 %v1867_v1, %v1867_v1  ;;  %2648 = vst [vmem:[%s3610_s15 + $0x8] sm:$0xff] %v2616_v57  }
 0x143   : > { %2651 = vst [vmem:[%s3602_s13 + $0x8] sm:$0xff] %v2636_v40   ;;  %2612 = vst [vmem:[%s3610_s15] sm:$0xff] %v2611_v58   ;;  %v1936_v56 = vadd.f32 %v1935_v7, %v1872_v63  ;;  %v2860_v21 = vpop.f32.mrb[36].mxu0 }
 0x144   : > { %2632 = vst [vmem:[%s3602_s13] sm:$0xff] %v2631_v41   ;;  %v2177_v59 = vadd.f32 %v2880_v43, %v2176_v49  ;;  %v2200_v62 = vadd.f32 %v2193_v50, %v2192_v46  ;;  %v1959_v18 = vadd.f32 %v1952_v9, %v1951_v0  ;;  %v1888_v24 = vadd.f32 %v2860_v21, %v1823_v32  ;;  %v1879_v26 = vpop.f32.mrb[37].mxu0  ;;  %v2175_v0 = vld [vmem:[%s3580_s24] sm:$0x1] }
 0x145   : > { %v1880_v33 = vadd.f32 %v1879_v26, %v3594_v30  ;;  %v1937_v34 = vadd.f32 %v1936_v56, %v1875_v8  ;;  %v2861_v35 = vpop.f32.mrb[38].mxu0 }
 0x146   : > { %v2201_v54 = vadd.f32 %v2200_v62, %v2194_v55  ;;  %v2884_v3 = vpop.f32.mrb[36].mxu1  ;;  %v2178_v4 = vadd.f32 %v2881_v6, %v2177_v59  ;;  %v1960_v31 = vadd.f32 %v1959_v18, %v1953_v61  ;;  %v1891_v37 = vadd.f32 %v2861_v35, %v1826_v42  ;;  %v1882_v20 = vpop.f32.mrb[39].mxu0 }
 0x147   : > { %v2120_v10 = vpop.f32.mrb[37].mxu1  ;;  %v1938_v13 = vadd.f32 %v1937_v34, %v1880_v33  ;;  %v1955_v52 = vmul.f32 %v1880_v33, %v1880_v33  ;;  %v1883_v38 = vadd.f32 %v1882_v20, %v3596_v44  ;;  %v2198_v5 = vmul.f32 %v2884_v3, %v2884_v3 }
 0x148   : > { %v2179_v11 = vadd.f32 %v2178_v4, %v2120_v10  ;;  %v2196_v12 = vmul.f32 %v2120_v10, %v2120_v10  ;;  %v2202_v14 = vadd.f32 %v2201_v54, %v2195_v2  ;;  %v2885_v15 = vpop.f32.mrb[38].mxu1  ;;  %v1961_v29 = vadd.f32 %v1960_v31, %v1954_v16  ;;  %v1934_v16 = vld [vmem:[%s3566_s20] sm:$0x1] }
 0x149   : > { %v2646_v22 = vpack.c.bf16 %v2885_v15, %v2884_v3  ;;  %v2123_v23 = vpop.f32.mrb[39].mxu1  ;;  %v2626_v19 = vpack.c.bf16 %v1891_v37, %v1888_v24  ;;  %v2621_v45 = vpack.c.bf16 %v1883_v38, %v1880_v33  ;;  %v1939_v46 = vadd.f32 %v1938_v13, %v1883_v38 }
 0x14a   : > { %v2203_v27 = vadd.f32 %v2202_v14, %v2196_v12  ;;  %v2641_v28 = vpack.c.bf16 %v2123_v23, %v2120_v10  ;;  %v2180_v39 = vadd.f32 %v2179_v11, %v2123_v23  ;;  %v2197_v36 = vmul.f32 %v2123_v23, %v2123_v23 }
 0x14b   : > { %2653 = vst [vmem:[%s3602_s13 + $0x18] sm:$0xff] %v2646_v22   ;;  %v1962_v30 = vadd.f32 %v1961_v29, %v1955_v52  ;;  %v1956_v6 = vmul.f32 %v1883_v38, %v1883_v38  ;;  %2650 = vst [vmem:[%s3610_s15 + $0x18] sm:$0xff] %v2626_v19   ;;  %v2199_v42 = vmul.f32 %v2885_v15, %v2885_v15  ;;  %v1950_v22 = vld [vmem:[%s3572_s21] sm:$0x1] }
 0x14c   : > { %2652 = vst [vmem:[%s3602_s13 + $0x10] sm:$0xff] %v2641_v28   ;;  %v2181_v25 = vadd.f32 %v2884_v3, %v2180_v39  ;;  %v2204_v43 = vadd.f32 %v2203_v27, %v2197_v36  ;;  %v1957_v47 = vmul.f32 %v1888_v24, %v1888_v24  ;;  %2649 = vst [vmem:[%s3610_s15 + $0x10] sm:$0xff] %v2621_v45  }
 0x14d   : > { %v1940_v63 = vadd.f32 %v1939_v46, %v1888_v24  ;;  %v1963_v48 = vadd.f32 %v1962_v30, %v1956_v6  ;;  %v1958_v44 = vmul.f32 %v1891_v37, %v1891_v37 }
 0x14e   : > { %v2182_v32 = vadd.f32 %v2885_v15, %v2181_v25  ;;  %v2205_v40 = vadd.f32 %v2204_v43, %v2198_v5  ;;  %v2191_v15 = vld [vmem:[%s3587_s9] sm:$0x1] }
 0x14f   : > { %v1941_v50 = vadd.f32 %v1940_v63, %v1891_v37  ;;  %v1964_v51 = vadd.f32 %v1963_v48, %v1957_v47 }
 0x150   : > { %v2183_v60 = vrot.slane %v2182_v32, 4  ;;  %v2206_v49 = vadd.f32 %v2205_v40, %v2199_v42 }
 0x151   : > { %v1942_v8 = vrot.slane %v1941_v50, 4  ;;  %v1965_v17 = vadd.f32 %v1964_v51, %v1958_v44 }
 0x152   : > { %v2184_v41 = vadd.f32 %v2183_v60, %v2182_v32  ;;  %v2207_v55 = vrot.slane %v2206_v49, 4 }
 0x153   : > { %v1943_v1 = vadd.f32 %v1942_v8, %v1941_v50  ;;  %v1966_v57 = vrot.slane %v1965_v17, 4 }
 0x154   : > { %v2185_v53 = vrot.slane %v2184_v41, 2  ;;  %v2208_v62 = vadd.f32 %v2207_v55, %v2206_v49 }
 0x155   : > { %v1944_v3 = vrot.slane %v1943_v1, 2  ;;  %v1967_v4 = vadd.f32 %v1966_v57, %v1965_v17 }
 0x156   : > { %v2186_v59 = vadd.f32 %v2185_v53, %v2184_v41  ;;  %v2209_v54 = vrot.slane %v2208_v62, 2 }
 0x157   : > { %v1945_v9 = vadd.f32 %v1944_v3, %v1943_v1  ;;  %v1968_v10 = vrot.slane %v1967_v4, 2 }
 0x158   : > { %v2187_v2 = vrot.slane %v2186_v59, 1  ;;  %v2210_v7 = vadd.f32 %v2209_v54, %v2208_v62 }
 0x159   : > { %v1946_v12 = vrot.slane %v1945_v9, 1  ;;  %v1969_v14 = vadd.f32 %v1968_v10, %v1967_v4 }
 0x15a   : > { %v2188_v58 = vadd.f32 %v2187_v2, %v2186_v59  ;;  %v2211_v11 = vrot.slane %v2210_v7, 1 }
 0x15b   : > { %v1947_v18 = vadd.f32 %v1946_v12, %v1945_v9  ;;  %v1970_v21 = vrot.slane %v1969_v14, 1 }
 0x15c   : > { %v2189_v61 = vadd.f32 %v2188_v58, %v2175_v0  ;;  %v2212_v56 = vadd.f32 %v2211_v11, %v2210_v7 }
 0x15d   : > { %v1948_v24 = vadd.f32 %v1947_v18, %v1934_v16  ;;  %v1971_v26 = vadd.f32 %v1970_v21, %v1969_v14 }
 0x15e   : > { %2190 = vst [vmem:[%s3580_s24] sm:$0x1] %v2189_v61  ;;  %v2213_v23 = vadd.f32 %v2212_v56, %v2191_v15 }
 0x15f   : > { %1949 = vst [vmem:[%s3566_s20] sm:$0x1] %v1948_v24  ;;  %v1972_v27 = vadd.f32 %v1971_v26, %v1950_v22 }
 0x160   : > { %2214 = vst [vmem:[%s3587_s9] sm:$0x1] %v2213_v23 }
 0x161   : > { %1973 = vst [vmem:[%s3572_s21] sm:$0x1] %v1972_v27 }
 0x162 PF: > { %s19_s29 = sadd.s32 1, %s3014_s29   ;;  %s3649_s27 = smov %s3010_s28 }
 0x163   : > { %p16_p5 = scmp.ge.s32.totalorder %s19_s29, 4   ;;  %s3650_s28 = smov %s3652_s30 }
 0x165   :  { %18 = sbr.rel (!%p16_p5) target bundleno = 2 (0x2), region = 127 }

// kernel: residual_block_pallas.4
= control target key start
LH: loop header
LB: loop body
LE: loop exit
PB: predicated region body
PF: predicated region fallthrough
CT: control target
= control target key end

     0   :  { %s3046_s27 = smov 0   ;;  %s3048_s28 = smov 0   ;;  %s3830_s0 = inlined_call_operand.vmem [shape: bf16[2,8,8,128], index: 0, kind: input, shape index: {}]   ;;  %s3831_s1 = inlined_call_operand.vmem [shape: f32[2,1,128], index: 1, kind: input, shape index: {}]   ;;  %s3832_s2 = inlined_call_operand.vmem [shape: f32[2,1,128], index: 2, kind: input, shape index: {}]   ;;  %s3833_s3 = inlined_call_operand.vmem [shape: f32[1,128], index: 3, kind: input, shape index: {}]   ;;  %s3834_s4 = inlined_call_operand.vmem [shape: f32[1,128], index: 4, kind: input, shape index: {}]   ;;  %s3835_s5 = inlined_call_operand.vmem [shape: bf16[1152,128], index: 5, kind: input, shape index: {}]   ;;  %s3836_s6 = inlined_call_operand.vmem [shape: bf16[2,8,8,128], index: 6, kind: output, shape index: {0}]   ;;  %s3837_s7 = inlined_call_operand.vmem [shape: f32[2,1,128], index: 7, kind: output, shape index: {1}]   ;;  %s3838_s8 = inlined_call_operand.vmem [shape: f32[2,1,128], index: 8, kind: output, shape index: {2}]  }
   0x1   :  { %s3050_s29 = smov 0  }
   0x2 LB: > { %s31_s30 = sadd.s32 1, %s2993_s28  ;;  %p2436_p0 = scmp.ge.s32.totalorder %s2997_s29, 1  ;;  %s2997_s29 = sphi %s3050_s29, %s19_s29   ;;  %s2993_s28 = sphi %s3048_s28, %s3848_s28   ;;  %s2989_s27 = sphi %s3046_s27, %s3847_s27  }
   0x3   : > { %p33_p1 = scmp.ge.s32.totalorder %s31_s30, 2  ;;  %p285_p2 = scmp.lt.s32.totalorder %s2997_s29, 3 }
   0x5   : > { %s3850_s30 = smov (%p33_p1, %s31_s30), 0  ;;  %p286_p3 = pnand %p2436_p0, %p285_p2 }
   0x6   : > { %v2889_v0 = vld [vmem:[%s3835_s5 + $0xc0] sm:$0xff] (!%p286_p3)   ;;  %v2891_v2 = vld [vmem:[%s3835_s5 + $0xc8] sm:$0xff] (!%p286_p3)   ;;  %v2999_v3 = vmov (!%p286_p3), 0   ;;  %v2895_v7 = vld [vmem:[%s3835_s5 + $0xd0] sm:$0xff] (!%p286_p3)   ;;  %vm380_vm0 = vcmask (!%p286_p3), 1040384   ;;  %p328_p4 = scmp.lt.s32.totalorder (!%p286_p3), %s2989_s27, 1  ;;  %v414_v51 = vlaneseq (!%p286_p3) }
   0x7   : > { %289 = sbr.rel (%p286_p3) target bundleno = 413 (0x19d), region = 44  ;;  %v2890_v1 = vld [vmem:[%s3835_s5 + $0x80] sm:$0xff] (!%p286_p3)   ;;  %2691 = vmatprep.subr.bf16.mxu1 (!%p286_p3), %v2889_v0  ;;  %354 = vst [vmem:[#allocation2 + $0x8] sm:$0xf] (!%p286_p3), %v2999_v3  ;;  %356 = vst [vmem:[#allocation2 + $0x10] sm:$0xf] (!%p286_p3), %v2999_v3 }
   0x8   : > { %352 = vst [vmem:[#allocation2] sm:$0xf] (!%p286_p3), %v2999_v3  ;;  %353 = vst [vmem:[#allocation2 + $0x4] sm:$0x1] (!%p286_p3), %v2999_v3  ;;  %2692 = vmatpush3.bf16.msra.mxu1 (!%p286_p3), %v2890_v1  ;;  %v2892_v4 = vld [vmem:[%s3835_s5 + $0x88] sm:$0xff] (!%p286_p3)   ;;  %v2893_v5 = vld [vmem:[%s3835_s5 + $0x40] sm:$0xff] (!%p286_p3)  }
   0x9   : > { %355 = vst [vmem:[#allocation2 + $0xc] sm:$0x1] (!%p286_p3), %v2999_v3  ;;  %357 = vst [vmem:[#allocation2 + $0x14] sm:$0x1] (!%p286_p3), %v2999_v3  ;;  %2693 = vmatprep.subr.bf16.mxu1 (!%p286_p3), %v2891_v2  ;;  %v2894_v6 = vld [vmem:[%s3835_s5] sm:$0xff] (!%p286_p3)   ;;  %2651 = vmatprep.subr.bf16.mxu0 (!%p286_p3), %v2893_v5  ;;  %v2896_v8 = vld [vmem:[%s3835_s5 + $0x90] sm:$0xff] (!%p286_p3)  }
   0xa   : > { %358 = vst [vmem:[#allocation2 + $0x18] sm:$0xf] (!%p286_p3), %v2999_v3  ;;  %359 = vst [vmem:[#allocation2 + $0x1c] sm:$0x1] (!%p286_p3), %v2999_v3  ;;  %2652 = vmatpush3.bf16.msra.mxu0 (!%p286_p3), %v2894_v6  ;;  %v2897_v9 = vld [vmem:[%s3835_s5 + $0x48] sm:$0xff] (!%p286_p3)   ;;  %v2899_v11 = vld [vmem:[%s3835_s5 + $0xd8] sm:$0xff] (!%p286_p3)  }
   0xb   : > { %360 = vst [vmem:[#allocation2 + $0x20] sm:$0xf] (!%p286_p3), %v2999_v3  ;;  %361 = vst [vmem:[#allocation2 + $0x24] sm:$0x1] (!%p286_p3), %v2999_v3  ;;  %v2898_v10 = vld [vmem:[%s3835_s5 + $0x8] sm:$0xff] (!%p286_p3)   ;;  %2653 = vmatprep.subr.bf16.mxu0 (!%p286_p3), %v2897_v9  ;;  %v2900_v12 = vld [vmem:[%s3835_s5 + $0x98] sm:$0xff] (!%p286_p3)  }
   0xc   : > { %362 = vst [vmem:[#allocation2 + $0x28] sm:$0xf] (!%p286_p3), %v2999_v3  ;;  %363 = vst [vmem:[#allocation2 + $0x2c] sm:$0x1] (!%p286_p3), %v2999_v3  ;;  %2694 = vmatpush3.bf16.msra.mxu1 (!%p286_p3), %v2892_v4  ;;  %v2901_v13 = vld [vmem:[%s3835_s5 + $0x50] sm:$0xff] (!%p286_p3)   ;;  %v2903_v15 = vld [vmem:[%s3835_s5 + $0xe0] sm:$0xff] (!%p286_p3)  }
   0xd   : > { %364 = vst [vmem:[#allocation2 + $0x30] sm:$0xf] (!%p286_p3), %v2999_v3  ;;  %365 = vst [vmem:[#allocation2 + $0x34] sm:$0x1] (!%p286_p3), %v2999_v3  ;;  %2695 = vmatprep.subr.bf16.mxu1 (!%p286_p3), %v2895_v7  ;;  %v2902_v14 = vld [vmem:[%s3835_s5 + $0x10] sm:$0xff] (!%p286_p3)   ;;  %v2904_v16 = vld [vmem:[%s3835_s5 + $0xa0] sm:$0xff] (!%p286_p3)  }
   0xe   : > { %366 = vst [vmem:[#allocation2 + $0x38] sm:$0xf] %v2999_v3  ;;  %367 = vst [vmem:[#allocation2 + $0x3c] sm:$0x1] %v2999_v3  ;;  %2654 = vmatpush3.bf16.msra.mxu0 %v2898_v10  ;;  %v2905_v17 = vld [vmem:[%s3835_s5 + $0x58] sm:$0xff]   ;;  %v2907_v19 = vld [vmem:[%s3835_s5 + $0xe8] sm:$0xff]  }
   0xf   : > { %368 = vst [vmem:[#allocation2 + $0x40] sm:$0xf] %v2999_v3  ;;  %369 = vst [vmem:[#allocation2 + $0x44] sm:$0x1] %v2999_v3  ;;  %2655 = vmatprep.subr.bf16.mxu0 %v2901_v13  ;;  %v2906_v18 = vld [vmem:[%s3835_s5 + $0x18] sm:$0xff]   ;;  %v2908_v20 = vld [vmem:[%s3835_s5 + $0xa8] sm:$0xff]  }
  0x10   : > { %370 = vst [vmem:[#allocation2 + $0x48] sm:$0xf] %v2999_v3  ;;  %371 = vst [vmem:[#allocation2 + $0x4c] sm:$0x1] %v2999_v3  ;;  %2696 = vmatpush3.bf16.msra.mxu1 %v2896_v8  ;;  %v2909_v21 = vld [vmem:[%s3835_s5 + $0x60] sm:$0xff]   ;;  %v2911_v23 = vld [vmem:[%s3835_s5 + $0xf0] sm:$0xff]  }
  0x11   : > { %2697 = vmatprep.subr.bf16.mxu1 %v2899_v11  ;;  %v2910_v22 = vld [vmem:[%s3835_s5 + $0x20] sm:$0xff]   ;;  %v2912_v24 = vld [vmem:[%s3835_s5 + $0xb0] sm:$0xff]   ;;  %v2913_v25 = vld [vmem:[%s3835_s5 + $0x68] sm:$0xff]   ;;  %s3852_s27 = smov (!%p328_p4, %s2989_s27), 1  ;;  %v415_v52 = vshrl.u32 %v414_v51, 7  ;;  %vm553_vm1 = vcmask 1043456  }
  0x12   : > { %2656 = vmatpush3.bf16.msra.mxu0 %v2902_v14  ;;  %v2914_v26 = vld [vmem:[%s3835_s5 + $0x28] sm:$0xff]   ;;  %v2915_v27 = vld [vmem:[%s3835_s5 + $0xf8] sm:$0xff]   ;;  %v2917_v29 = vld [vmem:[%s3835_s5 + $0x70] sm:$0xff]   ;;  %s2591_s13 = sshll.u32 %s3852_s27, 5  ;;  %vm554_vm2 = vsmask.f32 7938  ;;  %s3802_s14 = scalar_lea.vmem %s3837_s7, %s3852_s27 }
  0x13   : > { %2657 = vmatprep.subr.bf16.mxu0 %v2905_v17  ;;  %v2916_v28 = vld [vmem:[%s3835_s5 + $0xb8] sm:$0xff]   ;;  %v2918_v30 = vld [vmem:[%s3835_s5 + $0x30] sm:$0xff]   ;;  %v374_v31 = vld [vmem:[%s3831_s1] sm:$0x1]  ;;  %s3194_s16 = scalar_lea.vmem %s3830_s0, %s2591_s13  ;;  %v416_v57 = vsub.s32 0, %v415_v52  ;;  %vm762_vm4 = vcmask 1042432   ;;  %s3808_s17 = scalar_lea.vmem %s3838_s8, %s3852_s27 }
  0x14   : > { %2698 = vmatpush3.bf16.msra.mxu1 %v2900_v12  ;;  %v375_v32 = vld [vmem:[%s3831_s1 + $0x1] sm:$0x1]  ;;  %v376_v33 = vld [vmem:[%s3832_s2] sm:$0x1]  ;;  %v381_v35 = vsel %vm380_vm0, %v374_v31, 0.0  ;;  %v2922_v45 = vld [vmem:[%s3835_s5 + $0x78] sm:$0xff]   ;;  %s339_s20 = scalar_lea.vmem %s3836_s6, %s2591_s13 }
  0x15   : > { %2699 = vmatprep.subr.bf16.mxu1 %v2903_v15  ;;  %v377_v34 = vld [vmem:[%s3832_s2 + $0x1] sm:$0x1]  ;;  %v382_v36 = vsel %vm380_vm0, %v375_v32, 0.0  ;;  %v384_v37 = vsel %vm380_vm0, %v376_v33, 0.0  ;;  %v2923_v47 = vld [vmem:[%s3835_s5 + $0x38] sm:$0xff]   ;;  %v2645_v56 = vld [vmem:[%s3194_s16 + $0x8] sm:$0xff]  }
  0x16   : > { %2658 = vmatpush3.bf16.msra.mxu0 %v2906_v18  ;;  %v385_v38 = vsel %vm380_vm0, %v377_v34, 0.0  ;;  %v2920_v39 = vld [vmem:[%s3835_s5 + $0x1c0] sm:$0xff]   ;;  %v383_v40 = vadd.f32 %v382_v36, %v381_v35  ;;  %v2646_v58 = vld [vmem:[%s3194_s16 + $0x10] sm:$0xff]   ;;  %v2615_v1 = vunpack.c.l.bf16 %v2645_v56  ;;  %v2616_v3 = vunpack.c.h.bf16 %v2645_v56  ;;  %v562_v56 = vld [vmem:[#allocation2 + $0xc] sm:$0x1] }
  0x17   : > { %2659 = vmatprep.subr.bf16.mxu0 %v2909_v21  ;;  %v386_v41 = vadd.f32 %v385_v38, %v384_v37  ;;  %v2926_v50 = vld [vmem:[%s3835_s5 + $0x140] sm:$0xff]   ;;  %v2619_v4 = vunpack.c.l.bf16 %v2646_v58  ;;  %v2620_v5 = vunpack.c.h.bf16 %v2646_v58  ;;  %vm560_vm3 = vsmask.f32 256  ;;  %vm3233_vm6 = vmand %vm553_vm1, %vm554_vm2 }
  0x18   : > { %2700 = vmatpush3.bf16.msra.mxu1 %v2904_v16  ;;  %v388_v42 = vmul.f32 0.0078125, %v383_v40  ;;  %v378_v53 = vld [vmem:[%s3833_s3] sm:$0x1]  ;;  %v3209_v8 = vld [vmem:[#allocation2 + $0x4] sm:$0x1]  ;;  %vm763_vm5 = vcmask 1046532   ;;  %vm3241_vm7 = vmand %vm380_vm0, %vm560_vm3 }
  0x19   : > { %2701 = vmatprep.subr.bf16.mxu1 %v2907_v19  ;;  %v389_v43 = vmul.f32 0.0078125, %v386_v41  ;;  %v2610_v54 = vld [vmem:[%s3194_s16] sm:$0xff]   ;;  %v767_v21 = vrot.slane %v3209_v8, 5  ;;  %vm623_vm8 = vsmask.f32 3328  ;;  %vm3271_vm10 = vmor %vm762_vm4, %vm763_vm5 }
  0x1a   : > { %2660 = vmatpush3.bf16.msra.mxu0 %v2910_v22  ;;  %v390_v44 = vmul.f32 %v388_v42, %v388_v42  ;;  %v3200_v55 = vld [vmem:[#allocation2] sm:$0xf]  ;;  %v2611_v63 = vunpack.c.l.bf16 %v2610_v54  ;;  %v2612_v0 = vunpack.c.h.bf16 %v2610_v54  ;;  %v565_v54 = vld [vmem:[#allocation2 + $0x10] sm:$0xf]  ;;  %vm624_vm9 = vsmask.f32 7440 }
  0x1b   : > { %2661 = vmatprep.subr.bf16.mxu0 %v2913_v25  ;;  %v627_v60 = vshrl.u32 %v3200_v55, 16  ;;  %v630_v61 = vshll.u32 %v3200_v55, 16  ;;  %v379_v2 = vld [vmem:[%s3834_s4] sm:$0x1]  ;;  %v3215_v14 = vld [vmem:[#allocation2] sm:$0xe]  ;;  %vm3314_vm11 = vmor %vm623_vm8, %vm624_vm9 }
  0x1c   : > { %2702 = vmatpush3.bf16.msra.mxu1 %v2908_v20  ;;  %v391_v46 = vsub.f32 %v389_v43, %v390_v44  ;;  %v2449_v20 = vrot.slane %v3215_v14, 9  ;;  %v2921_v14 = vld [vmem:[%s3835_s5 + $0x180] sm:$0xff]  }
  0x1d   : > { %2703 = vmatprep.subr.bf16.mxu1 %v2911_v23  ;;  %v3211_v9 = vrot.slane %v627_v60, 4  ;;  %v3213_v10 = vrot.slane %v630_v61, 5  ;;  %v636_v23 = vshll.u32 %v3209_v8, 16  ;;  %v568_v61 = vld [vmem:[#allocation2 + $0x14] sm:$0x1] }
  0x1e   : > { %2662 = vmatpush3.bf16.msra.mxu0 %v2914_v26  ;;  %v392_v48 = vmax.f32 %v391_v46, 0.0 }
  0x1f   : > { %2663 = vmatprep.subr.bf16.mxu0 %v2917_v29  ;;  %v633_v22 = vor.u32 %v3213_v10, %v3211_v9 }
  0x20   : > { %2704 = vmatpush3.bf16.msra.mxu1 %v2912_v24  ;;  %v393_v49 = vadd.f32 1e-05, %v392_v48  ;;  %v2647_v24 = vld [vmem:[%s3194_s16 + $0x18] sm:$0xff]  }
  0x21   : > { %2705 = vmatprep.subr.bf16.mxu1 %v2915_v27  ;;  %v2623_v31 = vunpack.c.l.bf16 %v2647_v24  ;;  %v2624_v32 = vunpack.c.h.bf16 %v2647_v24 }
  0x22   : > { %2664 = vmatpush3.bf16.msra.mxu0 %v2918_v30  ;;  %2973 = vrsqrt.f32 %v393_v49 }
  0x23   : > { %2665 = vmatprep.subr.bf16.mxu0 %v2922_v45 }
  0x24   : > { %2706 = vmatpush3.bf16.msra.mxu1 %v2916_v28 }
  0x25   : > { %2771 = vmatprep.subr.bf16.mxu1 %v2920_v39 }
  0x26   : > { %2666 = vmatpush3.bf16.msra.mxu0 %v2923_v47 }
  0x27   : > { %2731 = vmatprep.subr.bf16.mxu0 %v2926_v50 }
  0x2c   : > { %v2974_v59 = vpop.eup %2973 }
  0x2d   : > { %v395_v62 = vmul.f32 %v2974_v59, %v378_v53  ;;  %v556_v53 = vld [vmem:[#allocation2 + $0x8] sm:$0xf] }
  0x2f   : > { %v396_v6 = vmul.f32 %v395_v62, %v388_v42  ;;  %v417_v7 = vrot.slane %v395_v62, %v416_v57 }
  0x31   : > { %v397_v11 = vsub.f32 %v379_v2, %v396_v6  ;;  %v418_v12 = vmul.f32 %v2611_v63, %v417_v7  ;;  %v419_v13 = vmul.f32 %v2612_v0, %v417_v7  ;;  %v420_v15 = vmul.f32 %v2615_v1, %v417_v7  ;;  %v571_v1 = vld [vmem:[#allocation2 + $0x18] sm:$0xf]  ;;  %v577_v2 = vld [vmem:[#allocation2 + $0x20] sm:$0xf] }
  0x32   : > { %v421_v16 = vmul.f32 %v2616_v3, %v417_v7  ;;  %v422_v17 = vmul.f32 %v2619_v4, %v417_v7  ;;  %v423_v18 = vmul.f32 %v2620_v5, %v417_v7  ;;  %v424_v39 = vmul.f32 %v2623_v31, %v417_v7  ;;  %v574_v3 = vld [vmem:[#allocation2 + $0x1c] sm:$0x1] }
  0x33   : > { %v430_v19 = vrot.slane %v397_v11, %v416_v57  ;;  %v425_v40 = vmul.f32 %v2624_v32, %v417_v7  ;;  %v583_v32 = vld [vmem:[#allocation2 + $0x28] sm:$0xf] }
  0x35   : > { %v432_v25 = vadd.f32 %v430_v19, %v418_v12  ;;  %v433_v26 = vadd.f32 %v430_v19, %v419_v13  ;;  %v434_v27 = vadd.f32 %v430_v19, %v420_v15  ;;  %v435_v28 = vadd.f32 %v430_v19, %v421_v16 }
  0x36   : > { %v436_v29 = vadd.f32 %v430_v19, %v422_v17  ;;  %v437_v30 = vadd.f32 %v430_v19, %v423_v18  ;;  %v3227_v47 = vadd.f32 %v430_v19, %v424_v39  ;;  %v3229_v48 = vadd.f32 %v430_v19, %v425_v40  ;;  %v580_v19 = vld [vmem:[#allocation2 + $0x24] sm:$0x1] }
  0x37   : > { %v440_v33 = vmax.f32 %v432_v25, 0.0  ;;  %v441_v34 = vmax.f32 %v433_v26, 0.0  ;;  %v442_v35 = vmax.f32 %v434_v27, 0.0  ;;  %v443_v36 = vmax.f32 %v435_v28, 0.0 }
  0x38   : > { %v444_v37 = vmax.f32 %v436_v29, 0.0  ;;  %v445_v38 = vmax.f32 %v437_v30, 0.0 }
  0x39   : > { %v2593_v41 = vpack.c.bf16 %v440_v33, %v440_v33  ;;  %v2594_v42 = vpack.c.bf16 %v441_v34, %v441_v34  ;;  %v2595_v43 = vpack.c.bf16 %v442_v35, %v442_v35  ;;  %v2596_v44 = vpack.c.bf16 %v443_v36, %v443_v36  ;;  %v586_v33 = vld [vmem:[#allocation2 + $0x2c] sm:$0x1] }
  0x3a   : > { %v3223_v45 = vpack.c.bf16 %v444_v37, %v444_v37  ;;  %v3225_v46 = vpack.c.bf16 %v445_v38, %v445_v38  ;;  %v589_v38 = vld [vmem:[#allocation2 + $0x30] sm:$0xf] }
  0x3b   : > { %v473_v49 = vshrl.u32 %v2593_v41, 16  ;;  %v476_v50 = vshll.u32 %v2593_v41, 16  ;;  %v481_v51 = vshrl.u32 %v2594_v42, 16  ;;  %v484_v52 = vshll.u32 %v2594_v42, 16 }
  0x3c   : > { %v489_v57 = vshrl.u32 %v2595_v43, 16  ;;  %v492_v58 = vshll.u32 %v2595_v43, 16  ;;  %v497_v59 = vshrl.u32 %v2596_v44, 16  ;;  %v500_v60 = vshll.u32 %v2596_v44, 16  ;;  %v592_v43 = vld [vmem:[#allocation2 + $0x34] sm:$0x1] }
  0x3d   : > { %v475_v62 = vrot.slane %v473_v49, 7  ;;  %v483_v63 = vrot.slane %v481_v51, 7  ;;  %v505_v4 = vshrl.u32 %v3223_v45, 16  ;;  %v508_v5 = vshll.u32 %v3223_v45, 16 }
  0x3e   : > { %v491_v7 = vrot.slane %v489_v57, 7  ;;  %v499_v11 = vrot.slane %v497_v59, 7  ;;  %v513_v12 = vshrl.u32 %v3225_v46, 16  ;;  %v516_v13 = vshll.u32 %v3225_v46, 16 }
  0x3f   : > { %v478_v15 = vor.u32 %v476_v50, %v475_v62  ;;  %v479_v16 = vrot.slane %v475_v62, 4  ;;  %v486_v17 = vor.u32 %v484_v52, %v483_v63  ;;  %v487_v18 = vrot.slane %v483_v63, 4 }
  0x40   : > { %v494_v24 = vor.u32 %v492_v58, %v491_v7  ;;  %v495_v25 = vrot.slane %v491_v7, 4  ;;  %v502_v26 = vor.u32 %v500_v60, %v499_v11  ;;  %v503_v27 = vrot.slane %v499_v11, 4 }
  0x41   : > { %v557_v28 = vsel %vm3233_vm6, %v478_v15, %v556_v53  ;;  %v566_v29 = vsel %vm3233_vm6, %v486_v17, %v565_v54  ;;  %v563_v30 = vsel %vm3241_vm7, %v479_v16, %v562_v56  ;;  %v569_v31 = vsel %vm3241_vm7, %v487_v18, %v568_v61 }
  0x42   : > { %558 = vst [vmem:[#allocation2 + $0x8] sm:$0xf] %v557_v28  ;;  %567 = vst [vmem:[#allocation2 + $0x10] sm:$0xf] %v566_v29  ;;  %v572_v34 = vsel %vm3233_vm6, %v494_v24, %v571_v1  ;;  %v578_v35 = vsel %vm3233_vm6, %v502_v26, %v577_v2  ;;  %v575_v36 = vsel %vm3241_vm7, %v495_v25, %v574_v3  ;;  %v507_v37 = vrot.slane %v505_v4, 7 }
  0x43   : > { %564 = vst [vmem:[#allocation2 + $0xc] sm:$0x1] %v563_v30  ;;  %570 = vst [vmem:[#allocation2 + $0x14] sm:$0x1] %v569_v31  ;;  %v515_v39 = vrot.slane %v513_v12, 7  ;;  %v581_v40 = vsel %vm3241_vm7, %v503_v27, %v580_v19  ;;  %v446_v41 = vmax.f32 %v3227_v47, 0.0  ;;  %v768_v61 = vsel %vm3271_vm10, %v2449_v20, %v767_v21 }
  0x44   : > { %573 = vst [vmem:[#allocation2 + $0x18] sm:$0xf] %v572_v34  ;;  %579 = vst [vmem:[#allocation2 + $0x20] sm:$0xf] %v578_v35  ;;  %v447_v42 = vmax.f32 %v3229_v48, 0.0  ;;  %v3267_v44 = vrot.slane %v636_v23, 5  ;;  %v510_v45 = vor.u32 %v508_v5, %v507_v37 }
  0x45   : > { %576 = vst [vmem:[#allocation2 + $0x1c] sm:$0x1] %v575_v36  ;;  %v511_v46 = vrot.slane %v507_v37, 4  ;;  %582 = vst [vmem:[#allocation2 + $0x24] sm:$0x1] %v581_v40  ;;  %v518_v50 = vor.u32 %v516_v13, %v515_v39  ;;  %v519_v51 = vrot.slane %v515_v39, 4  ;;  %v3275_v52 = vpack.c.bf16 %v446_v41, %v446_v41 }
  0x46   : > { %v3277_v47 = vpack.c.bf16 %v447_v42, %v447_v42  ;;  %v584_v48 = vsel %vm3233_vm6, %v510_v45, %v583_v32  ;;  %v3286_v53 = vrot.slane %v633_v22, 4  ;;  %v2924_v21 = vld [vmem:[%s3835_s5 + $0x1c8] sm:$0xff]   ;;  %v3000_v49 = vmov 0.0  }
  0x47   : > { %v587_v23 = vsel %vm3241_vm7, %v511_v46, %v586_v33  ;;  %585 = vst [vmem:[#allocation2 + $0x28] sm:$0xf] %v584_v48  ;;  %v590_v54 = vsel %vm3233_vm6, %v518_v50, %v589_v38  ;;  %v521_v56 = vshrl.u32 %v3275_v52, 16  ;;  %v524_v57 = vshll.u32 %v3275_v52, 16  ;;  %372 = vst [vmem:[%s3802_s14] sm:$0x1] %v3000_v49 }
  0x48   : > { %588 = vst [vmem:[#allocation2 + $0x2c] sm:$0x1] %v587_v23  ;;  %591 = vst [vmem:[#allocation2 + $0x30] sm:$0xf] %v590_v54  ;;  %v529_v58 = vshrl.u32 %v3277_v47, 16  ;;  %v532_v59 = vshll.u32 %v3277_v47, 16  ;;  %v593_v60 = vsel %vm3241_vm7, %v519_v51, %v592_v43  ;;  %v639_v39 = vsel %vm3314_vm11, %v3286_v53, %v3267_v44 }
  0x49   : > { %v797_v9 = vld [vmem:[#allocation2 + $0x8] sm:$0xf]  ;;  %v798_v10 = vld [vmem:[#allocation2 + $0x10] sm:$0xf]  ;;  %594 = vst [vmem:[#allocation2 + $0x34] sm:$0x1] %v593_v60 }
  0x4a   : > { %v616_v22 = vld [vmem:[#allocation2 + $0xc] sm:$0x1]  ;;  %v814_v62 = vshrl.u32 %v797_v9, 16  ;;  %v817_v63 = vshll.u32 %v797_v9, 16  ;;  %v828_v1 = vshrl.u32 %v798_v10, 16  ;;  %v831_v2 = vshll.u32 %v798_v10, 16 }
  0x4b   : > { %v739_v3 = vld [vmem:[#allocation2 + $0x8] sm:$0xe]  ;;  %v2485_v4 = vcombine.low %v797_v9, %v798_v10  ;;  %v771_v7 = vrot.slane %v616_v22, 5  ;;  %v650_v12 = vshll.u32 %v616_v22, 16  ;;  %v799_v25 = vld [vmem:[#allocation2 + $0x18] sm:$0xf] }
  0x4c   : > { %v2450_v5 = vrot.slane %v739_v3, 9  ;;  %v3302_v11 = vld [vmem:[#allocation2 + $0x8] sm:$0xf]  ;;  %v816_v13 = vrot.slane %v814_v62, 4  ;;  %v819_v15 = vrot.slane %v817_v63, 5  ;;  %v830_v8 = vrot.slane %v828_v1, 4 }
  0x4d   : > { %v833_v16 = vrot.slane %v831_v2, 5  ;;  %2007 = vmatprep.mubr.bf16.mxu1 %v2485_v4  ;;  %v641_v18 = vshrl.u32 %v3302_v11, 16  ;;  %v644_v19 = vshll.u32 %v3302_v11, 16  ;;  %v652_v24 = vrot.slane %v650_v12, 5  ;;  %v800_v29 = vld [vmem:[#allocation2 + $0x20] sm:$0xf] }
  0x4e   : > { %v772_v20 = vsel %vm3271_vm10, %v2450_v5, %v771_v7  ;;  %v820_v26 = vor.u32 %v819_v15, %v816_v13  ;;  %v617_v30 = vld [vmem:[#allocation2 + $0x14] sm:$0x1]  ;;  %v3320_v31 = vld [vmem:[#allocation2 + $0x1c] sm:$0x1]  ;;  %v842_v34 = vshrl.u32 %v799_v25, 16  ;;  %v845_v35 = vshll.u32 %v799_v25, 16 }
  0x4f   : > { %v834_v27 = vor.u32 %v833_v16, %v830_v8  ;;  %v2481_v28 = vcombine.low %v768_v61, %v772_v20  ;;  %v643_v32 = vrot.slane %v641_v18, 4  ;;  %v646_v33 = vrot.slane %v644_v19, 5  ;;  %v740_v36 = vld [vmem:[#allocation2 + $0x10] sm:$0xe]  ;;  %v741_v41 = vld [vmem:[#allocation2 + $0x18] sm:$0xe] }
  0x50   : > { %v3322_v37 = vrot.slane %v820_v26, 4  ;;  %v2473_v40 = vcombine.low %v3200_v55, %v3302_v11  ;;  %v3332_v42 = vld [vmem:[#allocation2 + $0x10] sm:$0xf]  ;;  %v2925_v43 = vld [vmem:[%s3835_s5 + $0x188] sm:$0xff]   ;;  %v856_v46 = vshrl.u32 %v800_v29, 16  ;;  %v859_v50 = vshll.u32 %v800_v29, 16 }
  0x51   : > { %v3324_v38 = vrot.slane %v834_v27, 4  ;;  %2008 = vmatmul.mubr.bf16.vlgmr.msra.gmra.mrb[0].mxu1 %v2481_v28  ;;  %v647_v45 = vor.u32 %v646_v33, %v643_v32  ;;  %v2486_v51 = vcombine.low %v799_v25, %v800_v29  ;;  %v3337_v48 = vld [vmem:[#allocation2 + $0x18] sm:$0xf]  ;;  %v3339_v23 = vrot.slane %v842_v34, 4  ;;  %v2930_v54 = vld [vmem:[%s3835_s5 + $0x1d0] sm:$0xff]   ;;  %v2929_v61 = vld [vmem:[%s3835_s5 + $0x100] sm:$0xff]  }
  0x52   : > { %2772 = vmatpush3.bf16.msra.mxu1 %v2921_v14  ;;  %v3341_v44 = vrot.slane %v845_v35, 5  ;;  %v2451_v55 = vrot.slane %v740_v36, 9  ;;  %v775_v53 = vrot.slane %v617_v30, 5  ;;  %v2452_v9 = vrot.slane %v741_v41, 9  ;;  %v2931_v63 = vld [vmem:[%s3835_s5 + $0x190] sm:$0xff]   ;;  %v2932_v7 = vld [vmem:[%s3835_s5 + $0x148] sm:$0xff]  }
  0x53   : > { %2773 = vmatprep.subr.bf16.mxu1 %v2924_v21  ;;  %v648_v60 = vrot.slane %v647_v45, 4  ;;  %2015 = vmatprep.mubr.bf16.mxu1 %v2486_v51  ;;  %v779_v10 = vrot.slane %v3320_v31, 5  ;;  %v655_v22 = vshrl.u32 %v3332_v42, 16  ;;  %v658_v1 = vshll.u32 %v3332_v42, 16  ;;  %v2934_v11 = vld [vmem:[%s3835_s5 + $0x1d8] sm:$0xff]   ;;  %v2933_v28 = vld [vmem:[%s3835_s5 + $0x108] sm:$0xff]  }
  0x54   : > { %v776_v62 = vsel %vm3271_vm10, %v2451_v55, %v775_v53  ;;  %v664_v2 = vshll.u32 %v617_v30, 16  ;;  %v669_v3 = vshrl.u32 %v3337_v48, 16  ;;  %v672_v13 = vshll.u32 %v3337_v48, 16  ;;  %v801_v15 = vld [vmem:[#allocation2 + $0x28] sm:$0xf]  ;;  %v2935_v35 = vld [vmem:[%s3835_s5 + $0x198] sm:$0xff]  }
  0x55   : > { %v653_v4 = vsel %vm3314_vm11, %v648_v60, %v652_v24  ;;  %v780_v5 = vsel %vm3271_vm10, %v2452_v9, %v779_v10  ;;  %v657_v12 = vrot.slane %v655_v22, 4  ;;  %v3369_v16 = vrot.slane %v856_v46, 4  ;;  %v3371_v21 = vld [vmem:[#allocation2 + $0x30] sm:$0xf]  ;;  %v3373_v18 = vld [vmem:[#allocation2 + $0x24] sm:$0x1] }
  0x56   : > { %2774 = vmatpush3.bf16.msra.mxu1 %v2925_v43  ;;  %v2477_v8 = vcombine.low %v639_v39, %v653_v4  ;;  %v2482_v14 = vcombine.low %v776_v62, %v780_v5  ;;  %v660_v20 = vrot.slane %v658_v1, 5  ;;  %v3375_v19 = vrot.slane %v859_v50, 5  ;;  %v3378_v27 = vld [vmem:[#allocation2 + $0x2c] sm:$0x1]  ;;  %v742_v34 = vld [vmem:[#allocation2 + $0x20] sm:$0xe] }
  0x57   : > { %2775 = vmatprep.subr.bf16.mxu1 %v2930_v54  ;;  %v671_v24 = vrot.slane %v669_v3, 4  ;;  %v674_v25 = vrot.slane %v672_v13, 5  ;;  %v678_v26 = vshll.u32 %v3320_v31, 16  ;;  %v666_v30 = vrot.slane %v664_v2, 5  ;;  %v743_v43 = vld [vmem:[#allocation2 + $0x28] sm:$0xe] }
  0x58   : > { %1942 = vmatprep.mubr.bf16.mxu0 %v2477_v8  ;;  %v661_v29 = vor.u32 %v660_v20, %v657_v12  ;;  %v870_v32 = vshrl.u32 %v801_v15, 16  ;;  %v873_v33 = vshll.u32 %v801_v15, 16  ;;  %v2474_v39 = vcombine.low %v3332_v42, %v3337_v48  ;;  %v3389_v45 = vld [vmem:[#allocation2 + $0x20] sm:$0xf]  ;;  %v3404_v9 = vld [vmem:[#allocation2 + $0x28] sm:$0xf] }
  0x59   : > { %2016 = vmatmul.mubr.bf16.gmra.mrb[4].mxu1 %v2482_v14  ;;  %1943 = vmatmul.mubr.bf16.vlgmr.msra.gmra.mrb[0].mxu0 %v2473_v40  ;;  %v675_v31 = vor.u32 %v674_v25, %v671_v24  ;;  %v680_v36 = vrot.slane %v678_v26, 5  ;;  %v2487_v41 = vcombine.low %v801_v15, %v3371_v21  ;;  %v2936_v40 = vld [vmem:[%s3835_s5 + $0x150] sm:$0xff]   ;;  %v884_v51 = vshrl.u32 %v3371_v21, 16  ;;  %v2940_v42 = vld [vmem:[%s3835_s5 + $0x1e0] sm:$0xff]   ;;  %v2942_v12 = vld [vmem:[%s3835_s5 + $0x158] sm:$0xff]   ;;  %373 = vst [vmem:[%s3808_s17] sm:$0x1] %v3000_v49 }
  0x5a   : > { %2776 = vmatpush3.bf16.msra.mxu1 %v2931_v63  ;;  %2732 = vmatpush3.bf16.msra.mxu0 %v2929_v61  ;;  %v662_v46 = vrot.slane %v661_v29, 4  ;;  %v3394_v50 = vrot.slane %v870_v32, 4  ;;  %v887_v55 = vshll.u32 %v3371_v21, 16  ;;  %v3401_v53 = vrot.slane %v873_v33, 5  ;;  %v2939_v5 = vld [vmem:[%s3835_s5 + $0x110] sm:$0xff]   ;;  %v2944_v20 = vld [vmem:[%s3835_s5 + $0x1e8] sm:$0xff]  }
  0x5b   : > { %2777 = vmatprep.subr.bf16.mxu1 %v2934_v11  ;;  %2733 = vmatprep.subr.bf16.mxu0 %v2932_v7  ;;  %v676_v48 = vrot.slane %v675_v31, 4  ;;  %v2453_v54 = vrot.slane %v742_v34, 9  ;;  %v783_v60 = vrot.slane %v3373_v18, 5  ;;  %v2454_v22 = vrot.slane %v743_v43, 9  ;;  %v2941_v11 = vld [vmem:[%s3835_s5 + $0x1a0] sm:$0xff]   ;;  %v2943_v29 = vld [vmem:[%s3835_s5 + $0x118] sm:$0xff]  }
  0x5c   : > { %2023 = vmatprep.mubr.bf16.mxu1 %v2487_v41  ;;  %v667_v10 = vsel %vm3314_vm11, %v662_v46, %v666_v30  ;;  %v787_v61 = vrot.slane %v3378_v27, 5  ;;  %v683_v62 = vshrl.u32 %v3389_v45, 16  ;;  %v686_v2 = vshll.u32 %v3389_v45, 16  ;;  %v595_v24 = vld [vmem:[#allocation2 + $0x38] sm:$0xf] }
  0x5d   : > { %v681_v63 = vsel %vm3314_vm11, %v676_v48, %v680_v36  ;;  %v784_v1 = vsel %vm3271_vm10, %v2453_v54, %v783_v60  ;;  %v692_v3 = vshll.u32 %v3373_v18, 16  ;;  %v697_v15 = vshrl.u32 %v3404_v9, 16  ;;  %v598_v25 = vld [vmem:[#allocation2 + $0x3c] sm:$0x1]  ;;  %v3434_v26 = vld [vmem:[#allocation2 + $0x30] sm:$0xe] }
  0x5e   : > { %2778 = vmatpush3.bf16.msra.mxu1 %v2935_v35  ;;  %2734 = vmatpush3.bf16.msra.mxu0 %v2933_v28  ;;  %v2478_v4 = vcombine.low %v667_v10, %v681_v63  ;;  %v788_v7 = vsel %vm3271_vm10, %v2454_v22, %v787_v61  ;;  %v685_v13 = vrot.slane %v683_v62, 4  ;;  %v3428_v8 = vrot.slane %v884_v51, 4  ;;  %v3444_v34 = vld [vmem:[#allocation2 + $0x34] sm:$0x1]  ;;  %v2945_v35 = vld [vmem:[%s3835_s5 + $0x1a8] sm:$0xff]  }
  0x5f   : > { %2779 = vmatprep.subr.bf16.mxu1 %v2940_v42  ;;  %2735 = vmatprep.subr.bf16.mxu0 %v2936_v40  ;;  %v2483_v14 = vcombine.low %v784_v1, %v788_v7  ;;  %v688_v21 = vrot.slane %v686_v2, 5  ;;  %v700_v18 = vshll.u32 %v3404_v9, 16  ;;  %v3436_v28 = vrot.slane %v887_v55, 5  ;;  %v3453_v46 = vld [vmem:[#allocation2 + $0x30] sm:$0xf] }
  0x60   : > { %1950 = vmatprep.mubr.bf16.mxu0 %v2478_v4  ;;  %v699_v30 = vrot.slane %v697_v15, 4  ;;  %v706_v32 = vshll.u32 %v3378_v27, 16  ;;  %v523_v33 = vrot.slane %v521_v56, 7  ;;  %v694_v36 = vrot.slane %v692_v3, 5  ;;  %v2946_v56 = vld [vmem:[%s3835_s5 + $0x160] sm:$0xff]   ;;  %v2951_v3 = vld [vmem:[%s3835_s5 + $0x1b0] sm:$0xff]  }
  0x61   : > { %1951 = vmatmul.mubr.bf16.gmra.mrb[4].mxu0 %v2474_v39  ;;  %2024 = vmatmul.mubr.bf16.gmra.mrb[8].mxu1 %v2483_v14  ;;  %v689_v31 = vor.u32 %v688_v21, %v685_v13  ;;  %v702_v41 = vrot.slane %v700_v18, 5  ;;  %v3451_v43 = vrot.slane %v529_v58, 7  ;;  %v2475_v27 = vcombine.low %v3389_v45, %v3404_v9  ;;  %v601_v51 = vld [vmem:[#allocation2 + $0x40] sm:$0xf]  ;;  %v2950_v58 = vld [vmem:[%s3835_s5 + $0x1f0] sm:$0xff]   ;;  %v2952_v21 = vld [vmem:[%s3835_s5 + $0x168] sm:$0xff]  }
  0x62   : > { %2736 = vmatpush3.bf16.msra.mxu0 %v2939_v5  ;;  %2780 = vmatpush3.bf16.msra.mxu1 %v2941_v11  ;;  %v526_v39 = vor.u32 %v524_v57, %v523_v33  ;;  %v527_v40 = vrot.slane %v523_v33, 4  ;;  %v2455_v55 = vrot.slane %v3434_v26, 9  ;;  %v708_v54 = vrot.slane %v706_v32, 5  ;;  %v3469_v10 = vld [vmem:[#allocation2 + $0x10] sm:$0xf]  ;;  %v2949_v57 = vld [vmem:[%s3835_s5 + $0x120] sm:$0xff]  }
  0x63   : > { %2737 = vmatprep.subr.bf16.mxu0 %v2942_v12  ;;  %2781 = vmatprep.subr.bf16.mxu1 %v2944_v20  ;;  %v690_v42 = vrot.slane %v689_v31, 4  ;;  %v703_v48 = vor.u32 %v702_v41, %v699_v30  ;;  %v534_v60 = vor.u32 %v532_v59, %v3451_v43  ;;  %v791_v61 = vrot.slane %v3444_v34, 5  ;;  %v3480_v63 = vld [vmem:[#allocation2 + $0x18] sm:$0xf]  ;;  %v3482_v47 = vld [vmem:[#allocation2 + $0x14] sm:$0x1] }
  0x64   : > { %v596_v52 = vsel %vm3233_vm6, %v526_v39, %v595_v24  ;;  %v599_v22 = vsel %vm3241_vm7, %v527_v40, %v598_v25  ;;  %v711_v62 = vshrl.u32 %v3453_v46, 16  ;;  %v714_v4 = vshll.u32 %v3453_v46, 16  ;;  %v3492_v5 = vld [vmem:[#allocation2 + $0x1c] sm:$0x1]  ;;  %v3494_v7 = vld [vmem:[#allocation2 + $0xc] sm:$0x1] }
  0x65   : > { %v695_v59 = vsel %vm3314_vm11, %v690_v42, %v694_v36  ;;  %v704_v1 = vrot.slane %v703_v48, 4  ;;  %597 = vst [vmem:[#allocation2 + $0x38] sm:$0xf] %v596_v52  ;;  %v602_v2 = vsel %vm3233_vm6, %v534_v60, %v601_v51  ;;  %600 = vst [vmem:[#allocation2 + $0x3c] sm:$0x1] %v599_v22  ;;  %v720_v12 = vshll.u32 %v3444_v34, 16 }
  0x66   : > { %2738 = vmatpush3.bf16.msra.mxu0 %v2943_v29  ;;  %2782 = vmatpush3.bf16.msra.mxu1 %v2945_v35  ;;  %603 = vst [vmem:[#allocation2 + $0x40] sm:$0xf] %v602_v2  ;;  %v713_v11 = vrot.slane %v711_v62, 4  ;;  %v999_v0 = vshrl.u32 %v3469_v10, 16  ;;  %v1002_v13 = vshll.u32 %v3469_v10, 16  ;;  %v716_v18 = vrot.slane %v714_v4, 5 }
  0x67   : > { %v3499_v15 = vld [vmem:[#allocation2 + $0x14] sm:$0x1]  ;;  %v3501_v14 = vld [vmem:[#allocation2 + $0x8] sm:$0xe]  ;;  %v709_v20 = vsel %vm3314_vm11, %v704_v1, %v708_v54  ;;  %2739 = vmatprep.subr.bf16.mxu0 %v2946_v56  ;;  %2783 = vmatprep.subr.bf16.mxu1 %v2950_v58  ;;  %v1008_v24 = vshll.u32 %v3482_v47, 16  ;;  %v1013_v25 = vshrl.u32 %v3480_v63, 16  ;;  %v792_v35 = vsel %vm3271_vm10, %v2455_v55, %v791_v61 }
  0x68   : > { %v2479_v26 = vcombine.low %v695_v59, %v709_v20  ;;  %v535_v29 = vrot.slane %v3451_v43, 4  ;;  %v2953_v30 = vld [vmem:[%s3835_s5 + $0x128] sm:$0xff]   ;;  %v2954_v32 = vld [vmem:[%s3835_s5 + $0x1f8] sm:$0xff]   ;;  %v1001_v33 = vrot.slane %v999_v0, 4  ;;  %v1004_v34 = vrot.slane %v1002_v13, 5  ;;  %v2956_v56 = vld [vmem:[%s3835_s5 + $0x170] sm:$0xff]  }
  0x69   : > { %v2955_v31 = vld [vmem:[%s3835_s5 + $0x1b8] sm:$0xff]   ;;  %v717_v36 = vor.u32 %v716_v18, %v713_v11  ;;  %v3522_v41 = vrot.slane %v720_v12, 5  ;;  %v1016_v39 = vshll.u32 %v3480_v63, 16  ;;  %v3528_v40 = vld [vmem:[#allocation2 + $0x20] sm:$0xf]  ;;  %v3530_v51 = vrot.slane %v1008_v24, 5 }
  0x6a   : > { %1958 = vmatprep.mubr.bf16.mxu0 %v2479_v26  ;;  %2740 = vmatpush3.bf16.msra.mxu0 %v2949_v57  ;;  %v1015_v55 = vrot.slane %v1013_v25, 4  ;;  %v1022_v58 = vshll.u32 %v3492_v5, 16  ;;  %v3536_v42 = vld [vmem:[%s3835_s5 + $0x200] sm:$0xff]   ;;  %v823_v48 = vshll.u32 %v3494_v7, 16  ;;  %v837_v52 = vshll.u32 %v3499_v15, 16 }
  0x6b   : > { %1959 = vmatmul.mubr.bf16.gmra.mrb[8].mxu0 %v2475_v27  ;;  %2784 = vmatpush3.bf16.msra.mxu1 %v2951_v3  ;;  %v3542_v54 = vrot.slane %v717_v36, 4  ;;  %v1018_v60 = vrot.slane %v1016_v39, 5  ;;  %v2457_v57 = vrot.slane %v3501_v14, 9  ;;  %v3546_v22 = vld [vmem:[#allocation2 + $0x28] sm:$0xf]  ;;  %v1005_v1 = vor.u32 %v1004_v34, %v1001_v33  ;;  %v2958_v14 = vld [vmem:[%s3835_s5 + $0x130] sm:$0xff]  }
  0x6c   : > { %v803_v61 = vld [vmem:[#allocation2 + $0x38] sm:$0xf]  ;;  %v622_v62 = vld [vmem:[#allocation2 + $0x3c] sm:$0x1]  ;;  %2741 = vmatprep.subr.bf16.mxu0 %v2952_v21  ;;  %2785 = vmatprep.subr.bf16.mxu1 %v2954_v32  ;;  %v2497_v45 = vcombine.low %v3469_v10, %v3480_v63  ;;  %v2498_v9 = vcombine.low %v3528_v40, %v3546_v22  ;;  %v848_v20 = vor.u32 %v3341_v44, %v3339_v23  ;;  %v3631_v10 = vld [vmem:[%s3835_s5 + $0x210] sm:$0xff]  }
  0x6d   : > { %v745_v59 = vld [vmem:[#allocation2 + $0x38] sm:$0xe]  ;;  %v804_v27 = vld [vmem:[#allocation2 + $0x40] sm:$0xf]  ;;  %v898_v2 = vshrl.u32 %v803_v61, 16  ;;  %v901_v3 = vshll.u32 %v803_v61, 16  ;;  %v862_v21 = vor.u32 %v3375_v19, %v3369_v16  ;;  %v723_v25 = vsel %vm3314_vm11, %v3542_v54, %v3522_v41 }
  0x6e   : > { %v2456_v4 = vrot.slane %v745_v59, 9  ;;  %v795_v11 = vrot.slane %v622_v62, 5  ;;  %v912_v12 = vshrl.u32 %v804_v27, 16  ;;  %v2488_v0 = vcombine.low %v803_v61, %v804_v27  ;;  %2742 = vmatpush3.bf16.msra.mxu0 %v2953_v30  ;;  %v3552_v13 = vld [vmem:[#allocation2 + $0x38] sm:$0xf] }
  0x6f   : > { %v915_v18 = vshll.u32 %v804_v27, 16  ;;  %2786 = vmatpush3.bf16.msra.mxu1 %v2955_v31  ;;  %v725_v26 = vshrl.u32 %v3552_v13, 16  ;;  %2743 = vmatprep.subr.bf16.mxu0 %v2956_v56  ;;  %v2961_v30 = vld [vmem:[%s3835_s5 + $0x178] sm:$0xff]   ;;  %v3571_v32 = vrot.slane %v898_v2, 4  ;;  %v3573_v33 = vrot.slane %v901_v3, 5 }
  0x70   : > { %v796_v24 = vsel %vm3271_vm10, %v2456_v4, %v795_v11  ;;  %2031 = vmatprep.mubr.bf16.mxu1 %v2488_v0  ;;  %v728_v31 = vshll.u32 %v3552_v13, 16  ;;  %2847 = vmatprep.subr.bf16.mxu1 %v3536_v42  ;;  %v3577_v36 = vrot.slane %v912_v12, 4  ;;  %v734_v39 = vshll.u32 %v622_v62, 16  ;;  %v926_v56 = vld [vmem:[#allocation2 + $0x10] sm:$0xe]  ;;  %v2962_v2 = vld [vmem:[%s3835_s5 + $0x138] sm:$0xff]  }
  0x71   : > { %v2484_v34 = vcombine.low %v792_v35, %v796_v24  ;;  %v727_v41 = vrot.slane %v725_v26, 4  ;;  %v1006_v54 = vrot.slane %v1005_v1, 4  ;;  %v1019_v59 = vor.u32 %v1018_v60, %v1015_v55  ;;  %v3651_v16 = vld [vmem:[#allocation2 + $0x3c] sm:$0x1] }
  0x72   : > { %v730_v61 = vrot.slane %v728_v31, 5  ;;  %2744 = vmatpush3.bf16.msra.mxu0 %v2958_v14  ;;  %v1024_v27 = vrot.slane %v1022_v58, 5  ;;  %v825_v35 = vrot.slane %v823_v48, 5  ;;  %v736_v3 = vrot.slane %v734_v39, 5  ;;  %v3587_v58 = vld [vmem:[#allocation2 + $0x24] sm:$0x1] }
  0x73   : > { %2032 = vmatmul.mubr.bf16.gmra.mrb[12].mxu1 %v2484_v34  ;;  %v1011_v4 = vsel %vm3314_vm11, %v1006_v54, %v3530_v51  ;;  %2745 = vmatprep.subr.bf16.mxu0 %v2961_v30  ;;  %v839_v11 = vrot.slane %v837_v52, 5  ;;  %v951_v62 = vrot.slane %v3494_v7, 5  ;;  %v1020_v12 = vrot.slane %v1019_v59, 4  ;;  %v3595_v51 = vld [vmem:[#allocation2 + $0x2c] sm:$0x1] }
  0x74   : > { %v731_v1 = vor.u32 %v730_v61, %v727_v41  ;;  %v2458_v0 = vrot.slane %v926_v56, 9  ;;  %v955_v55 = vrot.slane %v3499_v15, 5  ;;  %v3589_v60 = vrot.slane %v915_v18, 5  ;;  %v807_v30 = vld [vmem:[#allocation2 + $0x1c] sm:$0x1]  ;;  %v3615_v31 = vld [vmem:[%s3835_s5 + $0x208] sm:$0xff]  }
  0x75   : > { %v2476_v48 = vcombine.low %v3453_v46, %v3552_v13  ;;  %v952_v14 = vsel %vm3271_vm10, %v2457_v57, %v951_v62  ;;  %v1027_v52 = vshrl.u32 %v3528_v40, 16  ;;  %v1025_v24 = vsel %vm3314_vm11, %v1020_v12, %v1024_v27  ;;  %v927_v54 = vld [vmem:[#allocation2 + $0x18] sm:$0xe]  ;;  %v808_v27 = vld [vmem:[#allocation2 + $0x24] sm:$0x1] }
  0x76   : > { %v732_v7 = vrot.slane %v731_v1, 4  ;;  %2746 = vmatpush3.bf16.msra.mxu0 %v2962_v2  ;;  %v956_v15 = vsel %vm3271_vm10, %v2458_v0, %v955_v55  ;;  %v826_v18 = vsel %vm3314_vm11, %v3322_v37, %v825_v35  ;;  %v2501_v46 = vcombine.low %v1011_v4, %v1025_v24  ;;  %v928_v2 = vld [vmem:[#allocation2 + $0x20] sm:$0xe]  ;;  %v3625_v0 = vld [vmem:[#allocation2 + $0x30] sm:$0xf] }
  0x77   : > { %2823 = vmatprep.subr.bf16.mxu0 %v3536_v42  ;;  %v840_v57 = vsel %vm3314_vm11, %v3324_v38, %v839_v11  ;;  %v1029_v13 = vrot.slane %v1027_v52, 4  ;;  %v1030_v26 = vshll.u32 %v3528_v40, 16  ;;  %v1036_v37 = vshll.u32 %v3587_v58, 16 }
  0x78   : > { %v737_v34 = vsel %vm3314_vm11, %v732_v7, %v736_v3  ;;  %v1041_v41 = vshrl.u32 %v3546_v22, 16  ;;  %v1044_v39 = vshll.u32 %v3546_v22, 16  ;;  %2137 = vmatprep.mubr.bf16.mxu1 %v2501_v46  ;;  %v2493_v56 = vcombine.low %v952_v14, %v956_v15  ;;  %v3641_v15 = vld [vmem:[#allocation2 + $0x34] sm:$0x1] }
  0x79   : > { %v2480_v38 = vcombine.low %v723_v25, %v737_v34  ;;  %v1032_v61 = vrot.slane %v1030_v26, 5  ;;  %v1050_v59 = vshll.u32 %v3595_v51, 16  ;;  %v2489_v35 = vcombine.low %v826_v18, %v840_v57 }
  0x7a   : > { %v1038_v3 = vrot.slane %v1036_v37, 5  ;;  %v1043_v4 = vrot.slane %v1041_v41, 4  ;;  %v1046_v11 = vrot.slane %v1044_v39, 5  ;;  %v2459_v1 = vrot.slane %v927_v54, 9  ;;  %v809_v39 = vld [vmem:[#allocation2 + $0x2c] sm:$0x1] }
  0x7b   : > { %2138 = vmatmul.mubr.bf16.vlgmr.msra.gmra.mrb[16].mxu1 %v2497_v45  ;;  %1966 = vmatprep.mubr.bf16.mxu0 %v2480_v38  ;;  %v1033_v62 = vor.u32 %v1032_v61, %v1029_v13  ;;  %v1052_v25 = vrot.slane %v1050_v59, 5  ;;  %v959_v12 = vrot.slane %v807_v30, 5  ;;  %v2460_v63 = vrot.slane %v928_v2, 9  ;;  %v3645_v13 = vld [vmem:[#allocation2 + $0x38] sm:$0xf] }
  0x7c   : > { %2855 = vmatpush3.bf16.msra.mxu1 %v3536_v42  ;;  %1967 = vmatmul.mubr.bf16.gmra.mrb[12].mxu0 %v2476_v48  ;;  %v1047_v55 = vor.u32 %v1046_v11, %v1043_v4  ;;  %v963_v45 = vrot.slane %v808_v27, 5  ;;  %v849_v14 = vrot.slane %v848_v20, 4  ;;  %v851_v48 = vshll.u32 %v807_v30, 16  ;;  %v3660_v30 = vld [vmem:[%s3835_s5 + $0x218] sm:$0xff]   ;;  %v810_v59 = vld [vmem:[#allocation2 + $0x34] sm:$0x1] }
  0x7d   : > { %2848 = vmatprep.subr.bf16.mxu1 %v3615_v31  ;;  %2072 = vmatprep.mubr.bf16.mxu0 %v2493_v56  ;;  %v1034_v52 = vrot.slane %v1033_v62, 4  ;;  %v960_v7 = vsel %vm3271_vm10, %v2459_v1, %v959_v12  ;;  %v863_v24 = vrot.slane %v862_v21, 4  ;;  %v865_v57 = vshll.u32 %v808_v27, 16  ;;  %v929_v27 = vld [vmem:[#allocation2 + $0x28] sm:$0xe] }
  0x7e   : > { %v1048_v18 = vrot.slane %v1047_v55, 4  ;;  %v964_v46 = vsel %vm3271_vm10, %v2460_v63, %v963_v45  ;;  %v1055_v23 = vshrl.u32 %v3625_v0, 16  ;;  %v853_v26 = vrot.slane %v851_v48, 5  ;;  %v930_v62 = vld [vmem:[#allocation2 + $0x30] sm:$0xe] }
  0x7f   : > { %v1039_v44 = vsel %vm3314_vm11, %v1034_v52, %v1038_v3  ;;  %v2494_v20 = vcombine.low %v960_v7, %v964_v46  ;;  %v1058_v19 = vshll.u32 %v3625_v0, 16  ;;  %v867_v34 = vrot.slane %v865_v57, 5  ;;  %v3690_v57 = vld [vmem:[#allocation2 + $0x40] sm:$0xf] }
  0x80   : > { %2856 = vmatpush3.bf16.msra.mxu1 %v3615_v31  ;;  %v1053_v21 = vsel %vm3314_vm11, %v1048_v18, %v1052_v25  ;;  %v1057_v37 = vrot.slane %v1055_v23, 4  ;;  %v1064_v41 = vshll.u32 %v3641_v15, 16  ;;  %v854_v38 = vsel %vm3314_vm11, %v849_v14, %v853_v26  ;;  %v3679_v14 = vld [vmem:[%s3835_s5 + $0x220] sm:$0xff]  }
  0x81   : > { %2849 = vmatprep.subr.bf16.mxu1 %v3631_v10  ;;  %v2502_v54 = vcombine.low %v1039_v44, %v1053_v21  ;;  %v1060_v56 = vrot.slane %v1058_v19, 5  ;;  %v1069_v61 = vshrl.u32 %v3645_v13, 16  ;;  %v868_v2 = vsel %vm3314_vm11, %v863_v24, %v867_v34 }
  0x82   : > { %v1066_v3 = vrot.slane %v1064_v41, 5  ;;  %v1072_v4 = vshll.u32 %v3645_v13, 16  ;;  %v1078_v11 = vshll.u32 %v3651_v16, 16  ;;  %v2490_v25 = vcombine.low %v854_v38, %v868_v2  ;;  %v3710_v41 = vld [vmem:[#allocation2 + $0x4c] sm:$0x1] }
  0x83   : > { %2145 = vmatprep.mubr.bf16.mxu1 %v2502_v54  ;;  %v1061_v1 = vor.u32 %v1060_v56, %v1057_v37  ;;  %v1071_v12 = vrot.slane %v1069_v61, 4  ;;  %v2499_v55 = vcombine.low %v3625_v0, %v3645_v13  ;;  %v2461_v52 = vrot.slane %v929_v27, 9  ;;  %v811_v2 = vld [vmem:[#allocation2 + $0x3c] sm:$0x1] }
  0x84   : > { %2857 = vmatpush3.bf16.msra.mxu1 %v3631_v10  ;;  %2073 = vmatmul.mubr.bf16.vlgmr.msra.gmra.mrb[16].mxu0 %v2489_v35  ;;  %v1074_v63 = vrot.slane %v1072_v4, 5  ;;  %v1080_v45 = vrot.slane %v1078_v11, 5  ;;  %v967_v7 = vrot.slane %v809_v39, 5  ;;  %v2462_v24 = vrot.slane %v930_v62, 9  ;;  %v3729_v62 = vld [vmem:[%s3835_s5 + $0x230] sm:$0xff]  }
  0x85   : > { %2146 = vmatmul.mubr.bf16.gmra.mrb[20].mxu1 %v2498_v9  ;;  %2824 = vmatpush3.bf16.msra.mxu0 %v3536_v42  ;;  %v1062_v48 = vrot.slane %v1061_v1, 4  ;;  %v971_v35 = vrot.slane %v810_v59, 5  ;;  %v876_v40 = vor.u32 %v3401_v53, %v3394_v50  ;;  %v879_v18 = vshll.u32 %v809_v39, 16  ;;  %v604_v42 = vld [vmem:[#allocation2 + $0x44] sm:$0x1] }
  0x86   : > { %2850 = vmatprep.subr.bf16.mxu1 %v3660_v30  ;;  %2825 = vmatprep.subr.bf16.mxu0 %v3615_v31  ;;  %v1075_v22 = vor.u32 %v1074_v63, %v1071_v12  ;;  %v968_v9 = vsel %vm3271_vm10, %v2461_v52, %v967_v7  ;;  %v890_v46 = vor.u32 %v3436_v28, %v3428_v8  ;;  %v893_v44 = vshll.u32 %v810_v59, 16  ;;  %v3703_v8 = vld [vmem:[%s3835_s5 + $0x228] sm:$0xff]   ;;  %v932_v1 = vld [vmem:[#allocation2 + $0x40] sm:$0xe]  ;;  %v1114_v52 = vld [vmem:[#allocation2 + $0x30] sm:$0xe] }
  0x87   : > { %2080 = vmatprep.mubr.bf16.mxu0 %v2494_v20  ;;  %v1067_v23 = vsel %vm3314_vm11, %v1062_v48, %v1066_v3  ;;  %v972_v50 = vsel %vm3271_vm10, %v2462_v24, %v971_v35  ;;  %v877_v53 = vrot.slane %v876_v40, 4  ;;  %v3697_v20 = vld [vmem:[#allocation2 + $0x48] sm:$0xf]  ;;  %v881_v19 = vrot.slane %v879_v18, 5  ;;  %v1115_v40 = vld [vmem:[#allocation2 + $0x38] sm:$0xe] }
  0x88   : > { %2858 = vmatpush3.bf16.msra.mxu1 %v3660_v30  ;;  %v1076_v26 = vrot.slane %v1075_v22, 4  ;;  %v2495_v28 = vcombine.low %v968_v9, %v972_v50  ;;  %v891_v21 = vrot.slane %v890_v46, 4  ;;  %v895_v34 = vrot.slane %v893_v44, 5 }
  0x89   : > { %2851 = vmatprep.subr.bf16.mxu1 %v3679_v14  ;;  %2826 = vmatpush3.bf16.msra.mxu0 %v3615_v31  ;;  %v605_v37 = vsel %vm3241_vm7, %v535_v29, %v604_v42  ;;  %v1083_v39 = vshrl.u32 %v3690_v57, 16  ;;  %v1086_v54 = vshll.u32 %v3690_v57, 16  ;;  %v882_v31 = vsel %vm3314_vm11, %v877_v53, %v881_v19  ;;  %v931_v29 = vld [vmem:[#allocation2 + $0x38] sm:$0xe]  ;;  %v1116_v42 = vld [vmem:[#allocation2 + $0x40] sm:$0xe] }
  0x8a   : > { %2827 = vmatprep.subr.bf16.mxu0 %v3631_v10  ;;  %v1081_v38 = vsel %vm3314_vm11, %v1076_v26, %v1080_v45  ;;  %606 = vst [vmem:[#allocation2 + $0x44] sm:$0x1] %v605_v37  ;;  %v1097_v43 = vshrl.u32 %v3697_v20, 16  ;;  %v1100_v6 = vshll.u32 %v3697_v20, 16  ;;  %v896_v61 = vsel %vm3314_vm11, %v891_v21, %v895_v34  ;;  %v1110_v21 = vld [vmem:[#allocation2 + $0x10] sm:$0xe] }
  0x8b   : > { %v2503_v56 = vcombine.low %v1067_v23, %v1081_v38  ;;  %v1085_v59 = vrot.slane %v1083_v39, 4  ;;  %v1088_v27 = vrot.slane %v1086_v54, 5  ;;  %v1106_v11 = vshll.u32 %v3710_v41, 16  ;;  %v1111_v38 = vld [vmem:[#allocation2 + $0x18] sm:$0xe] }
  0x8c   : > { %2859 = vmatpush3.bf16.msra.mxu1 %v3679_v14  ;;  %2081 = vmatmul.mubr.bf16.gmra.mrb[20].mxu0 %v2490_v25  ;;  %v1099_v3 = vrot.slane %v1097_v43, 4  ;;  %v1102_v4 = vrot.slane %v1100_v6, 5  ;;  %v2491_v12 = vcombine.low %v882_v31, %v896_v61  ;;  %v2463_v45 = vrot.slane %v931_v29, 9 }
  0x8d   : > { %2852 = vmatprep.subr.bf16.mxu1 %v3703_v8  ;;  %2153 = vmatprep.mubr.bf16.mxu1 %v2503_v56  ;;  %v1089_v63 = vor.u32 %v1088_v27, %v1085_v59  ;;  %v1108_v7 = vrot.slane %v1106_v11, 5  ;;  %v1164_v48 = vrot.slane %v3710_v41, 5  ;;  %v975_v24 = vrot.slane %v811_v2, 5 }
  0x8e   : > { %2828 = vmatpush3.bf16.msra.mxu0 %v3631_v10  ;;  %2154 = vmatmul.mubr.bf16.gmra.mrb[24].mxu1 %v2499_v55  ;;  %v1103_v25 = vor.u32 %v1102_v4, %v1099_v3  ;;  %v3741_v10 = vld [vmem:[%s3835_s5 + $0x238] sm:$0xff]   ;;  %v2464_v35 = vrot.slane %v932_v1, 9  ;;  %v904_v0 = vor.u32 %v3573_v33, %v3571_v32  ;;  %v907_v13 = vshll.u32 %v811_v2, 16  ;;  %v1112_v2 = vld [vmem:[#allocation2 + $0x20] sm:$0xe] }
  0x8f   : > { %2829 = vmatprep.subr.bf16.mxu0 %v3660_v30  ;;  %2088 = vmatprep.mubr.bf16.mxu0 %v2495_v28  ;;  %v918_v55 = vor.u32 %v3589_v60, %v3577_v36  ;;  %v1090_v22 = vrot.slane %v1089_v63, 4  ;;  %v2469_v18 = vrot.slane %v1114_v52, 9  ;;  %v1152_v46 = vrot.slane %v3641_v15, 5  ;;  %v1117_v28 = vld [vmem:[#allocation2 + $0x48] sm:$0xe] }
  0x90   : > { %2860 = vmatpush3.bf16.msra.mxu1 %v3703_v8  ;;  %v1104_v9 = vrot.slane %v1103_v25, 4  ;;  %v2500_v50 = vcombine.low %v3690_v57, %v3697_v20  ;;  %v976_v33 = vsel %vm3271_vm10, %v2463_v45, %v975_v24  ;;  %v905_v36 = vrot.slane %v904_v0, 4 }
  0x91   : > { %2853 = vmatprep.subr.bf16.mxu1 %v3729_v62  ;;  %v996_v23 = vld [vmem:[#allocation2 + $0x44] sm:$0x1]  ;;  %v909_v60 = vrot.slane %v907_v13, 5  ;;  %v919_v57 = vrot.slane %v918_v55, 4  ;;  %v1153_v19 = vsel %vm3271_vm10, %v2469_v18, %v1152_v46  ;;  %v2470_v39 = vrot.slane %v1115_v40, 9 }
  0x92   : > { %2830 = vmatpush3.bf16.msra.mxu0 %v3660_v30  ;;  %v812_v32 = vld [vmem:[#allocation2 + $0x44] sm:$0x1]  ;;  %v1092_v53 = vshll.u32 %v996_v23, 16  ;;  %v1109_v44 = vsel %vm3314_vm11, %v1104_v9, %v1108_v7  ;;  %v1160_v15 = vrot.slane %v996_v23, 5  ;;  %v1156_v54 = vrot.slane %v3651_v16, 5 }
  0x93   : > { %2831 = vmatprep.subr.bf16.mxu0 %v3679_v14  ;;  %v979_v26 = vrot.slane %v812_v32, 5  ;;  %v910_v30 = vsel %vm3314_vm11, %v905_v36, %v909_v60  ;;  %v921_v20 = vshll.u32 %v812_v32, 16  ;;  %v2471_v6 = vrot.slane %v1116_v42, 9  ;;  %v1113_v16 = vld [vmem:[#allocation2 + $0x28] sm:$0xe] }
  0x94   : > { %2861 = vmatpush3.bf16.msra.mxu1 %v3729_v62  ;;  %2089 = vmatmul.mubr.bf16.gmra.mrb[24].mxu0 %v2491_v12  ;;  %v1094_v34 = vrot.slane %v1092_v53, 5  ;;  %v2472_v29 = vrot.slane %v1117_v28, 9  ;;  %v1157_v61 = vsel %vm3271_vm10, %v2470_v39, %v1156_v54  ;;  %v2465_v59 = vrot.slane %v1110_v21, 9 }
  0x95   : > { %2854 = vmatprep.subr.bf16.mxu1 %v3741_v10  ;;  %v980_v37 = vsel %vm3271_vm10, %v2464_v35, %v979_v26  ;;  %v923_v43 = vrot.slane %v921_v20, 5  ;;  %v1136_v27 = vrot.slane %v3482_v47, 5  ;;  %v2507_v4 = vcombine.low %v1153_v19, %v1157_v61 }
  0x96   : > { %2832 = vmatpush3.bf16.msra.mxu0 %v3679_v14  ;;  %v2496_v31 = vcombine.low %v976_v33, %v980_v37  ;;  %v1095_v56 = vsel %vm3314_vm11, %v1090_v22, %v1094_v34  ;;  %v2466_v11 = vrot.slane %v1111_v38, 9  ;;  %v1144_v1 = vrot.slane %v3587_v58, 5 }
  0x97   : > { %2833 = vmatprep.subr.bf16.mxu0 %v3703_v8  ;;  %v2504_v3 = vcombine.low %v1095_v56, %v1109_v44  ;;  %v924_v14 = vsel %vm3314_vm11, %v919_v57, %v923_v43  ;;  %v1148_v12 = vrot.slane %v3595_v51, 5  ;;  %v1137_v47 = vsel %vm3271_vm10, %v2465_v59, %v1136_v27 }
  0x98   : > { %2862 = vmatpush3.bf16.msra.mxu1 %v3741_v10  ;;  %2096 = vmatprep.mubr.bf16.mxu0 %v2496_v31  ;;  %v2492_v63 = vcombine.low %v910_v30, %v924_v14  ;;  %v1140_v45 = vrot.slane %v3492_v5, 5  ;;  %v2467_v52 = vrot.slane %v1112_v2, 9  ;;  %v2468_v25 = vrot.slane %v1113_v16, 9 }
  0x99   : > { %2161 = vmatprep.mubr.bf16.mxu1 %v2504_v3  ;;  %v1161_v17 = vsel %vm3271_vm10, %v2471_v6, %v1160_v15  ;;  %v1165_v58 = vsel %vm3271_vm10, %v2472_v29, %v1164_v48 }
  0x9a   : > { %2834 = vmatpush3.bf16.msra.mxu0 %v3703_v8  ;;  %2162 = vmatmul.mubr.bf16.gmra.mrb[28].mxu1 %v2500_v50  ;;  %v1141_v51 = vsel %vm3271_vm10, %v2466_v11, %v1140_v45  ;;  %v1145_v8 = vsel %vm3271_vm10, %v2467_v52, %v1144_v1  ;;  %v1149_v7 = vsel %vm3271_vm10, %v2468_v25, %v1148_v12 }
  0x9b   : > { %2835 = vmatprep.subr.bf16.mxu0 %v3729_v62  ;;  %2843 = vmatprep.mubr.bf16.mxu1 %v2507_v4  ;;  %v2505_v5 = vcombine.low %v1137_v47, %v1141_v51  ;;  %v2508_v24 = vcombine.low %v1161_v17, %v1165_v58  ;;  %v2506_v41 = vcombine.low %v1145_v8, %v1149_v7 }
  0x9c   : > { %2097 = vmatmul.mubr.bf16.gmra.mrb[28].mxu0 %v2492_v63 }
  0x9d   : > { %2839 = vmatprep.mubr.bf16.mxu0 %v2505_v5 }
  0x9e   : > { %2836 = vmatpush3.bf16.msra.mxu0 %v3729_v62 }
  0x9f   : > { %2837 = vmatprep.subr.bf16.mxu0 %v3741_v10 }
  0xa2   : > { %2838 = vmatpush3.bf16.msra.mxu0 %v3741_v10  ;;  %2844 = vmatmul.mubr.bf16.vlgmr.msra.gmra.mrb[32].mxu1 %v2508_v24 }
  0xa5   : > { %2840 = vmatmul.mubr.bf16.vlgmr.msra.gmra.mrb[32].mxu0 %v2506_v41 }
 0x124   : > { %v2707_v62 = vpop.f32.mrb[0].mxu1 }
 0x125   : > { %v2708_v48 = vpop.f32.mrb[1].mxu1 }
 0x126   : > { %v2709_v10 = vadd.f32 %v2708_v48, %v2707_v62  ;;  %v2710_v35 = vpop.f32.mrb[2].mxu1 }
 0x127   : > { %v2711_v0 = vpop.f32.mrb[3].mxu1 }
 0x128   : > { %v2712_v13 = vadd.f32 %v2711_v0, %v2710_v35 }
 0x12c   : > { %v2713_v55 = vpop.f32.mrb[4].mxu1  ;;  %v2667_v40 = vpop.f32.mrb[0].mxu0 }
 0x12d   : > { %v2714_v22 = vpop.f32.mrb[5].mxu1  ;;  %v2668_v9 = vpop.f32.mrb[1].mxu0 }
 0x12e   : > { %v2715_v18 = vadd.f32 %v2714_v22, %v2713_v55  ;;  %v2716_v46 = vpop.f32.mrb[6].mxu1  ;;  %v2669_v42 = vadd.f32 %v2668_v9, %v2667_v40  ;;  %v2670_v23 = vpop.f32.mrb[2].mxu0 }
 0x12f   : > { %v2717_v50 = vpop.f32.mrb[7].mxu1  ;;  %v2671_v32 = vpop.f32.mrb[3].mxu0 }
 0x130   : > { %v2718_v33 = vadd.f32 %v2717_v50, %v2716_v46  ;;  %v2010_v36 = vadd.f32 %v2709_v10, %v2669_v42  ;;  %v2672_v60 = vadd.f32 %v2671_v32, %v2670_v23 }
 0x132   : > { %v2013_v53 = vadd.f32 %v2712_v13, %v2672_v60 }
 0x134   : > { %v2673_v44 = vpop.f32.mrb[4].mxu0  ;;  %v2719_v15 = vpop.f32.mrb[8].mxu1 }
 0x135   : > { %v2674_v26 = vpop.f32.mrb[5].mxu0  ;;  %v2720_v28 = vpop.f32.mrb[9].mxu1 }
 0x136   : > { %v2675_v30 = vadd.f32 %v2674_v26, %v2673_v44  ;;  %v2676_v57 = vpop.f32.mrb[6].mxu0  ;;  %v2721_v20 = vadd.f32 %v2720_v28, %v2719_v15  ;;  %v2722_v19 = vpop.f32.mrb[10].mxu1 }
 0x137   : > { %v2677_v21 = vpop.f32.mrb[7].mxu0  ;;  %v2723_v34 = vpop.f32.mrb[11].mxu1 }
 0x138   : > { %v2018_v37 = vadd.f32 %v2715_v18, %v2675_v30  ;;  %v2678_v39 = vadd.f32 %v2677_v21, %v2676_v57  ;;  %v2724_v54 = vadd.f32 %v2723_v34, %v2722_v19 }
 0x13a   : > { %v2021_v38 = vadd.f32 %v2718_v33, %v2678_v39 }
 0x13e   : > { %v2679_v31 = vpop.f32.mrb[8].mxu0 }
 0x13f   : > { %v2680_v43 = vpop.f32.mrb[9].mxu0 }
 0x140   : > { %v2681_v6 = vadd.f32 %v2680_v43, %v2679_v31  ;;  %v2682_v29 = vpop.f32.mrb[10].mxu0 }
 0x141   : > { %v2683_v56 = vpop.f32.mrb[11].mxu0 }
 0x142   : > { %v2026_v61 = vadd.f32 %v2721_v20, %v2681_v6  ;;  %v2684_v59 = vadd.f32 %v2683_v56, %v2682_v29 }
 0x144   : > { %v2029_v27 = vadd.f32 %v2724_v54, %v2684_v59 }
 0x146   : > { %v2725_v2 = vpop.f32.mrb[12].mxu1 }
 0x147   : > { %v2726_v16 = vpop.f32.mrb[13].mxu1 }
 0x148   : > { %v2727_v3 = vadd.f32 %v2726_v16, %v2725_v2  ;;  %v2728_v14 = vpop.f32.mrb[14].mxu1 }
 0x149   : > { %v2729_v4 = vpop.f32.mrb[15].mxu1 }
 0x14a   : > { %v2730_v11 = vadd.f32 %v2729_v4, %v2728_v14 }
 0x14e   : > { %v2787_v1 = vpop.f32.mrb[16].mxu1 }
 0x14f   : > { %v2788_v12 = vpop.f32.mrb[17].mxu1  ;;  %v2685_v63 = vpop.f32.mrb[12].mxu0 }
 0x150   : > { %v2789_v47 = vadd.f32 %v2788_v12, %v2787_v1  ;;  %v2790_v45 = vpop.f32.mrb[18].mxu1  ;;  %v2686_v52 = vpop.f32.mrb[13].mxu0 }
 0x151   : > { %v2791_v25 = vpop.f32.mrb[19].mxu1  ;;  %v2687_v17 = vadd.f32 %v2686_v52, %v2685_v63  ;;  %v2688_v58 = vpop.f32.mrb[14].mxu0 }
 0x152   : > { %v2792_v51 = vadd.f32 %v2791_v25, %v2790_v45  ;;  %v2689_v5 = vpop.f32.mrb[15].mxu0 }
 0x153   : > { %v2034_v8 = vadd.f32 %v2727_v3, %v2687_v17  ;;  %v2690_v7 = vadd.f32 %v2689_v5, %v2688_v58 }
 0x155   : > { %v2037_v24 = vadd.f32 %v2730_v11, %v2690_v7 }
 0x157   : > { %v2747_v41 = vpop.f32.mrb[16].mxu0 }
 0x158   : > { %v2793_v49 = vpop.f32.mrb[20].mxu1  ;;  %v2748_v62 = vpop.f32.mrb[17].mxu0 }
 0x159   : > { %v2794_v48 = vpop.f32.mrb[21].mxu1  ;;  %v2749_v10 = vadd.f32 %v2748_v62, %v2747_v41  ;;  %v2750_v35 = vpop.f32.mrb[18].mxu0 }
 0x15a   : > { %v2795_v0 = vadd.f32 %v2794_v48, %v2793_v49  ;;  %v2796_v13 = vpop.f32.mrb[22].mxu1  ;;  %v2751_v55 = vpop.f32.mrb[19].mxu0 }
 0x15b   : > { %v2797_v40 = vpop.f32.mrb[23].mxu1  ;;  %v2075_v22 = vadd.f32 %v2749_v10, %v2010_v36  ;;  %v2752_v9 = vadd.f32 %v2751_v55, %v2750_v35 }
 0x15c   : > { %v2798_v18 = vadd.f32 %v2797_v40, %v2796_v13 }
 0x15d   : > { %v2078_v46 = vadd.f32 %v2752_v9, %v2013_v53  ;;  %v2140_v42 = vadd.f32 %v2789_v47, %v2075_v22 }
 0x15f   : > { %v2753_v23 = vpop.f32.mrb[20].mxu0  ;;  %v2143_v50 = vadd.f32 %v2792_v51, %v2078_v46 }
 0x160   : > { %v2754_v32 = vpop.f32.mrb[21].mxu0 }
 0x161   : > { %v2755_v33 = vadd.f32 %v2754_v32, %v2753_v23  ;;  %v2756_v60 = vpop.f32.mrb[22].mxu0  ;;  %v2799_v44 = vpop.f32.mrb[24].mxu1 }
 0x162   : > { %v2757_v15 = vpop.f32.mrb[23].mxu0  ;;  %v2800_v26 = vpop.f32.mrb[25].mxu1 }
 0x163   : > { %v2083_v28 = vadd.f32 %v2755_v33, %v2018_v37  ;;  %v2758_v30 = vadd.f32 %v2757_v15, %v2756_v60  ;;  %v2801_v57 = vadd.f32 %v2800_v26, %v2799_v44  ;;  %v2802_v20 = vpop.f32.mrb[26].mxu1 }
 0x164   : > { %v2803_v19 = vpop.f32.mrb[27].mxu1 }
 0x165   : > { %v2086_v21 = vadd.f32 %v2758_v30, %v2021_v38  ;;  %v2804_v34 = vadd.f32 %v2803_v19, %v2802_v20  ;;  %v2148_v36 = vadd.f32 %v2795_v0, %v2083_v28 }
 0x167   : > { %v2759_v39 = vpop.f32.mrb[24].mxu0  ;;  %v2151_v54 = vadd.f32 %v2798_v18, %v2086_v21 }
 0x168   : > { %v2760_v53 = vpop.f32.mrb[25].mxu0 }
 0x169   : > { %v2761_v31 = vadd.f32 %v2760_v53, %v2759_v39  ;;  %v2762_v43 = vpop.f32.mrb[26].mxu0 }
 0x16a   : > { %v2763_v6 = vpop.f32.mrb[27].mxu0 }
 0x16b   : > { %v2091_v29 = vadd.f32 %v2761_v31, %v2026_v61  ;;  %v2764_v56 = vadd.f32 %v2763_v6, %v2762_v43 }
 0x16d   : > { %v2094_v59 = vadd.f32 %v2764_v56, %v2029_v27  ;;  %v2805_v2 = vpop.f32.mrb[28].mxu1  ;;  %v2156_v16 = vadd.f32 %v2801_v57, %v2091_v29 }
 0x16e   : > { %v2806_v3 = vpop.f32.mrb[29].mxu1 }
 0x16f   : > { %v2807_v37 = vadd.f32 %v2806_v3, %v2805_v2  ;;  %v2808_v14 = vpop.f32.mrb[30].mxu1  ;;  %v2765_v4 = vpop.f32.mrb[28].mxu0  ;;  %v2159_v11 = vadd.f32 %v2804_v34, %v2094_v59 }
 0x170   : > { %v2809_v1 = vpop.f32.mrb[31].mxu1  ;;  %v2766_v38 = vpop.f32.mrb[29].mxu0 }
 0x171   : > { %v2810_v12 = vadd.f32 %v2809_v1, %v2808_v14  ;;  %v2767_v63 = vadd.f32 %v2766_v38, %v2765_v4  ;;  %v2768_v47 = vpop.f32.mrb[30].mxu0  ;;  %v2275_v4 = vld [vmem:[%s3802_s14] sm:$0x1] }
 0x172   : > { %v2769_v45 = vpop.f32.mrb[31].mxu0  ;;  %v2291_v38 = vld [vmem:[%s3808_s17] sm:$0x1] }
 0x173   : > { %v2099_v52 = vadd.f32 %v2767_v63, %v2034_v8  ;;  %v2770_v25 = vadd.f32 %v2769_v45, %v2768_v47 }
 0x175   : > { %v2164_v17 = vadd.f32 %v2807_v37, %v2099_v52  ;;  %v2845_v61 = vpop.f32.mrb[32].mxu1  ;;  %v2102_v58 = vadd.f32 %v2770_v25, %v2037_v24 }
 0x176   : > { %v2220_v27 = vpop.f32.mrb[33].mxu1 }
 0x177   : > { %v2229_v51 = vadd.f32 %v2845_v61, %v2164_v17  ;;  %v2221_v5 = vadd.f32 %v2220_v27, %v2156_v16  ;;  %v2167_v7 = vadd.f32 %v2810_v12, %v2102_v58  ;;  %v2846_v41 = vpop.f32.mrb[34].mxu1 }
 0x178   : > { %v2841_v49 = vpop.f32.mrb[32].mxu0  ;;  %v2223_v62 = vpop.f32.mrb[35].mxu1 }
 0x179   : > { %v2213_v48 = vadd.f32 %v2841_v49, %v2148_v36  ;;  %v2204_v10 = vpop.f32.mrb[33].mxu0  ;;  %v2232_v35 = vadd.f32 %v2846_v41, %v2167_v7  ;;  %v2224_v0 = vadd.f32 %v2223_v62, %v2159_v11  ;;  %v2296_v30 = vmul.f32 %v2221_v5, %v2221_v5 }
 0x17a   : > { %v2842_v13 = vpop.f32.mrb[34].mxu0  ;;  %v2205_v8 = vadd.f32 %v2204_v10, %v2140_v42  ;;  %v2298_v34 = vmul.f32 %v2229_v51, %v2229_v51 }
 0x17b   : > { %v2216_v55 = vadd.f32 %v2842_v13, %v2151_v54  ;;  %v2207_v24 = vpop.f32.mrb[35].mxu0  ;;  %v2643_v40 = vpack.c.bf16 %v2232_v35, %v2229_v51  ;;  %v2638_v22 = vpack.c.bf16 %v2224_v0, %v2221_v5  ;;  %v2294_v60 = vmul.f32 %v2213_v48, %v2213_v48 }
 0x17c   : > { %v2208_v18 = vadd.f32 %v2207_v24, %v2143_v50  ;;  %v2292_v46 = vmul.f32 %v2205_v8, %v2205_v8  ;;  %v2297_v19 = vmul.f32 %v2224_v0, %v2224_v0  ;;  %v2299_v54 = vmul.f32 %v2232_v35, %v2232_v35 }
 0x17d   : > { %v2633_v9 = vpack.c.bf16 %v2216_v55, %v2213_v48  ;;  %2650 = vst [vmem:[%s339_s20 + $0x18] sm:$0xff] %v2643_v40   ;;  %2649 = vst [vmem:[%s339_s20 + $0x10] sm:$0xff] %v2638_v22   ;;  %v2295_v26 = vmul.f32 %v2216_v55, %v2216_v55 }
 0x17e   : > { %v2628_v23 = vpack.c.bf16 %v2208_v18, %v2205_v8  ;;  %v2276_v32 = vadd.f32 %v2208_v18, %v2205_v8  ;;  %v2293_v33 = vmul.f32 %v2208_v18, %v2208_v18 }
 0x17f   : > { %2648 = vst [vmem:[%s339_s20 + $0x8] sm:$0xff] %v2633_v9  }
 0x180   : > { %2629 = vst [vmem:[%s339_s20] sm:$0xff] %v2628_v23   ;;  %v2277_v44 = vadd.f32 %v2276_v32, %v2213_v48  ;;  %v2300_v15 = vadd.f32 %v2293_v33, %v2292_v46 }
 0x182   : > { %v2278_v28 = vadd.f32 %v2277_v44, %v2216_v55  ;;  %v2301_v42 = vadd.f32 %v2300_v15, %v2294_v60 }
 0x184   : > { %v2279_v57 = vadd.f32 %v2278_v28, %v2221_v5  ;;  %v2302_v20 = vadd.f32 %v2301_v42, %v2295_v26 }
 0x186   : > { %v2280_v21 = vadd.f32 %v2279_v57, %v2224_v0  ;;  %v2303_v50 = vadd.f32 %v2302_v20, %v2296_v30 }
 0x188   : > { %v2281_v36 = vadd.f32 %v2280_v21, %v2229_v51  ;;  %v2304_v39 = vadd.f32 %v2303_v50, %v2297_v19 }
 0x18a   : > { %v2282_v53 = vadd.f32 %v2281_v36, %v2232_v35  ;;  %v2305_v31 = vadd.f32 %v2304_v39, %v2298_v34 }
 0x18c   : > { %v2283_v43 = vrot.slane %v2282_v53, 4  ;;  %v2306_v6 = vadd.f32 %v2305_v31, %v2299_v54 }
 0x18e   : > { %v2284_v29 = vadd.f32 %v2283_v43, %v2282_v53  ;;  %v2307_v56 = vrot.slane %v2306_v6, 4 }
 0x190   : > { %v2285_v59 = vrot.slane %v2284_v29, 2  ;;  %v2308_v2 = vadd.f32 %v2307_v56, %v2306_v6 }
 0x192   : > { %v2286_v16 = vadd.f32 %v2285_v59, %v2284_v29  ;;  %v2309_v3 = vrot.slane %v2308_v2, 2 }
 0x194   : > { %v2287_v37 = vrot.slane %v2286_v16, 1  ;;  %v2310_v14 = vadd.f32 %v2309_v3, %v2308_v2 }
 0x196   : > { %v2288_v11 = vadd.f32 %v2287_v37, %v2286_v16  ;;  %v2311_v1 = vrot.slane %v2310_v14, 1 }
 0x198   : > { %v2289_v12 = vadd.f32 %v2288_v11, %v2275_v4  ;;  %v2312_v63 = vadd.f32 %v2311_v1, %v2310_v14 }
 0x19a   : > { %2290 = vst [vmem:[%s3802_s14] sm:$0x1] %v2289_v12  ;;  %v2313_v47 = vadd.f32 %v2312_v63, %v2291_v38 }
 0x19c   : > { %2314 = vst [vmem:[%s3808_s17] sm:$0x1] %v2313_v47 }
 0x19d PF: > { %s19_s29 = sadd.s32 1, %s2997_s29   ;;  %s3847_s27 = smov %s2993_s28 }
 0x19e   : > { %p16_p5 = scmp.ge.s32.totalorder %s19_s29, 4   ;;  %s3848_s28 = smov %s3850_s30 }
 0x1a0   :  { %18 = sbr.rel (!%p16_p5) target bundleno = 2 (0x2), region = 104 }

</bundles_post_ra>
